<compile_context>
chip_gen: v5e
topology: v5e:2x2
jax: 0.10.0
libtpu: 0.0.40
codegen_flags: <defaults>
</compile_context>

<pallas_src>
import jax
import jax.numpy as jnp
from jax.experimental import pallas as pl
from jax.experimental.pallas import tpu as pltpu

# ----------------------------- config (small, matches module defaults) -----------------------------
D_MODEL = 512     # FeedForward default d_model
D_FF = 2048       # FeedForward default d_ff
BATCH = 2
SEQ = 8
FF_TILE = 512     # d_ff chunk streamed per grid step (multiple of 128)


# ----------------------------- fused SwiGLU kernel (weights streamed over d_ff) -----------------------------
def _swiglu_ffn_kernel(x_ref, w_ref, v_ref, w2_ref, o_ref, acc_ref):
    """x:(TM,D) f32  w:(D,TF) bf16  v:(D,TF) bf16  w2:(TF,D) bf16  ->  o:(TM,D) f32."""
    f = pl.program_id(1)

    @pl.when(f == 0)
    def _():
        acc_ref[...] = jnp.zeros_like(acc_ref)

    x_bf16 = x_ref[...].astype(jnp.bfloat16)
    # gate and up projections for this d_ff chunk, f32 MXU accumulation
    h = jnp.dot(x_bf16, w_ref[...], preferred_element_type=jnp.float32)   # (TM, TF)
    g = jnp.dot(x_bf16, v_ref[...], preferred_element_type=jnp.float32)   # (TM, TF)
    # SiLU + gating in f32 (VPU/EUP; v5e has no bf16 VALU/EUP), bf16 only as MXU operand
    z = (h * jax.nn.sigmoid(h) * g).astype(jnp.bfloat16)
    acc_ref[...] += jnp.dot(z, w2_ref[...], preferred_element_type=jnp.float32)

    @pl.when(f == pl.num_programs(1) - 1)
    def _():
        o_ref[...] = acc_ref[...].astype(o_ref.dtype)                      # lane-dense 512-wide store


def feed_forward(x, w_t, v_t, w2_t, *, row_tile=None, ff_tile=FF_TILE):
    """x: (..., d_model) f32.  w_t/v_t: (d_model, d_ff) bf16.  w2_t: (d_ff, d_model) bf16."""
    lead = x.shape[:-1]
    d_model = x.shape[-1]
    d_ff = w_t.shape[1]
    assert d_ff % ff_tile == 0

    x2 = x.reshape(-1, d_model)
    m = x2.shape[0]

    if row_tile is None:
        # >=16 rows fills a bf16 vreg's sublane packing; cap at 256 so the per-step
        # activations/intermediates stay small on v7x's 64 MiB VMEM.
        row_tile = 256 if m >= 256 else max(16, ((m + 15) // 16) * 16)

    # pad rows so general (batch, seq) shapes work; padded rows are zeros and sliced off
    m_pad = ((m + row_tile - 1) // row_tile) * row_tile
    if m_pad != m:
        x2 = jnp.pad(x2, ((0, m_pad - m), (0, 0)))

    grid = (m_pad // row_tile, d_ff // ff_tile)

    out = pl.pallas_call(
        _swiglu_ffn_kernel,
        grid=grid,
        out_shape=jax.ShapeDtypeStruct((m_pad, d_model), jnp.float32),
        in_specs=[
            # activations: constant across the d_ff axis -> stays resident, no re-DMA
            pl.BlockSpec((row_tile, d_model), lambda i, f: (i, 0)),
            # W^T / V^T: streamed d_ff chunks, pipelined against MXU work
            pl.BlockSpec((d_model, ff_tile), lambda i, f: (0, f)),
            pl.BlockSpec((d_model, ff_tile), lambda i, f: (0, f)),
            # W2^T: streamed d_ff chunks
            pl.BlockSpec((ff_tile, d_model), lambda i, f: (f, 0)),
        ],
        out_specs=pl.BlockSpec((row_tile, d_model), lambda i, f: (i, 0)),
        scratch_shapes=[pltpu.VMEM((row_tile, d_model), jnp.float32)],
        compiler_params=pltpu.CompilerParams(
            dimension_semantics=("parallel", "arbitrary"),
            vmem_limit_bytes=32 * 1024 * 1024,     # valid budget on v5e/v6e/v7x
        ),
    )(x2, w_t, v_t, w2_t)

    if m_pad != m:
        out = out[:m]
    return out.reshape(*lead, d_model)


# ----------------------------- init (deterministic; pre-transposed bf16 weights) -----------------------------
def init_params(key, d_model=D_MODEL, d_ff=D_FF):
    kw, kv, k2 = jax.random.split(key, 3)
    # PyTorch-layout parameters (out_features, in_features), bias=False
    W = jax.random.normal(kw, (d_ff, d_model), jnp.float32) / jnp.sqrt(d_model)
    V = jax.random.normal(kv, (d_ff, d_model), jnp.float32) / jnp.sqrt(d_model)
    W2 = jax.random.normal(k2, (d_model, d_ff), jnp.float32) / jnp.sqrt(d_ff)
    # hoisted once at init: transpose + bf16 cast (MXU operand layout, contiguous d_ff chunks)
    w_t = W.T.astype(jnp.bfloat16)    # (d_model, d_ff)
    v_t = V.T.astype(jnp.bfloat16)    # (d_model, d_ff)
    w2_t = W2.T.astype(jnp.bfloat16)  # (d_ff, d_model)
    return {"W": W, "V": V, "W2": W2, "w_t": w_t, "v_t": v_t, "w2_t": w2_t}


def reference_f32(x, W, V, W2):
    """Plain-JAX f32 replica of the PyTorch forward."""
    h = x @ W.T
    h = h * jax.nn.sigmoid(h)
    g = x @ V.T
    return (h * g) @ W2.T


def reference_bf16_ops(x, w_t, v_t, w2_t):
    """Replica using the same bf16 MXU operands / f32 accumulation as the kernel (tight check)."""
    lead = x.shape[:-1]
    xb = x.reshape(-1, x.shape[-1]).astype(jnp.bfloat16)
    h = jnp.dot(xb, w_t, preferred_element_type=jnp.float32)
    g = jnp.dot(xb, v_t, preferred_element_type=jnp.float32)
    z = (h * jax.nn.sigmoid(h) * g).astype(jnp.bfloat16)
    y = jnp.dot(z, w2_t, preferred_element_type=jnp.float32)
    return y.reshape(*lead, w2_t.shape[1])


# ----------------------------- main -----------------------------
if __name__ == "__main__":
    key = jax.random.PRNGKey(0)
    k_x, k_p = jax.random.split(key)
    x = jax.random.normal(k_x, (BATCH, SEQ, D_MODEL), jnp.float32)
    params = init_params(k_p)

    out = feed_forward(x, params["w_t"], params["v_t"], params["w2_t"])
    out = jax.block_until_ready(out)

    assert out.shape == (BATCH, SEQ, D_MODEL)
    assert bool(jnp.all(jnp.isfinite(out)))

    # Tight check against a reference that emulates the kernel's bf16 operands / f32 accumulation.
    ref_bf16 = reference_bf16_ops(x, params["w_t"], params["v_t"], params["w2_t"])
    assert bool(jnp.allclose(out, ref_bf16, rtol=2e-2, atol=2e-2))

    # Loose check against the exact f32 PyTorch semantics (bf16 weight quantization is intentional).
    ref = reference_f32(x, params["W"], params["V"], params["W2"])
    assert bool(jnp.allclose(out, ref, rtol=1e-1, atol=1e-1))

    print("KERNEL_OK")
</pallas_src>

<mosaic_0001>
module attributes {stable_mosaic.version = 11 : i64} {
  func.func @_swiglu_ffn_kernel(%arg0: i32, %arg1: i32, %arg2: memref<16x512xf32, #tpu.memory_space<vmem>>, %arg3: memref<512x512xbf16, #tpu.memory_space<vmem>>, %arg4: memref<512x512xbf16, #tpu.memory_space<vmem>>, %arg5: memref<512x512xbf16, #tpu.memory_space<vmem>>, %arg6: memref<16x512xf32, #tpu.memory_space<vmem>>, %arg7: memref<16x512xf32, #tpu.memory_space<vmem>>) attributes {dimension_semantics = [#tpu.dimension_semantics<parallel>, #tpu.dimension_semantics<arbitrary>], iteration_bounds = array<i64: 1, 4>, scalar_prefetch = 0 : i64, scratch_operands = 1 : i64, tpu.core_type = #tpu.core_type<tc>, window_params = [{transform_indices = @transform_0, window_bounds = array<i64: 16, 512>}, {transform_indices = @transform_1, window_bounds = array<i64: 512, 512>}, {transform_indices = @transform_2, window_bounds = array<i64: 512, 512>}, {transform_indices = @transform_3, window_bounds = array<i64: 512, 512>}, {transform_indices = @transform_4, window_bounds = array<i64: 16, 512>}]} {
    %c0_i32 = arith.constant 0 : i32
    %0 = arith.cmpi eq, %arg1, %c0_i32 : i32
    %1 = arith.extui %0 : i1 to i32
    %c0_i32_0 = arith.constant 0 : i32
    %2 = arith.cmpi ne, %1, %c0_i32_0 : i32
    scf.if %2 {
      %cst_16 = arith.constant 0.000000e+00 : f32
      %25 = vector.broadcast %cst_16 : f32 to vector<16x512xf32>
      %c0_17 = arith.constant 0 : index
      %c0_18 = arith.constant 0 : index
      %26 = vector.load %arg7[%c0_17, %c0_18] : memref<16x512xf32, #tpu.memory_space<vmem>>, vector<16x512xf32>
      tpu.vector_store %arg7[%c0_17, %c0_18], %25 {strides = array<i32>} : memref<16x512xf32, #tpu.memory_space<vmem>>, vector<16x512xf32>,
    } else {
    }
    %c0 = arith.constant 0 : index
    %c0_1 = arith.constant 0 : index
    %3 = vector.load %arg2[%c0, %c0_1] : memref<16x512xf32, #tpu.memory_space<vmem>>, vector<16x512xf32>
    %4 = arith.truncf %3 : vector<16x512xf32> to vector<16x512xbf16>
    %c0_2 = arith.constant 0 : index
    %c0_3 = arith.constant 0 : index
    %5 = vector.load %arg3[%c0_2, %c0_3] : memref<512x512xbf16, #tpu.memory_space<vmem>>, vector<512x512xbf16>
    %cst = arith.constant dense<0.000000e+00> : vector<16x512xf32>
    %6 = tpu.matmul %4, %5, %cst {dimension_numbers = #tpu.dot_dimension_numbers<[1], [0], [0], [1], [0, 0, 1, 1], [], []>} : vector<16x512xbf16>, vector<512x512xbf16>, vector<16x512xf32> -> vector<16x512xf32>
    %c0_4 = arith.constant 0 : index
    %c0_5 = arith.constant 0 : index
    %7 = vector.load %arg4[%c0_4, %c0_5] : memref<512x512xbf16, #tpu.memory_space<vmem>>, vector<512x512xbf16>
    %cst_6 = arith.constant dense<0.000000e+00> : vector<16x512xf32>
    %8 = tpu.matmul %4, %7, %cst_6 {dimension_numbers = #tpu.dot_dimension_numbers<[1], [0], [0], [1], [0, 0, 1, 1], [], []>} : vector<16x512xbf16>, vector<512x512xbf16>, vector<16x512xf32> -> vector<16x512xf32>
    %9 = arith.negf %6 : vector<16x512xf32>
    %10 = math.exp %9 : vector<16x512xf32>
    %cst_7 = arith.constant 1.000000e+00 : f32
    %11 = vector.broadcast %cst_7 : f32 to vector<16x512xf32>
    %12 = arith.addf %11, %10 : vector<16x512xf32>
    %13 = arith.divf %11, %12 : vector<16x512xf32>
    %14 = arith.mulf %6, %13 : vector<16x512xf32>
    %15 = arith.mulf %14, %8 : vector<16x512xf32>
    %16 = arith.truncf %15 : vector<16x512xf32> to vector<16x512xbf16>
    %c0_8 = arith.constant 0 : index
    %c0_9 = arith.constant 0 : index
    %17 = vector.load %arg7[%c0_8, %c0_9] : memref<16x512xf32, #tpu.memory_space<vmem>>, vector<16x512xf32>
    %c0_10 = arith.constant 0 : index
    %c0_11 = arith.constant 0 : index
    %18 = vector.load %arg5[%c0_10, %c0_11] : memref<512x512xbf16, #tpu.memory_space<vmem>>, vector<512x512xbf16>
    %cst_12 = arith.constant dense<0.000000e+00> : vector<16x512xf32>
    %19 = tpu.matmul %16, %18, %cst_12 {dimension_numbers = #tpu.dot_dimension_numbers<[1], [0], [0], [1], [0, 0, 1, 1], [], []>} : vector<16x512xbf16>, vector<512x512xbf16>, vector<16x512xf32> -> vector<16x512xf32>
    %20 = arith.addf %17, %19 : vector<16x512xf32>
    %c0_13 = arith.constant 0 : index
    %c0_14 = arith.constant 0 : index
    %21 = vector.load %arg7[%c0_13, %c0_14] : memref<16x512xf32, #tpu.memory_space<vmem>>, vector<16x512xf32>
    tpu.vector_store %arg7[%c0_13, %c0_14], %20 {strides = array<i32>} : memref<16x512xf32, #tpu.memory_space<vmem>>, vector<16x512xf32>,
    %c3_i32 = arith.constant 3 : i32
    %22 = arith.cmpi eq, %arg1, %c3_i32 : i32
    %23 = arith.extui %22 : i1 to i32
    %c0_i32_15 = arith.constant 0 : i32
    %24 = arith.cmpi ne, %23, %c0_i32_15 : i32
    scf.if %24 {
      %c0_16 = arith.constant 0 : index
      %c0_17 = arith.constant 0 : index
      %25 = vector.load %arg7[%c0_16, %c0_17] : memref<16x512xf32, #tpu.memory_space<vmem>>, vector<16x512xf32>
      %c0_18 = arith.constant 0 : index
      %c0_19 = arith.constant 0 : index
      %26 = vector.load %arg6[%c0_18, %c0_19] : memref<16x512xf32, #tpu.memory_space<vmem>>, vector<16x512xf32>
      tpu.vector_store %arg6[%c0_18, %c0_19], %25 {strides = array<i32>} : memref<16x512xf32, #tpu.memory_space<vmem>>, vector<16x512xf32>,
    } else {
    }
    return
  }
  func.func @transform_0(%arg0: i32, %arg1: i32) -> (i32, i32) {
    %c0_i32 = arith.constant 0 : i32
    %c0_i32_0 = arith.constant 0 : i32
    return %arg0, %c0_i32 : i32, i32
  }
  func.func @transform_1(%arg0: i32, %arg1: i32) -> (i32, i32) {
    %c0_i32 = arith.constant 0 : i32
    %c0_i32_0 = arith.constant 0 : i32
    return %c0_i32, %arg1 : i32, i32
  }
  func.func @transform_2(%arg0: i32, %arg1: i32) -> (i32, i32) {
    %c0_i32 = arith.constant 0 : i32
    %c0_i32_0 = arith.constant 0 : i32
    return %c0_i32, %arg1 : i32, i32
  }
  func.func @transform_3(%arg0: i32, %arg1: i32) -> (i32, i32) {
    %c0_i32 = arith.constant 0 : i32
    %c0_i32_0 = arith.constant 0 : i32
    return %arg1, %c0_i32 : i32, i32
  }
  func.func @transform_4(%arg0: i32, %arg1: i32) -> (i32, i32) {
    %c0_i32 = arith.constant 0 : i32
    %c0_i32_0 = arith.constant 0 : i32
    return %arg0, %c0_i32 : i32, i32
  }
}

</mosaic_0001>

<bundles_post_ra>
// kernel: tpu_custom_call.1
= control target key start
LH: loop header
LB: loop body
LE: loop exit
PB: predicated region body
PF: predicated region fallthrough
CT: control target
= control target key end

     0   :  { %s7335_s0 = inlined_call_operand.hbm [shape: f32[16,512], index: 0, kind: input, shape index: {}]   ;;  %s7336_s1 = inlined_call_operand.hbm [shape: bf16[512,2048], index: 1, kind: input, shape index: {}]   ;;  %s7337_s2 = inlined_call_operand.hbm [shape: bf16[512,2048], index: 2, kind: input, shape index: {}]   ;;  %s7338_s3 = inlined_call_operand.hbm [shape: bf16[2048,512], index: 3, kind: input, shape index: {}]   ;;  %s7339_s4 = inlined_call_operand.hbm [shape: f32[16,512], index: 4, kind: output, shape index: {}]  }
   0x1   :  { %7342 = sst [smem:[#allocation18_spill]] %s7335_s0 }
   0x2   :  { %7343 = sst [smem:[#allocation19_spill]] %s7336_s1 }
   0x3   :  { %7344 = sst [smem:[#allocation20_spill]] %s7337_s2 }
   0x4   :  { %9 = vsyncpa [#allocation4], 0 }
   0x5   :  { %10 = vsyncpa [#allocation7], 0 }
   0x6   :  { %12 = vsyncpa [#allocation7 + $0x1], 0 }
   0x7   :  { %13 = vsyncpa [#allocation10], 0 }
   0x8   :  { %15 = vsyncpa [#allocation10 + $0x1], 0 }
   0x9   :  { %16 = vsyncpa [#allocation5], 0  ;;  %s6012_s15 = smov 0   ;;  %s6014_s16 = smov 0  }
   0xa   :  { %s6016_s17 = smov 0   ;;  %s6018_s18 = smov 0  }
   0xb   :  { %s6020_s19 = smov 0   ;;  %s6022_s20 = smov 0  }
   0xc LB: > { %s31_s21 = sadd.s32 1, %s5971_s19  ;;  %s67_s22 = sadd.s32 1, %s5963_s17  ;;  %s5975_s20 = sphi %s6022_s20, %s22_s20   ;;  %s5971_s19 = sphi %s6020_s19, %s7391_s19   ;;  %s5967_s18 = sphi %s6018_s18, %s7390_s18   ;;  %s5963_s17 = sphi %s6016_s17, %s7389_s17   ;;  %s5959_s16 = sphi %s6014_s16, %s7388_s16   ;;  %s5955_s15 = sphi %s6012_s15, %s7387_s15  }
   0xd   : > { %p32_p0 = scmp.ge.s32.totalorder %s31_s21, 4  ;;  %p74_p1 = scmp.ne.s32.totalorder %s5963_s17, %s5959_s16 }
   0xe   : > { %p75_p2 = scmp.eq.s32.totalorder %s5975_s20, 0  ;;  %p5671_p4 = scmp.lt.s32.totalorder %s5975_s20, 4 }
   0xf   : > { %s7393_s21 = smov (%p32_p0, %s31_s21), 0  ;;  %s200_s25 = sand.u32 1, %s5975_s20  }
  0x10   : > { %7345 = sst [smem:[#allocation16_spill]] %s7393_s21  ;;  %p6049_p3 = por %p75_p2, %p74_p1 }
  0x11   : > { %s64_s24 = ssub.s32 %s5971_s19, %s7393_s21  ;;  %s7340_s26 = sand.u32 1, %s5963_s17  }
  0x12   : > { %p65_p5 = scmp.eq.s32.totalorder %s64_s24, 0  ;;  %s5254_s27 = sshll.u32 %s5971_s19, 4 }
  0x13   : > { %s6064_s29 = sshll.u32 %s7340_s26, 10  ;;  %s7348_s1 = sld [smem:[#allocation19_spill]] }
  0x14   : > { %s6060_s28 = scalar_select %p65_p5, %s5963_s17, %s67_s22  }
  0x15   : > { %s204_s8 = scalar_lea.vmem [#allocation6], %s6064_s29  ;;  %p6074_p6 = pnand %p5671_p4, %p6049_p3 }
  0x16   : > { %7347 = sst [smem:[#allocation17_spill]] %s6060_s28  ;;  %s212_s9 = sshll.u32 %s204_s8, 4  ;;  %s213_s9 = int_to_ptr.vmem [resolvable:$true] %s212_s9 }
  0x17   : > { %s6078_s11 = scalar_lea.sflag [#allocation7], %s200_s25  ;;  %s5977_s12 = smov 1024  }
  0x18   : > { %s5978_s13 = smov 256   ;;  %s5979_s14 = smov 16  }
  0x19   : > { %s209_s6 = scalar_lea.hbm %s7348_s1, %s5254_s27  ;;  %s7350_s2 = sld [smem:[#allocation20_spill]] }
  0x1a   : > { %s210_s7 = sshll.u32 %s209_s6, 4  ;;  %s6090_s5 = sadd.s32 4294967295, %s5975_s20   ;;  %s211_s7 = int_to_ptr.hbm [resolvable:$true] %s210_s7 }
  0x1b   : > { %5663 = dma.hbm_to_vmem [thread:$0]  (!%p6074_p6), %s211_s7, 16384, %s213_s9, %s6078_s11, %s5977_s12, %s5978_s13, %s5979_s14  }
  0x1c   : > { %p80_p7 = scmp.ne.s32.totalorder %s5959_s16, %s5955_s15  ;;  %p81_p8 = scmp.eq.s32.totalorder %s6090_s5, 0 }
  0x1d   : > { %p3686_p9 = scmp.ge.s32.totalorder %s5975_s20, 1  ;;  %p169_p10 = scmp.lt.s32.totalorder %s5975_s20, 5 }
  0x1e   : > { %p6099_p11 = por %p81_p8, %p80_p7  ;;  %s7353_s0 = sld [smem:[#allocation18_spill]] }
  0x1f   : > { %s231_s23 = scalar_lea.hbm %s7350_s2, %s5254_s27  ;;  %p6103_p12 = pnand %p3686_p9, %p169_p10 }
  0x20   : > { %s232_s30 = sshll.u32 %s231_s23, 4  ;;  %s5980_s8 = smov [#allocation3]   ;;  %s233_s30 = int_to_ptr.hbm [resolvable:$true] %s232_s30 }
  0x21   : > { %p5656_p13 = pneg %p6103_p12  ;;  %s186_s9 = sshll.u32 %s5980_s8, 4  ;;  %s187_s9 = int_to_ptr.vmem [resolvable:$true] %s186_s9 }
  0x22   : > { %s226_s22 = scalar_lea.vmem [#allocation8], %s6064_s29  ;;  %s5981_s23 = smov 512  }
  0x23   : > { %p5657_p0 = pnand %p5656_p13, %p81_p8  ;;  %s234_s24 = sshll.u32 %s226_s22, 4  ;;  %s235_s24 = int_to_ptr.vmem [resolvable:$true] %s234_s24 }
  0x24   : > { %s184_s15 = sshll.u32 %s7353_s0, 4  ;;  %s5982_s26 = smov 32   ;;  %s185_s15 = int_to_ptr.hbm [resolvable:$true] %s184_s15 }
  0x25   : > { %5659 = dma.hbm_to_vmem [thread:$0]  (!%p5657_p0), %s185_s15, 1024, %s187_s9, [#allocation4], %s5981_s23, %s5981_s23, %s5982_s26  }
  0x26   : > { %5666 = dma.hbm_to_vmem [thread:$0]  (!%p6074_p6), %s233_s30, 16384, %s235_s24, %s6078_s11, %s5977_s12, %s5978_s13, %s5979_s14  }
  0x27   : > { %s5257_s6 = sshll.u32 %s5971_s19, 10  ;;  %s248_s7 = scalar_lea.vmem [#allocation9], %s6064_s29 }
  0x28   : > { %s257_s0 = sshll.u32 %s248_s7, 4  ;;  %s254_s2 = scalar_lea.hbm %s7338_s3, %s5257_s6  ;;  %s258_s0 = int_to_ptr.vmem [resolvable:$true] %s257_s0 }
  0x29   : > { %s255_s21 = sshll.u32 %s254_s2, 4  ;;  %s7354_s22 = sand.u32 1, %s5963_s17   ;;  %s256_s21 = int_to_ptr.hbm [resolvable:$true] %s255_s21 }
  0x2a   : > { %s245_s28 = scalar_lea.sflag [#allocation10], %s7354_s22  ;;  %269 = sbr.rel (%p6103_p12) target bundleno = 703 (0x2bf), region = 36 }
  0x2b   : > { %5669 = dma.hbm_to_vmem [thread:$0]  (!%p6074_p6), %s256_s21, 16384, %s258_s0, %s245_s28, %s5978_s13, %s5978_s13, %s5979_s14  }
  0x2f   : > { %5938 = dma.done.wait (%p81_p8), [#allocation4], 1024  }
  0x30   : > { %5940 = vsyncadd (%p81_p8), [#allocation4], 4294966272  ;;  %s276_s1 = sand.u32 1, %s6090_s5   ;;  %s278_s2 = sand.u32 1, %s5959_s16  }
  0x31   : > { %s3701_s26 = sshll.u32 %s278_s2, 10  ;;  %s277_s29 = scalar_lea.sflag [#allocation7], %s276_s1 }
  0x32   : > { %s6141_s10 = scalar_lea.vmem [#allocation6], %s3701_s26 }
  0x33   : > { %5942 = dma.done.wait (%p6099_p11), %s277_s29, 32768  }
  0x34   : > { %5944 = vsyncadd (%p6099_p11), %s277_s29, 4294934528  ;;  %s6147_s0 = scalar_lea.vmem [#allocation8], %s3701_s26  ;;  %s297_s21 = scalar_lea.sflag [#allocation10], %s278_s2 }
  0x35   : > { %s6149_s28 = scalar_lea.vmem [#allocation9], %s3701_s26 }
  0x36   : > { %5946 = dma.done.wait (%p6099_p11), %s297_s21, 16384  }
  0x37   : > { %5948 = vsyncadd (%p6099_p11), %s297_s21, 4294950912  ;;  %p3704_p1 = scmp.ne.s32.totalorder %s5967_s18, 0 }
  0x39   : > { %339 = sbr.rel (%p3704_p1) target bundleno = 71 (0x47), region = 56 }
  0x3e   : > { %v5983_v0 = vmov 0.0  }
  0x3f   : > { %340 = vst [vmem:[#allocation2 + $0x30] sm:$0xff] %v5983_v0 }
  0x40   : > { %341 = vst [vmem:[#allocation2] sm:$0xff] %v5983_v0 }
  0x41   : > { %342 = vst [vmem:[#allocation2 + $0x18] sm:$0xff] %v5983_v0 }
  0x42   : > { %343 = vst [vmem:[#allocation2 + $0x10] sm:$0xff] %v5983_v0 }
  0x43   : > { %344 = vst [vmem:[#allocation2 + $0x8] sm:$0xff] %v5983_v0 }
  0x44   : > { %345 = vst [vmem:[#allocation2 + $0x20] sm:$0xff] %v5983_v0 }
  0x45   : > { %346 = vst [vmem:[#allocation2 + $0x28] sm:$0xff] %v5983_v0 }
  0x46   : > { %347 = vst [vmem:[#allocation2 + $0x38] sm:$0xff] %v5983_v0 }
  0x47 PF: > { %v3819_v1 = vld [vmem:[%s6141_s10 + $0xe0] sm:$0xf]  ;;  %v5288_v2 = vld [vmem:[%s6141_s10 + $0xec] sm:$0xf0]  ;;  %p5249_p2 = scmp.ne.s32.totalorder %s5967_s18, 3 }
  0x48   : > { %v3947_v3 = vld [vmem:[%s6141_s10 + $0x1e0] sm:$0xf]  ;;  %v3820_v4 = vor.u32 %v5288_v2, %v3819_v1  ;;  %v5320_v5 = vld [vmem:[%s6141_s10 + $0x1ec] sm:$0xf0] }
  0x49   : > { %v4075_v6 = vld [vmem:[%s6141_s10 + $0x2e0] sm:$0xf]  ;;  %v5352_v7 = vld [vmem:[%s6141_s10 + $0x2ec] sm:$0xf0]  ;;  %v3948_v8 = vor.u32 %v5320_v5, %v3947_v3 }
  0x4a   : > { %v4076_v9 = vor.u32 %v5352_v7, %v4075_v6  ;;  %v4203_v10 = vld [vmem:[%s6141_s10 + $0x3e0] sm:$0xf]  ;;  %v5384_v11 = vld [vmem:[%s6141_s10 + $0x3ec] sm:$0xf0]  ;;  %1128 = vmatpush.bf16.msra.mxu0 %v3820_v4 }
  0x4b   : > { %v3803_v12 = vld [vmem:[%s6141_s10 + $0xc0] sm:$0xf]  ;;  %v4204_v13 = vor.u32 %v5384_v11, %v4203_v10  ;;  %v5284_v14 = vld [vmem:[%s6141_s10 + $0xcc] sm:$0xf0]  ;;  %1142 = vmatpush.bf16.msra.mxu1 %v3948_v8 }
  0x4c   : > { %v3931_v15 = vld [vmem:[%s6141_s10 + $0x1c0] sm:$0xf]  ;;  %v5316_v16 = vld [vmem:[%s6141_s10 + $0x1cc] sm:$0xf0]  ;;  %1156 = vmatpush.bf16.msra.mxu2 %v4076_v9  ;;  %v3804_v17 = vor.u32 %v5284_v14, %v3803_v12 }
  0x4d   : > { %v3932_v18 = vor.u32 %v5316_v16, %v3931_v15  ;;  %v4059_v19 = vld [vmem:[%s6141_s10 + $0x2c0] sm:$0xf]  ;;  %v5348_v20 = vld [vmem:[%s6141_s10 + $0x2cc] sm:$0xf0]  ;;  %1170 = vmatpush.bf16.msra.mxu3 %v4204_v13 }
  0x4e   : > { %v4187_v21 = vld [vmem:[%s6141_s10 + $0x3c0] sm:$0xf]  ;;  %v4060_v22 = vor.u32 %v5348_v20, %v4059_v19  ;;  %v5380_v23 = vld [vmem:[%s6141_s10 + $0x3cc] sm:$0xf0]  ;;  %1129 = vmatpush.bf16.msra.mxu0 %v3804_v17 }
  0x4f   : > { %v3787_v24 = vld [vmem:[%s6141_s10 + $0xa0] sm:$0xf]  ;;  %v5280_v25 = vld [vmem:[%s6141_s10 + $0xac] sm:$0xf0]  ;;  %v4188_v26 = vor.u32 %v5380_v23, %v4187_v21  ;;  %1143 = vmatpush.bf16.msra.mxu1 %v3932_v18 }
  0x50   : > { %v3915_v27 = vld [vmem:[%s6141_s10 + $0x1a0] sm:$0xf]  ;;  %v5312_v28 = vld [vmem:[%s6141_s10 + $0x1ac] sm:$0xf0]  ;;  %v3788_v30 = vor.u32 %v5280_v25, %v3787_v24  ;;  %1157 = vmatpush.bf16.msra.mxu2 %v4060_v22 }
  0x51   : > { %v4043_v29 = vld [vmem:[%s6141_s10 + $0x2a0] sm:$0xf]  ;;  %v5344_v31 = vld [vmem:[%s6141_s10 + $0x2ac] sm:$0xf0]  ;;  %v3916_v34 = vor.u32 %v5312_v28, %v3915_v27  ;;  %1171 = vmatpush.bf16.msra.mxu3 %v4188_v26  ;;  %v5286_v28 = vld [vmem:[%s6141_s10 + $0xe4] sm:$0xf] }
  0x52   : > { %v4171_v32 = vld [vmem:[%s6141_s10 + $0x3a0] sm:$0xf]  ;;  %v5376_v33 = vld [vmem:[%s6141_s10 + $0x3ac] sm:$0xf0]  ;;  %v4044_v35 = vor.u32 %v5344_v31, %v4043_v29  ;;  %1130 = vmatpush.bf16.msra.mxu0 %v3788_v30  ;;  %v3821_v30 = vld [vmem:[%s6141_s10 + $0xf0] sm:$0xf0] }
  0x53   : > { %v3771_v36 = vld [vmem:[%s6141_s10 + $0x80] sm:$0xf]  ;;  %v5276_v37 = vld [vmem:[%s6141_s10 + $0x8c] sm:$0xf0]  ;;  %v4172_v39 = vor.u32 %v5376_v33, %v4171_v32  ;;  %1144 = vmatpush.bf16.msra.mxu1 %v3916_v34  ;;  %v5318_v31 = vld [vmem:[%s6141_s10 + $0x1e4] sm:$0xf] }
  0x54   : > { %v3899_v38 = vld [vmem:[%s6141_s10 + $0x180] sm:$0xf]  ;;  %v5308_v40 = vld [vmem:[%s6141_s10 + $0x18c] sm:$0xf0]  ;;  %v3772_v45 = vor.u32 %v5276_v37, %v3771_v36  ;;  %1158 = vmatpush.bf16.msra.mxu2 %v4044_v35  ;;  %v3949_v32 = vld [vmem:[%s6141_s10 + $0x1f0] sm:$0xf0] }
  0x55   : > { %v4027_v41 = vld [vmem:[%s6141_s10 + $0x280] sm:$0xf]  ;;  %v5340_v42 = vld [vmem:[%s6141_s10 + $0x28c] sm:$0xf0]  ;;  %v3900_v46 = vor.u32 %v5308_v40, %v3899_v38  ;;  %1172 = vmatpush.bf16.msra.mxu3 %v4172_v39  ;;  %v5350_v33 = vld [vmem:[%s6141_s10 + $0x2e4] sm:$0xf] }
  0x56   : > { %v4155_v43 = vld [vmem:[%s6141_s10 + $0x380] sm:$0xf]  ;;  %v5372_v44 = vld [vmem:[%s6141_s10 + $0x38c] sm:$0xf0]  ;;  %v4028_v47 = vor.u32 %v5340_v42, %v4027_v41  ;;  %1131 = vmatpush.bf16.msra.mxu0 %v3772_v45  ;;  %v4077_v34 = vld [vmem:[%s6141_s10 + $0x2f0] sm:$0xf0] }
  0x57   : > { %v3755_v48 = vld [vmem:[%s6141_s10 + $0x60] sm:$0xf]  ;;  %v5272_v49 = vld [vmem:[%s6141_s10 + $0x6c] sm:$0xf0]  ;;  %v4156_v51 = vor.u32 %v5372_v44, %v4155_v43  ;;  %1145 = vmatpush.bf16.msra.mxu1 %v3900_v46  ;;  %v5382_v35 = vld [vmem:[%s6141_s10 + $0x3e4] sm:$0xf]  ;;  %v3824_v46 = vor.u32 %v5286_v28, %v3821_v30 }
  0x58   : > { %v3883_v50 = vld [vmem:[%s6141_s10 + $0x160] sm:$0xf]  ;;  %v5304_v52 = vld [vmem:[%s6141_s10 + $0x16c] sm:$0xf0]  ;;  %v3756_v57 = vor.u32 %v5272_v49, %v3755_v48  ;;  %1159 = vmatpush.bf16.msra.mxu2 %v4028_v47  ;;  %v4205_v37 = vld [vmem:[%s6141_s10 + $0x3f0] sm:$0xf0] }
  0x59   : > { %v4011_v53 = vld [vmem:[%s6141_s10 + $0x260] sm:$0xf]  ;;  %v5336_v54 = vld [vmem:[%s6141_s10 + $0x26c] sm:$0xf0]  ;;  %v3884_v58 = vor.u32 %v5304_v52, %v3883_v50  ;;  %1173 = vmatpush.bf16.msra.mxu3 %v4156_v51  ;;  %v351_v42 = vld [vmem:[#allocation3 + $0x18] sm:$0xff]  ;;  %v3952_v50 = vor.u32 %v5318_v31, %v3949_v32  ;;  %v4080_v51 = vor.u32 %v5350_v33, %v4077_v34 }
  0x5a   : > { %v4139_v55 = vld [vmem:[%s6141_s10 + $0x360] sm:$0xf]  ;;  %v5368_v56 = vld [vmem:[%s6141_s10 + $0x36c] sm:$0xf0]  ;;  %v4012_v59 = vor.u32 %v5336_v54, %v4011_v53  ;;  %1132 = vmatpush.bf16.msra.mxu0 %v3756_v57  ;;  %v355_v43 = vld [vmem:[#allocation3 + $0x38] sm:$0xff] }
  0x5b   : > { %v3739_v60 = vld [vmem:[%s6141_s10 + $0x40] sm:$0xf]  ;;  %v5268_v61 = vld [vmem:[%s6141_s10 + $0x4c] sm:$0xf0]  ;;  %v4140_v63 = vor.u32 %v5368_v56, %v4139_v55  ;;  %1146 = vmatpush.bf16.msra.mxu1 %v3884_v58  ;;  %v5282_v44 = vld [vmem:[%s6141_s10 + $0xc4] sm:$0xf]  ;;  %v4208_v55 = vor.u32 %v5382_v35, %v4205_v37 }
  0x5c   : > { %v3867_v62 = vld [vmem:[%s6141_s10 + $0x140] sm:$0xf]  ;;  %v5300_v0 = vld [vmem:[%s6141_s10 + $0x14c] sm:$0xf0]  ;;  %v3740_v5 = vor.u32 %v5268_v61, %v3739_v60  ;;  %1160 = vmatpush.bf16.msra.mxu2 %v4012_v59  ;;  %v3805_v47 = vld [vmem:[%s6141_s10 + $0xd0] sm:$0xf0]  ;;  %v6236_v60 = vpack.c.bf16 %v355_v43, %v351_v42 }
  0x5d   : > { %v3995_v1 = vld [vmem:[%s6141_s10 + $0x240] sm:$0xf]  ;;  %v5332_v2 = vld [vmem:[%s6141_s10 + $0x24c] sm:$0xf0]  ;;  %v3868_v7 = vor.u32 %v5300_v0, %v3867_v62  ;;  %1174 = vmatpush.bf16.msra.mxu3 %v4140_v63  ;;  %v5314_v52 = vld [vmem:[%s6141_s10 + $0x1c4] sm:$0xf]  ;;  %v3808_v0 = vor.u32 %v5282_v44, %v3805_v47 }
  0x5e   : > { %v4123_v3 = vld [vmem:[%s6141_s10 + $0x340] sm:$0xf]  ;;  %v5364_v4 = vld [vmem:[%s6141_s10 + $0x34c] sm:$0xf0]  ;;  %v3996_v8 = vor.u32 %v5332_v2, %v3995_v1  ;;  %1133 = vmatpush.bf16.msra.mxu0 %v3740_v5  ;;  %v349_v53 = vld [vmem:[#allocation3 + $0x8] sm:$0xff] }
  0x5f   : > { %v3723_v6 = vld [vmem:[%s6141_s10 + $0x20] sm:$0xf]  ;;  %v5264_v9 = vld [vmem:[%s6141_s10 + $0x2c] sm:$0xf0]  ;;  %v4124_v12 = vor.u32 %v5364_v4, %v4123_v3  ;;  %1147 = vmatpush.bf16.msra.mxu1 %v3868_v7  ;;  %v353_v54 = vld [vmem:[#allocation3 + $0x28] sm:$0xff] }
  0x60   : > { %v3851_v10 = vld [vmem:[%s6141_s10 + $0x120] sm:$0xf]  ;;  %v5296_v11 = vld [vmem:[%s6141_s10 + $0x12c] sm:$0xf0]  ;;  %v3724_v19 = vor.u32 %v5264_v9, %v3723_v6  ;;  %1161 = vmatpush.bf16.msra.mxu2 %v3996_v8  ;;  %v3933_v57 = vld [vmem:[%s6141_s10 + $0x1d0] sm:$0xf0]  ;;  %v6242_v1 = vpack.c.bf16 %v353_v54, %v349_v53 }
  0x61   : > { %v3979_v13 = vld [vmem:[%s6141_s10 + $0x220] sm:$0xf]  ;;  %v5328_v14 = vld [vmem:[%s6141_s10 + $0x22c] sm:$0xf0]  ;;  %v3852_v24 = vor.u32 %v5296_v11, %v3851_v10  ;;  %1175 = vmatpush.bf16.msra.mxu3 %v4124_v12  ;;  %v5346_v58 = vld [vmem:[%s6141_s10 + $0x2c4] sm:$0xf]  ;;  %v3936_v2 = vor.u32 %v5314_v52, %v3933_v57 }
  0x62   : > { %v4107_v15 = vld [vmem:[%s6141_s10 + $0x320] sm:$0xf]  ;;  %v5360_v16 = vld [vmem:[%s6141_s10 + $0x32c] sm:$0xf0]  ;;  %v3980_v25 = vor.u32 %v5328_v14, %v3979_v13  ;;  %1134 = vmatpush.bf16.msra.mxu0 %v3724_v19  ;;  %v4061_v59 = vld [vmem:[%s6141_s10 + $0x2d0] sm:$0xf0] }
  0x63   : > { %v3707_v17 = vld [vmem:[%s6141_s10] sm:$0xf]  ;;  %v5260_v18 = vld [vmem:[%s6141_s10 + $0xc] sm:$0xf0]  ;;  %v4108_v29 = vor.u32 %v5360_v16, %v4107_v15  ;;  %1148 = vmatpush.bf16.msra.mxu1 %v3852_v24  ;;  %v5378_v61 = vld [vmem:[%s6141_s10 + $0x3c4] sm:$0xf]  ;;  %v4064_v3 = vor.u32 %v5346_v58, %v4061_v59 }
  0x64   : > { %v3835_v20 = vld [vmem:[%s6141_s10 + $0x100] sm:$0xf]  ;;  %v5292_v21 = vld [vmem:[%s6141_s10 + $0x10c] sm:$0xf0]  ;;  %v3708_v36 = vor.u32 %v5260_v18, %v3707_v17  ;;  %1162 = vmatpush.bf16.msra.mxu2 %v3980_v25  ;;  %v4189_v62 = vld [vmem:[%s6141_s10 + $0x3d0] sm:$0xf0] }
  0x65   : > { %v3963_v22 = vld [vmem:[%s6141_s10 + $0x200] sm:$0xf]  ;;  %v5324_v23 = vld [vmem:[%s6141_s10 + $0x20c] sm:$0xf0]  ;;  %v3836_v40 = vor.u32 %v5292_v21, %v3835_v20  ;;  %1176 = vmatpush.bf16.msra.mxu3 %v4108_v29  ;;  %v5278_v4 = vld [vmem:[%s6141_s10 + $0xa4] sm:$0xf]  ;;  %v4192_v7 = vor.u32 %v5378_v61, %v4189_v62 }
  0x66   : > { %v4091_v26 = vld [vmem:[%s6141_s10 + $0x300] sm:$0xf]  ;;  %v5356_v27 = vld [vmem:[%s6141_s10 + $0x30c] sm:$0xf0]  ;;  %v3964_v41 = vor.u32 %v5324_v23, %v3963_v22  ;;  %1135 = vmatpush.bf16.msra.mxu0 %v3708_v36  ;;  %v3789_v5 = vld [vmem:[%s6141_s10 + $0xb0] sm:$0xf0] }
  0x67   : > { %v350_v38 = vld [vmem:[#allocation3 + $0x10] sm:$0xff]  ;;  %v4092_v45 = vor.u32 %v5356_v27, %v4091_v26  ;;  %v348_v48 = vld [vmem:[#allocation3] sm:$0xff]  ;;  %1149 = vmatpush.bf16.msra.mxu1 %v3836_v40  ;;  %v3792_v13 = vor.u32 %v5278_v4, %v3789_v5 }
  0x68   : > { %v354_v39 = vld [vmem:[#allocation3 + $0x30] sm:$0xff]  ;;  %v352_v49 = vld [vmem:[#allocation3 + $0x20] sm:$0xff]  ;;  %1163 = vmatpush.bf16.msra.mxu2 %v3964_v41 }
  0x69   : > { %v6231_v56 = vpack.c.bf16 %v354_v39, %v350_v38  ;;  %v6240_v63 = vpack.c.bf16 %v352_v49, %v348_v48  ;;  %1177 = vmatpush.bf16.msra.mxu3 %v4092_v45  ;;  %v5310_v6 = vld [vmem:[%s6141_s10 + $0x1a4] sm:$0xf]  ;;  %v3917_v8 = vld [vmem:[%s6141_s10 + $0x1b0] sm:$0xf0] }
  0x6a   : > { %1184 = vmatpush.bf16.msrb.mxu0 %v3824_v46  ;;  %v5342_v9 = vld [vmem:[%s6141_s10 + $0x2a4] sm:$0xf]  ;;  %v4045_v10 = vld [vmem:[%s6141_s10 + $0x2b0] sm:$0xf0]  ;;  %1150 = vmatmul.bf16.vlgmr.msra.gmra.mxu1 %v6242_v1  ;;  %v3920_v14 = vor.u32 %v5310_v6, %v3917_v8 }
  0x6b   : > { %1198 = vmatpush.bf16.msrb.mxu1 %v3952_v50  ;;  %1164 = vmatmul.bf16.vlgmr.msra.gmra.mxu2 %v6231_v56  ;;  %v5374_v11 = vld [vmem:[%s6141_s10 + $0x3a4] sm:$0xf]  ;;  %v4173_v12 = vld [vmem:[%s6141_s10 + $0x3b0] sm:$0xf0]  ;;  %v4048_v15 = vor.u32 %v5342_v9, %v4045_v10 }
  0x6c   : > { %1212 = vmatpush.bf16.msrb.mxu2 %v4080_v51  ;;  %1178 = vmatmul.bf16.vlgmr.msra.gmra.mxu3 %v6236_v60  ;;  %v5274_v16 = vld [vmem:[%s6141_s10 + $0x84] sm:$0xf]  ;;  %v3773_v17 = vld [vmem:[%s6141_s10 + $0x90] sm:$0xf0]  ;;  %v4176_v19 = vor.u32 %v5374_v11, %v4173_v12 }
  0x6d   : > { %1226 = vmatpush.bf16.msrb.mxu3 %v4208_v55  ;;  %1136 = vmatmul.bf16.vlgmr.msra.gmra.mxu0 %v6240_v63  ;;  %v5306_v18 = vld [vmem:[%s6141_s10 + $0x184] sm:$0xf]  ;;  %v3901_v20 = vld [vmem:[%s6141_s10 + $0x190] sm:$0xf0]  ;;  %v3776_v25 = vor.u32 %v5274_v16, %v3773_v17  ;;  %v5321_v17 = vld [vmem:[%s6141_s10 + $0x1f4] sm:$0xf0] }
  0x6e   : > { %1185 = vmatpush.bf16.msrb.mxu0 %v3808_v0  ;;  %v5338_v21 = vld [vmem:[%s6141_s10 + $0x284] sm:$0xf]  ;;  %v4029_v22 = vld [vmem:[%s6141_s10 + $0x290] sm:$0xf0]  ;;  %v3904_v26 = vor.u32 %v5306_v18, %v3901_v20  ;;  %v4083_v18 = vld [vmem:[%s6141_s10 + $0x2e8] sm:$0xf] }
  0x6f   : > { %1199 = vmatpush.bf16.msrb.mxu1 %v3936_v2  ;;  %v5370_v23 = vld [vmem:[%s6141_s10 + $0x384] sm:$0xf]  ;;  %v4157_v24 = vld [vmem:[%s6141_s10 + $0x390] sm:$0xf0]  ;;  %v4032_v27 = vor.u32 %v5338_v21, %v4029_v22  ;;  %v4211_v22 = vld [vmem:[%s6141_s10 + $0x3e8] sm:$0xf] }
  0x70   : > { %1213 = vmatpush.bf16.msrb.mxu2 %v4064_v3  ;;  %v5270_v28 = vld [vmem:[%s6141_s10 + $0x64] sm:$0xf]  ;;  %v3757_v29 = vld [vmem:[%s6141_s10 + $0x70] sm:$0xf0]  ;;  %v4160_v31 = vor.u32 %v5370_v23, %v4157_v24  ;;  %v5385_v23 = vld [vmem:[%s6141_s10 + $0x3f4] sm:$0xf0] }
  0x71   : > { %1227 = vmatpush.bf16.msrb.mxu3 %v4192_v7  ;;  %v5302_v30 = vld [vmem:[%s6141_s10 + $0x164] sm:$0xf]  ;;  %v3885_v32 = vld [vmem:[%s6141_s10 + $0x170] sm:$0xf0]  ;;  %v3760_v37 = vor.u32 %v5270_v28, %v3757_v29  ;;  %v3811_v28 = vld [vmem:[%s6141_s10 + $0xc8] sm:$0xf] }
  0x72   : > { %1186 = vmatpush.bf16.msrb.mxu0 %v3792_v13  ;;  %v5334_v33 = vld [vmem:[%s6141_s10 + $0x264] sm:$0xf]  ;;  %v4013_v34 = vld [vmem:[%s6141_s10 + $0x270] sm:$0xf0]  ;;  %v3888_v38 = vor.u32 %v5302_v30, %v3885_v32  ;;  %v3827_v13 = vld [vmem:[%s6141_s10 + $0xe8] sm:$0xf] }
  0x73   : > { %1200 = vmatpush.bf16.msrb.mxu1 %v3920_v14  ;;  %v5366_v35 = vld [vmem:[%s6141_s10 + $0x364] sm:$0xf]  ;;  %v4141_v36 = vld [vmem:[%s6141_s10 + $0x370] sm:$0xf0]  ;;  %v4016_v39 = vor.u32 %v5334_v33, %v4013_v34  ;;  %v5289_v14 = vld [vmem:[%s6141_s10 + $0xf4] sm:$0xf0] }
  0x74   : > { %1214 = vmatpush.bf16.msrb.mxu2 %v4048_v15  ;;  %v5266_v40 = vld [vmem:[%s6141_s10 + $0x44] sm:$0xf]  ;;  %v3741_v41 = vld [vmem:[%s6141_s10 + $0x50] sm:$0xf0]  ;;  %v4144_v43 = vor.u32 %v5366_v35, %v4141_v36  ;;  %v3955_v15 = vld [vmem:[%s6141_s10 + $0x1e8] sm:$0xf] }
  0x75   : > { %1228 = vmatpush.bf16.msrb.mxu3 %v4176_v19  ;;  %v5298_v42 = vld [vmem:[%s6141_s10 + $0x144] sm:$0xf]  ;;  %v3869_v44 = vld [vmem:[%s6141_s10 + $0x150] sm:$0xf0]  ;;  %v3744_v49 = vor.u32 %v5266_v40, %v3741_v41  ;;  %v5353_v19 = vld [vmem:[%s6141_s10 + $0x2f4] sm:$0xf0] }
  0x76   : > { %1187 = vmatpush.bf16.msrb.mxu0 %v3776_v25  ;;  %v5330_v45 = vld [vmem:[%s6141_s10 + $0x244] sm:$0xf]  ;;  %v3997_v46 = vld [vmem:[%s6141_s10 + $0x250] sm:$0xf0]  ;;  %v3872_v50 = vor.u32 %v5298_v42, %v3869_v44  ;;  %v3828_v25 = vor.u32 %v5289_v14, %v3827_v13  ;;  %v5285_v29 = vld [vmem:[%s6141_s10 + $0xd4] sm:$0xf0] }
  0x77   : > { %1201 = vmatpush.bf16.msrb.mxu1 %v3904_v26  ;;  %v5362_v47 = vld [vmem:[%s6141_s10 + $0x344] sm:$0xf]  ;;  %v4125_v48 = vld [vmem:[%s6141_s10 + $0x350] sm:$0xf0]  ;;  %v4000_v51 = vor.u32 %v5330_v45, %v3997_v46  ;;  %v3956_v26 = vor.u32 %v5321_v17, %v3955_v15  ;;  %v3939_v30 = vld [vmem:[%s6141_s10 + $0x1c8] sm:$0xf] }
  0x78   : > { %1215 = vmatpush.bf16.msrb.mxu2 %v4032_v27  ;;  %v5262_v52 = vld [vmem:[%s6141_s10 + $0x24] sm:$0xf]  ;;  %v3725_v53 = vld [vmem:[%s6141_s10 + $0x30] sm:$0xf0]  ;;  %v4128_v55 = vor.u32 %v5362_v47, %v4125_v48  ;;  %v4084_v27 = vor.u32 %v5353_v19, %v4083_v18  ;;  %v5317_v32 = vld [vmem:[%s6141_s10 + $0x1d4] sm:$0xf0] }
  0x79   : > { %1229 = vmatpush.bf16.msrb.mxu3 %v4160_v31  ;;  %v5294_v54 = vld [vmem:[%s6141_s10 + $0x124] sm:$0xf]  ;;  %v3853_v57 = vld [vmem:[%s6141_s10 + $0x130] sm:$0xf0]  ;;  %v3728_v0 = vor.u32 %v5262_v52, %v3725_v53  ;;  %v4212_v31 = vor.u32 %v5385_v23, %v4211_v22  ;;  %v4067_v33 = vld [vmem:[%s6141_s10 + $0x2c8] sm:$0xf] }
  0x7a   : > { %1188 = vmatpush.bf16.msrb.mxu0 %v3760_v37  ;;  %v5326_v58 = vld [vmem:[%s6141_s10 + $0x224] sm:$0xf]  ;;  %v3981_v59 = vld [vmem:[%s6141_s10 + $0x230] sm:$0xf0]  ;;  %v3856_v4 = vor.u32 %v5294_v54, %v3853_v57  ;;  %v5349_v34 = vld [vmem:[%s6141_s10 + $0x2d4] sm:$0xf0]  ;;  %v3812_v37 = vor.u32 %v5285_v29, %v3811_v28 }
  0x7b   : > { %1202 = vmatpush.bf16.msrb.mxu1 %v3888_v38  ;;  %v5358_v61 = vld [vmem:[%s6141_s10 + $0x324] sm:$0xf]  ;;  %v4109_v62 = vld [vmem:[%s6141_s10 + $0x330] sm:$0xf0]  ;;  %v3984_v5 = vor.u32 %v5326_v58, %v3981_v59  ;;  %v4195_v35 = vld [vmem:[%s6141_s10 + $0x3c8] sm:$0xf]  ;;  %v3940_v38 = vor.u32 %v5317_v32, %v3939_v30 }
  0x7c   : > { %1216 = vmatpush.bf16.msrb.mxu2 %v4016_v39  ;;  %v5258_v2 = vld [vmem:[%s6141_s10 + $0x4] sm:$0xf]  ;;  %v3709_v3 = vld [vmem:[%s6141_s10 + $0x10] sm:$0xf0]  ;;  %v4112_v9 = vor.u32 %v5358_v61, %v4109_v62  ;;  %v5381_v36 = vld [vmem:[%s6141_s10 + $0x3d4] sm:$0xf0]  ;;  %v4068_v39 = vor.u32 %v5349_v34, %v4067_v33 }
  0x7d   : > { %1230 = vmatpush.bf16.msrb.mxu3 %v4144_v43  ;;  %v5290_v6 = vld [vmem:[%s6141_s10 + $0x104] sm:$0xf]  ;;  %v3837_v7 = vld [vmem:[%s6141_s10 + $0x110] sm:$0xf0]  ;;  %v3712_v16 = vor.u32 %v5258_v2, %v3709_v3  ;;  %v3795_v40 = vld [vmem:[%s6141_s10 + $0xa8] sm:$0xf]  ;;  %v4196_v43 = vor.u32 %v5381_v36, %v4195_v35 }
  0x7e   : > { %1189 = vmatpush.bf16.msrb.mxu0 %v3744_v49  ;;  %v5322_v8 = vld [vmem:[%s6141_s10 + $0x204] sm:$0xf]  ;;  %v3965_v10 = vld [vmem:[%s6141_s10 + $0x210] sm:$0xf0]  ;;  %v3840_v20 = vor.u32 %v5290_v6, %v3837_v7  ;;  %v5281_v41 = vld [vmem:[%s6141_s10 + $0xb4] sm:$0xf0] }
  0x7f   : > { %1203 = vmatpush.bf16.msrb.mxu1 %v3872_v50  ;;  %v5354_v11 = vld [vmem:[%s6141_s10 + $0x304] sm:$0xf]  ;;  %v4093_v12 = vld [vmem:[%s6141_s10 + $0x310] sm:$0xf0]  ;;  %v3968_v21 = vor.u32 %v5322_v8, %v3965_v10  ;;  %v3923_v42 = vld [vmem:[%s6141_s10 + $0x1a8] sm:$0xf]  ;;  %v3796_v49 = vor.u32 %v5281_v41, %v3795_v40 }
  0x80   : > { %1217 = vmatpush.bf16.msrb.mxu2 %v4000_v51  ;;  %v4096_v24 = vor.u32 %v5354_v11, %v4093_v12  ;;  %v5313_v44 = vld [vmem:[%s6141_s10 + $0x1b4] sm:$0xf0]  ;;  %v4051_v45 = vld [vmem:[%s6141_s10 + $0x2a8] sm:$0xf] }
  0x81   : > { %1231 = vmatpush.bf16.msrb.mxu3 %v4128_v55  ;;  %v5345_v46 = vld [vmem:[%s6141_s10 + $0x2b4] sm:$0xf0]  ;;  %v4179_v47 = vld [vmem:[%s6141_s10 + $0x3a8] sm:$0xf]  ;;  %v3924_v50 = vor.u32 %v5313_v44, %v3923_v42 }
  0x82   : > { %1190 = vmatpush.bf16.msrb.mxu0 %v3728_v0  ;;  %v5377_v48 = vld [vmem:[%s6141_s10 + $0x3b4] sm:$0xf0]  ;;  %v4052_v51 = vor.u32 %v5345_v46, %v4051_v45  ;;  %v3779_v52 = vld [vmem:[%s6141_s10 + $0x88] sm:$0xf] }
  0x83   : > { %1204 = vmatpush.bf16.msrb.mxu1 %v3856_v4  ;;  %v5277_v53 = vld [vmem:[%s6141_s10 + $0x94] sm:$0xf0]  ;;  %v3907_v54 = vld [vmem:[%s6141_s10 + $0x188] sm:$0xf]  ;;  %v4180_v55 = vor.u32 %v5377_v48, %v4179_v47 }
  0x84   : > { %1218 = vmatpush.bf16.msrb.mxu2 %v3984_v5  ;;  %v5309_v57 = vld [vmem:[%s6141_s10 + $0x194] sm:$0xf0]  ;;  %v4035_v58 = vld [vmem:[%s6141_s10 + $0x288] sm:$0xf]  ;;  %v3780_v0 = vor.u32 %v5277_v53, %v3779_v52  ;;  %v3957_v53 = vld [vmem:[%s6141_s10 + $0x1f8] sm:$0xf0] }
  0x85   : > { %1232 = vmatpush.bf16.msrb.mxu3 %v4112_v9  ;;  %v5341_v59 = vld [vmem:[%s6141_s10 + $0x294] sm:$0xf0]  ;;  %v4163_v61 = vld [vmem:[%s6141_s10 + $0x388] sm:$0xf]  ;;  %v3908_v2 = vor.u32 %v5309_v57, %v3907_v54  ;;  %v5351_v54 = vld [vmem:[%s6141_s10 + $0x2ec] sm:$0xf] }
  0x86   : > { %1191 = vmatpush.bf16.msrb.mxu0 %v3712_v16  ;;  %v5373_v62 = vld [vmem:[%s6141_s10 + $0x394] sm:$0xf0]  ;;  %v4036_v3 = vor.u32 %v5341_v59, %v4035_v58  ;;  %v3763_v4 = vld [vmem:[%s6141_s10 + $0x68] sm:$0xf]  ;;  %v5383_v59 = vld [vmem:[%s6141_s10 + $0x3ec] sm:$0xf] }
  0x87   : > { %1205 = vmatpush.bf16.msrb.mxu1 %v3840_v20  ;;  %v5273_v5 = vld [vmem:[%s6141_s10 + $0x74] sm:$0xf0]  ;;  %v3891_v6 = vld [vmem:[%s6141_s10 + $0x168] sm:$0xf]  ;;  %v4164_v7 = vor.u32 %v5373_v62, %v4163_v61  ;;  %v4213_v61 = vld [vmem:[%s6141_s10 + $0x3f8] sm:$0xf0] }
  0x88   : > { %1219 = vmatpush.bf16.msrb.mxu2 %v3968_v21  ;;  %v5305_v8 = vld [vmem:[%s6141_s10 + $0x174] sm:$0xf0]  ;;  %v4019_v9 = vld [vmem:[%s6141_s10 + $0x268] sm:$0xf]  ;;  %v3764_v13 = vor.u32 %v5273_v5, %v3763_v4  ;;  %v5283_v4 = vld [vmem:[%s6141_s10 + $0xcc] sm:$0xf] }
  0x89   : > { %1233 = vmatpush.bf16.msrb.mxu3 %v4096_v24  ;;  %1192 = vmatmul.bf16.vlgmr.msrb.gmra.mxu0 %v6240_v63  ;;  %v5337_v10 = vld [vmem:[%s6141_s10 + $0x274] sm:$0xf0]  ;;  %v4147_v11 = vld [vmem:[%s6141_s10 + $0x368] sm:$0xf]  ;;  %v3892_v14 = vor.u32 %v5305_v8, %v3891_v6  ;;  %v3813_v5 = vld [vmem:[%s6141_s10 + $0xd8] sm:$0xf0] }
  0x8a   : > { %1240 = vmatpush.bf16.msra.mxu0 %v3828_v25  ;;  %1206 = vmatmul.bf16.vlgmr.msrb.gmra.mxu1 %v6242_v1  ;;  %v5369_v12 = vld [vmem:[%s6141_s10 + $0x374] sm:$0xf0]  ;;  %v4020_v15 = vor.u32 %v5337_v10, %v4019_v9  ;;  %v3747_v16 = vld [vmem:[%s6141_s10 + $0x48] sm:$0xf]  ;;  %v5315_v6 = vld [vmem:[%s6141_s10 + $0x1cc] sm:$0xf] }
  0x8b   : > { %1254 = vmatpush.bf16.msra.mxu1 %v3956_v26  ;;  %1220 = vmatmul.bf16.vlgmr.msrb.gmra.mxu2 %v6231_v56  ;;  %v5269_v17 = vld [vmem:[%s6141_s10 + $0x54] sm:$0xf0]  ;;  %v3875_v18 = vld [vmem:[%s6141_s10 + $0x148] sm:$0xf]  ;;  %v4148_v19 = vor.u32 %v5369_v12, %v4147_v11  ;;  %v3941_v8 = vld [vmem:[%s6141_s10 + $0x1d8] sm:$0xf0] }
  0x8c   : > { %1268 = vmatpush.bf16.msra.mxu2 %v4084_v27  ;;  %1234 = vmatmul.bf16.vlgmr.msrb.gmra.mxu3 %v6236_v60  ;;  %v5301_v20 = vld [vmem:[%s6141_s10 + $0x154] sm:$0xf0]  ;;  %v4003_v21 = vld [vmem:[%s6141_s10 + $0x248] sm:$0xf]  ;;  %v3748_v25 = vor.u32 %v5269_v17, %v3747_v16  ;;  %v5347_v9 = vld [vmem:[%s6141_s10 + $0x2cc] sm:$0xf] }
  0x8d   : > { %1282 = vmatpush.bf16.msra.mxu3 %v4212_v31  ;;  %v5333_v22 = vld [vmem:[%s6141_s10 + $0x254] sm:$0xf0]  ;;  %v4131_v23 = vld [vmem:[%s6141_s10 + $0x348] sm:$0xf]  ;;  %v3876_v26 = vor.u32 %v5301_v20, %v3875_v18  ;;  %v4069_v10 = vld [vmem:[%s6141_s10 + $0x2d8] sm:$0xf0] }
  0x8e   : > { %1241 = vmatpush.bf16.msra.mxu0 %v3812_v37  ;;  %v5365_v24 = vld [vmem:[%s6141_s10 + $0x354] sm:$0xf0]  ;;  %v4004_v27 = vor.u32 %v5333_v22, %v4003_v21  ;;  %v3731_v28 = vld [vmem:[%s6141_s10 + $0x28] sm:$0xf]  ;;  %v5379_v11 = vld [vmem:[%s6141_s10 + $0x3cc] sm:$0xf] }
  0x8f   : > { %1255 = vmatpush.bf16.msra.mxu1 %v3940_v38  ;;  %v5265_v29 = vld [vmem:[%s6141_s10 + $0x34] sm:$0xf0]  ;;  %v3859_v30 = vld [vmem:[%s6141_s10 + $0x128] sm:$0xf]  ;;  %v4132_v31 = vor.u32 %v5365_v24, %v4131_v23  ;;  %v4197_v12 = vld [vmem:[%s6141_s10 + $0x3d8] sm:$0xf0] }
  0x90   : > { %1269 = vmatpush.bf16.msra.mxu2 %v4068_v39  ;;  %v5297_v32 = vld [vmem:[%s6141_s10 + $0x134] sm:$0xf0]  ;;  %v3987_v33 = vld [vmem:[%s6141_s10 + $0x228] sm:$0xf]  ;;  %v3732_v37 = vor.u32 %v5265_v29, %v3731_v28  ;;  %v5279_v16 = vld [vmem:[%s6141_s10 + $0xac] sm:$0xf] }
  0x91   : > { %1283 = vmatpush.bf16.msra.mxu3 %v4196_v43  ;;  %v5329_v34 = vld [vmem:[%s6141_s10 + $0x234] sm:$0xf0]  ;;  %v4115_v35 = vld [vmem:[%s6141_s10 + $0x328] sm:$0xf]  ;;  %v3860_v40 = vor.u32 %v5297_v32, %v3859_v30  ;;  %v3797_v17 = vld [vmem:[%s6141_s10 + $0xb8] sm:$0xf0] }
  0x92   : > { %1242 = vmatpush.bf16.msra.mxu0 %v3796_v49  ;;  %v5361_v36 = vld [vmem:[%s6141_s10 + $0x334] sm:$0xf0]  ;;  %v3715_v38 = vld [vmem:[%s6141_s10 + $0x8] sm:$0xf]  ;;  %v3988_v41 = vor.u32 %v5329_v34, %v3987_v33  ;;  %v5287_v49 = vld [vmem:[%s6141_s10 + $0xec] sm:$0xf] }
  0x93   : > { %1256 = vmatpush.bf16.msra.mxu1 %v3924_v50  ;;  %v5261_v39 = vld [vmem:[%s6141_s10 + $0x14] sm:$0xf0]  ;;  %v3843_v42 = vld [vmem:[%s6141_s10 + $0x108] sm:$0xf]  ;;  %v4116_v45 = vor.u32 %v5361_v36, %v4115_v35  ;;  %v3829_v50 = vld [vmem:[%s6141_s10 + $0xf8] sm:$0xf0] }
  0x94   : > { %1270 = vmatpush.bf16.msra.mxu2 %v4052_v51  ;;  %v5293_v43 = vld [vmem:[%s6141_s10 + $0x114] sm:$0xf0]  ;;  %v3971_v44 = vld [vmem:[%s6141_s10 + $0x208] sm:$0xf]  ;;  %v5319_v51 = vld [vmem:[%s6141_s10 + $0x1ec] sm:$0xf]  ;;  %v3716_v52 = vor.u32 %v5261_v39, %v3715_v38 }
  0x95   : > { %1284 = vmatpush.bf16.msra.mxu3 %v4180_v55  ;;  %v5325_v46 = vld [vmem:[%s6141_s10 + $0x214] sm:$0xf0]  ;;  %v4099_v47 = vld [vmem:[%s6141_s10 + $0x308] sm:$0xf]  ;;  %v4085_v55 = vld [vmem:[%s6141_s10 + $0x2f8] sm:$0xf0]  ;;  %v3844_v57 = vor.u32 %v5293_v43, %v3843_v42 }
  0x96   : > { %1243 = vmatpush.bf16.msra.mxu0 %v3780_v0  ;;  %v5357_v48 = vld [vmem:[%s6141_s10 + $0x314] sm:$0xf0]  ;;  %v3972_v58 = vor.u32 %v5325_v46, %v3971_v44  ;;  %v3832_v0 = vor.u32 %v5287_v49, %v3829_v50  ;;  %v5311_v18 = vld [vmem:[%s6141_s10 + $0x1ac] sm:$0xf]  ;;  %v3925_v20 = vld [vmem:[%s6141_s10 + $0x1b8] sm:$0xf0] }
  0x97   : > { %1257 = vmatpush.bf16.msra.mxu1 %v3908_v2  ;;  %v4100_v62 = vor.u32 %v5357_v48, %v4099_v47  ;;  %v3960_v2 = vor.u32 %v5319_v51, %v3957_v53  ;;  %v5343_v21 = vld [vmem:[%s6141_s10 + $0x2ac] sm:$0xf]  ;;  %v4053_v22 = vld [vmem:[%s6141_s10 + $0x2b8] sm:$0xf0] }
  0x98   : > { %1271 = vmatpush.bf16.msra.mxu2 %v4036_v3  ;;  %v4088_v3 = vor.u32 %v5351_v54, %v4085_v55  ;;  %v5375_v23 = vld [vmem:[%s6141_s10 + $0x3ac] sm:$0xf]  ;;  %v4181_v24 = vld [vmem:[%s6141_s10 + $0x3b8] sm:$0xf0] }
  0x99   : > { %1285 = vmatpush.bf16.msra.mxu3 %v4164_v7  ;;  %v4216_v7 = vor.u32 %v5383_v59, %v4213_v61  ;;  %v5275_v28 = vld [vmem:[%s6141_s10 + $0x8c] sm:$0xf]  ;;  %v3781_v29 = vld [vmem:[%s6141_s10 + $0x98] sm:$0xf0] }
  0x9a   : > { %1244 = vmatpush.bf16.msra.mxu0 %v3764_v13  ;;  %v3816_v13 = vor.u32 %v5283_v4, %v3813_v5  ;;  %v5307_v30 = vld [vmem:[%s6141_s10 + $0x18c] sm:$0xf]  ;;  %v3909_v32 = vld [vmem:[%s6141_s10 + $0x198] sm:$0xf0] }
  0x9b   : > { %1258 = vmatpush.bf16.msra.mxu1 %v3892_v14  ;;  %v3944_v14 = vor.u32 %v5315_v6, %v3941_v8  ;;  %v5339_v33 = vld [vmem:[%s6141_s10 + $0x28c] sm:$0xf]  ;;  %v4037_v34 = vld [vmem:[%s6141_s10 + $0x298] sm:$0xf0]  ;;  %v3912_v38 = vor.u32 %v5307_v30, %v3909_v32  ;;  %v4587_v30 = vld [vmem:[%s6147_s0 + $0x2e0] sm:$0xf] }
  0x9c   : > { %1272 = vmatpush.bf16.msra.mxu2 %v4020_v15  ;;  %v4072_v15 = vor.u32 %v5347_v9, %v4069_v10  ;;  %v5371_v35 = vld [vmem:[%s6141_s10 + $0x38c] sm:$0xf]  ;;  %v4165_v36 = vld [vmem:[%s6141_s10 + $0x398] sm:$0xf0]  ;;  %v4040_v39 = vor.u32 %v5339_v33, %v4037_v34  ;;  %v4715_v34 = vld [vmem:[%s6147_s0 + $0x3e0] sm:$0xf] }
  0x9d   : > { %1286 = vmatpush.bf16.msra.mxu3 %v4148_v19  ;;  %v4200_v19 = vor.u32 %v5379_v11, %v4197_v12  ;;  %v5303_v42 = vld [vmem:[%s6141_s10 + $0x16c] sm:$0xf]  ;;  %v4168_v43 = vor.u32 %v5371_v35, %v4165_v36  ;;  %v3893_v44 = vld [vmem:[%s6141_s10 + $0x178] sm:$0xf0]  ;;  %v5512_v35 = vld [vmem:[%s6147_s0 + $0x3ec] sm:$0xf0] }
  0x9e   : > { %1245 = vmatpush.bf16.msra.mxu0 %v3748_v25  ;;  %v3800_v25 = vor.u32 %v5279_v16, %v3797_v17  ;;  %v4021_v46 = vld [vmem:[%s6141_s10 + $0x278] sm:$0xf0]  ;;  %v5367_v47 = vld [vmem:[%s6141_s10 + $0x36c] sm:$0xf]  ;;  %v3896_v50 = vor.u32 %v5303_v42, %v3893_v44  ;;  %v4443_v42 = vld [vmem:[%s6147_s0 + $0x1c0] sm:$0xf] }
  0x9f   : > { %1259 = vmatpush.bf16.msra.mxu1 %v3876_v26  ;;  %v3928_v26 = vor.u32 %v5311_v18, %v3925_v20  ;;  %v4149_v48 = vld [vmem:[%s6141_s10 + $0x378] sm:$0xf0]  ;;  %v5299_v54 = vld [vmem:[%s6141_s10 + $0x14c] sm:$0xf]  ;;  %v5444_v44 = vld [vmem:[%s6147_s0 + $0x1cc] sm:$0xf0] }
  0xa0   : > { %1273 = vmatpush.bf16.msra.mxu2 %v4004_v27  ;;  %v4056_v27 = vor.u32 %v5343_v21, %v4053_v22  ;;  %v3749_v53 = vld [vmem:[%s6141_s10 + $0x58] sm:$0xf0]  ;;  %v4152_v55 = vor.u32 %v5367_v47, %v4149_v48  ;;  %v5363_v61 = vld [vmem:[%s6141_s10 + $0x34c] sm:$0xf]  ;;  %v4699_v47 = vld [vmem:[%s6147_s0 + $0x3c0] sm:$0xf] }
  0xa1   : > { %1287 = vmatpush.bf16.msra.mxu3 %v4132_v31  ;;  %v4184_v31 = vor.u32 %v5375_v23, %v4181_v24  ;;  %v4005_v59 = vld [vmem:[%s6141_s10 + $0x258] sm:$0xf0]  ;;  %v5263_v4 = vld [vmem:[%s6141_s10 + $0x2c] sm:$0xf]  ;;  %v5508_v48 = vld [vmem:[%s6147_s0 + $0x3cc] sm:$0xf0] }
  0xa2   : > { %1246 = vmatpush.bf16.msra.mxu0 %v3732_v37  ;;  %v3784_v37 = vor.u32 %v5275_v28, %v3781_v29  ;;  %v3733_v5 = vld [vmem:[%s6141_s10 + $0x38] sm:$0xf0]  ;;  %v5295_v6 = vld [vmem:[%s6141_s10 + $0x12c] sm:$0xf]  ;;  %v5448_v29 = vld [vmem:[%s6147_s0 + $0x1ec] sm:$0xf0] }
  0xa3   : > { %1260 = vmatpush.bf16.msra.mxu1 %v3860_v40  ;;  %v5271_v40 = vld [vmem:[%s6141_s10 + $0x6c] sm:$0xf]  ;;  %v3861_v8 = vld [vmem:[%s6141_s10 + $0x138] sm:$0xf0] }
  0xa4   : > { %1274 = vmatpush.bf16.msra.mxu2 %v3988_v41  ;;  %v3765_v41 = vld [vmem:[%s6141_s10 + $0x78] sm:$0xf0]  ;;  %v5327_v9 = vld [vmem:[%s6141_s10 + $0x22c] sm:$0xf]  ;;  %v3864_v16 = vor.u32 %v5295_v6, %v3861_v8  ;;  %v4411_v6 = vld [vmem:[%s6147_s0 + $0x180] sm:$0xf] }
  0xa5   : > { %1288 = vmatpush.bf16.msra.mxu3 %v4116_v45  ;;  %v5335_v45 = vld [vmem:[%s6141_s10 + $0x26c] sm:$0xf]  ;;  %v3768_v49 = vor.u32 %v5271_v40, %v3765_v41  ;;  %v3989_v10 = vld [vmem:[%s6141_s10 + $0x238] sm:$0xf0]  ;;  %v4315_v40 = vld [vmem:[%s6147_s0 + $0xc0] sm:$0xf] }
  0xa6   : > { %1247 = vmatpush.bf16.msra.mxu0 %v3716_v52  ;;  %v4024_v51 = vor.u32 %v5335_v45, %v4021_v46  ;;  %v5267_v52 = vld [vmem:[%s6141_s10 + $0x4c] sm:$0xf]  ;;  %v4117_v12 = vld [vmem:[%s6141_s10 + $0x338] sm:$0xf0]  ;;  %v3992_v17 = vor.u32 %v5327_v9, %v3989_v10  ;;  %v5412_v41 = vld [vmem:[%s6147_s0 + $0xcc] sm:$0xf0] }
  0xa7   : > { %1261 = vmatpush.bf16.msra.mxu1 %v3844_v57  ;;  %v3877_v57 = vld [vmem:[%s6141_s10 + $0x158] sm:$0xf0]  ;;  %v5359_v11 = vld [vmem:[%s6141_s10 + $0x32c] sm:$0xf]  ;;  %v4571_v45 = vld [vmem:[%s6147_s0 + $0x2c0] sm:$0xf] }
  0xa8   : > { %1275 = vmatpush.bf16.msra.mxu2 %v3972_v58  ;;  %v5331_v58 = vld [vmem:[%s6141_s10 + $0x24c] sm:$0xf]  ;;  %v4120_v21 = vor.u32 %v5359_v11, %v4117_v12  ;;  %v3973_v22 = vld [vmem:[%s6141_s10 + $0x218] sm:$0xf0]  ;;  %v5476_v46 = vld [vmem:[%s6147_s0 + $0x2cc] sm:$0xf0] }
  0xa9   : > { %1289 = vmatpush.bf16.msra.mxu3 %v4100_v62  ;;  %1248 = vmatmul.bf16.vlgmr.msra.gmra.mxu0 %v6240_v63  ;;  %v4133_v62 = vld [vmem:[%s6141_s10 + $0x358] sm:$0xf0]  ;;  %v5291_v18 = vld [vmem:[%s6141_s10 + $0x10c] sm:$0xf]  ;;  %v5436_v8 = vld [vmem:[%s6147_s0 + $0x18c] sm:$0xf0] }
  0xaa   : > { %1296 = vmatpush.bf16.msrb.mxu0 %v3832_v0  ;;  %1262 = vmatmul.bf16.vlgmr.msra.gmra.mxu1 %v6242_v1  ;;  %v3752_v0 = vor.u32 %v5267_v52, %v3749_v53  ;;  %v5323_v20 = vld [vmem:[%s6141_s10 + $0x20c] sm:$0xf]  ;;  %v4101_v24 = vld [vmem:[%s6141_s10 + $0x318] sm:$0xf0]  ;;  %v4299_v52 = vld [vmem:[%s6147_s0 + $0xa0] sm:$0xf] }
  0xab   : > { %1310 = vmatpush.bf16.msrb.mxu1 %v3960_v2  ;;  %1276 = vmatmul.bf16.vlgmr.msra.gmra.mxu2 %v6231_v56  ;;  %v3880_v2 = vor.u32 %v5299_v54, %v3877_v57  ;;  %v5355_v23 = vld [vmem:[%s6141_s10 + $0x30c] sm:$0xf]  ;;  %v3976_v33 = vor.u32 %v5323_v20, %v3973_v22  ;;  %v5408_v53 = vld [vmem:[%s6147_s0 + $0xac] sm:$0xf0]  ;;  %v4427_v54 = vld [vmem:[%s6147_s0 + $0x1a0] sm:$0xf] }
  0xac   : > { %1324 = vmatpush.bf16.msrb.mxu2 %v4088_v3  ;;  %1290 = vmatmul.bf16.vlgmr.msra.gmra.mxu3 %v6236_v60  ;;  %v4008_v3 = vor.u32 %v5331_v58, %v4005_v59  ;;  %v4104_v36 = vor.u32 %v5355_v23, %v4101_v24  ;;  %v5440_v57 = vld [vmem:[%s6147_s0 + $0x1ac] sm:$0xf0]  ;;  %v4555_v58 = vld [vmem:[%s6147_s0 + $0x2a0] sm:$0xf] }
  0xad   : > { %1338 = vmatpush.bf16.msrb.mxu3 %v4216_v7  ;;  %v4136_v7 = vor.u32 %v5363_v61, %v4133_v62  ;;  %v5472_v59 = vld [vmem:[%s6147_s0 + $0x2ac] sm:$0xf0]  ;;  %v4683_v61 = vld [vmem:[%s6147_s0 + $0x3a0] sm:$0xf] }
  0xae   : > { %1297 = vmatpush.bf16.msrb.mxu0 %v3816_v13  ;;  %v3736_v13 = vor.u32 %v5263_v4, %v3733_v5  ;;  %v5504_v62 = vld [vmem:[%s6147_s0 + $0x3ac] sm:$0xf0]  ;;  %v4283_v4 = vld [vmem:[%s6147_s0 + $0x80] sm:$0xf] }
  0xaf   : > { %1311 = vmatpush.bf16.msrb.mxu1 %v3944_v14  ;;  %v5259_v14 = vld [vmem:[%s6141_s10 + $0xc] sm:$0xf]  ;;  %v5404_v5 = vld [vmem:[%s6147_s0 + $0x8c] sm:$0xf0]  ;;  %v4539_v9 = vld [vmem:[%s6147_s0 + $0x280] sm:$0xf] }
  0xb0   : > { %1325 = vmatpush.bf16.msrb.mxu2 %v4072_v15  ;;  %v3717_v15 = vld [vmem:[%s6141_s10 + $0x18] sm:$0xf0]  ;;  %v5468_v10 = vld [vmem:[%s6147_s0 + $0x28c] sm:$0xf0]  ;;  %v4667_v11 = vld [vmem:[%s6147_s0 + $0x380] sm:$0xf] }
  0xb1   : > { %1339 = vmatpush.bf16.msrb.mxu3 %v4200_v19  ;;  %v3845_v19 = vld [vmem:[%s6141_s10 + $0x118] sm:$0xf0]  ;;  %v3720_v28 = vor.u32 %v5259_v14, %v3717_v15  ;;  %v5500_v12 = vld [vmem:[%s6147_s0 + $0x38c] sm:$0xf0]  ;;  %v4412_v14 = vor.u32 %v5436_v8, %v4411_v6  ;;  %v4540_v15 = vor.u32 %v5468_v10, %v4539_v9  ;;  %v4651_v23 = vld [vmem:[%s6147_s0 + $0x360] sm:$0xf] }
  0xb2   : > { %1298 = vmatpush.bf16.msrb.mxu0 %v3800_v25  ;;  %v4331_v25 = vld [vmem:[%s6147_s0 + $0xe0] sm:$0xf]  ;;  %v3848_v32 = vor.u32 %v5291_v18, %v3845_v19  ;;  %v4668_v19 = vor.u32 %v5500_v12, %v4667_v11  ;;  %v5432_v20 = vld [vmem:[%s6147_s0 + $0x16c] sm:$0xf0]  ;;  %v5478_v6 = vld [vmem:[%s6147_s0 + $0x2e4] sm:$0xf] }
  0xb3   : > { %1312 = vmatpush.bf16.msrb.mxu1 %v3928_v26  ;;  %v5416_v26 = vld [vmem:[%s6147_s0 + $0xec] sm:$0xf0]  ;;  %v4395_v18 = vld [vmem:[%s6147_s0 + $0x160] sm:$0xf]  ;;  %v5510_v10 = vld [vmem:[%s6147_s0 + $0x3e4] sm:$0xf] }
  0xb4   : > { %1326 = vmatpush.bf16.msrb.mxu2 %v4056_v27  ;;  %v4459_v27 = vld [vmem:[%s6147_s0 + $0x1e0] sm:$0xf]  ;;  %v5464_v22 = vld [vmem:[%s6147_s0 + $0x26c] sm:$0xf0]  ;;  %v4717_v11 = vld [vmem:[%s6147_s0 + $0x3f0] sm:$0xf0] }
  0xb5   : > { %1340 = vmatpush.bf16.msrb.mxu3 %v4184_v31  ;;  %v5480_v31 = vld [vmem:[%s6147_s0 + $0x2ec] sm:$0xf0] }
  0xb6   : > { %1299 = vmatpush.bf16.msrb.mxu0 %v3784_v37  ;;  %v4332_v37 = vor.u32 %v5416_v26, %v4331_v25  ;;  %v5496_v24 = vld [vmem:[%s6147_s0 + $0x36c] sm:$0xf0]  ;;  %v4396_v26 = vor.u32 %v5432_v20, %v4395_v18  ;;  %v5442_v18 = vld [vmem:[%s6147_s0 + $0x1c4] sm:$0xf]  ;;  %v4445_v20 = vld [vmem:[%s6147_s0 + $0x1d0] sm:$0xf0] }
  0xb7   : > { %1313 = vmatpush.bf16.msrb.mxu1 %v3912_v38  ;;  %v4460_v38 = vor.u32 %v5448_v29, %v4459_v27  ;;  %v5396_v29 = vld [vmem:[%s6147_s0 + $0x4c] sm:$0xf0] }
  0xb8   : > { %1327 = vmatpush.bf16.msrb.mxu2 %v4040_v39  ;;  %v4588_v39 = vor.u32 %v5480_v31, %v4587_v30  ;;  %v4379_v30 = vld [vmem:[%s6147_s0 + $0x140] sm:$0xf]  ;;  %v4652_v31 = vor.u32 %v5496_v24, %v4651_v23  ;;  %v5506_v23 = vld [vmem:[%s6147_s0 + $0x3c4] sm:$0xf]  ;;  %v4701_v24 = vld [vmem:[%s6147_s0 + $0x3d0] sm:$0xf0] }
  0xb9   : > { %1341 = vmatpush.bf16.msrb.mxu3 %v4168_v43  ;;  %v4716_v43 = vor.u32 %v5512_v35, %v4715_v34  ;;  %v5460_v34 = vld [vmem:[%s6147_s0 + $0x24c] sm:$0xf0]  ;;  %v4635_v35 = vld [vmem:[%s6147_s0 + $0x340] sm:$0xf] }
  0xba   : > { %1300 = vmatpush.bf16.msrb.mxu0 %v3768_v49  ;;  %v4316_v49 = vor.u32 %v5412_v41, %v4315_v40  ;;  %v4235_v40 = vld [vmem:[%s6147_s0 + $0x20] sm:$0xf]  ;;  %v5392_v41 = vld [vmem:[%s6147_s0 + $0x2c] sm:$0xf0] }
  0xbb   : > { %1314 = vmatpush.bf16.msrb.mxu1 %v3896_v50  ;;  %v4444_v50 = vor.u32 %v5444_v44, %v4443_v42  ;;  %v4363_v42 = vld [vmem:[%s6147_s0 + $0x120] sm:$0xf]  ;;  %v5424_v44 = vld [vmem:[%s6147_s0 + $0x12c] sm:$0xf0] }
  0xbc   : > { %1328 = vmatpush.bf16.msrb.mxu2 %v4024_v51  ;;  %v4572_v51 = vor.u32 %v5476_v46, %v4571_v45  ;;  %v4491_v45 = vld [vmem:[%s6147_s0 + $0x220] sm:$0xf]  ;;  %v5456_v46 = vld [vmem:[%s6147_s0 + $0x22c] sm:$0xf0] }
  0xbd   : > { %1342 = vmatpush.bf16.msrb.mxu3 %v4152_v55  ;;  %v4700_v55 = vor.u32 %v5508_v48, %v4699_v47  ;;  %v4619_v47 = vld [vmem:[%s6147_s0 + $0x320] sm:$0xf]  ;;  %v5488_v48 = vld [vmem:[%s6147_s0 + $0x32c] sm:$0xf0] }
  0xbe   : > { %1301 = vmatpush.bf16.msrb.mxu0 %v3752_v0  ;;  %v4300_v0 = vor.u32 %v5408_v53, %v4299_v52  ;;  %v4364_v52 = vor.u32 %v5424_v44, %v4363_v42  ;;  %v4492_v53 = vor.u32 %v5456_v46, %v4491_v45  ;;  %v5434_v42 = vld [vmem:[%s6147_s0 + $0x184] sm:$0xf]  ;;  %v4413_v44 = vld [vmem:[%s6147_s0 + $0x190] sm:$0xf0] }
  0xbf   : > { %1315 = vmatpush.bf16.msrb.mxu1 %v3880_v2  ;;  %v4428_v2 = vor.u32 %v5440_v57, %v4427_v54  ;;  %v4347_v54 = vld [vmem:[%s6147_s0 + $0x100] sm:$0xf]  ;;  %v5466_v45 = vld [vmem:[%s6147_s0 + $0x284] sm:$0xf]  ;;  %v4541_v46 = vld [vmem:[%s6147_s0 + $0x290] sm:$0xf0] }
  0xc0   : > { %1329 = vmatpush.bf16.msrb.mxu2 %v4008_v3  ;;  %v4556_v3 = vor.u32 %v5472_v59, %v4555_v58  ;;  %v4475_v57 = vld [vmem:[%s6147_s0 + $0x200] sm:$0xf]  ;;  %v4620_v58 = vor.u32 %v5488_v48, %v4619_v47  ;;  %v5452_v59 = vld [vmem:[%s6147_s0 + $0x20c] sm:$0xf0]  ;;  %v5498_v47 = vld [vmem:[%s6147_s0 + $0x384] sm:$0xf] }
  0xc1   : > { %1343 = vmatpush.bf16.msrb.mxu3 %v4136_v7  ;;  %v4684_v7 = vor.u32 %v5504_v62, %v4683_v61  ;;  %v4603_v61 = vld [vmem:[%s6147_s0 + $0x300] sm:$0xf]  ;;  %v5484_v62 = vld [vmem:[%s6147_s0 + $0x30c] sm:$0xf0]  ;;  %v4476_v9 = vor.u32 %v5452_v59, %v4475_v57  ;;  %v4669_v48 = vld [vmem:[%s6147_s0 + $0x390] sm:$0xf0] }
  0xc2   : > { %1302 = vmatpush.bf16.msrb.mxu0 %v3736_v13  ;;  %v4284_v13 = vor.u32 %v5404_v5, %v4283_v4  ;;  %v4461_v5 = vld [vmem:[%s6147_s0 + $0x1f0] sm:$0xf0]  ;;  %v4604_v12 = vor.u32 %v5484_v62, %v4603_v61  ;;  %v5494_v61 = vld [vmem:[%s6147_s0 + $0x364] sm:$0xf] }
  0xc3   : > { %1316 = vmatpush.bf16.msrb.mxu1 %v3864_v16  ;;  %v4267_v16 = vld [vmem:[%s6147_s0 + $0x60] sm:$0xf]  ;;  %v4397_v57 = vld [vmem:[%s6147_s0 + $0x170] sm:$0xf0] }
  0xc4   : > { %1330 = vmatpush.bf16.msrb.mxu2 %v3992_v17  ;;  %v5400_v17 = vld [vmem:[%s6147_s0 + $0x6c] sm:$0xf0]  ;;  %v4525_v59 = vld [vmem:[%s6147_s0 + $0x270] sm:$0xf0] }
  0xc5   : > { %1344 = vmatpush.bf16.msrb.mxu3 %v4120_v21  ;;  %v4523_v21 = vld [vmem:[%s6147_s0 + $0x260] sm:$0xf]  ;;  %v4268_v25 = vor.u32 %v5400_v17, %v4267_v16  ;;  %v5410_v16 = vld [vmem:[%s6147_s0 + $0xc4] sm:$0xf]  ;;  %v4317_v17 = vld [vmem:[%s6147_s0 + $0xd0] sm:$0xf0] }
  0xc6   : > { %1303 = vmatpush.bf16.msrb.mxu0 %v3720_v28  ;;  %v4524_v27 = vor.u32 %v5464_v22, %v4523_v21  ;;  %v4251_v28 = vld [vmem:[%s6147_s0 + $0x40] sm:$0xf]  ;;  %v5474_v21 = vld [vmem:[%s6147_s0 + $0x2c4] sm:$0xf]  ;;  %v4573_v22 = vld [vmem:[%s6147_s0 + $0x2d0] sm:$0xf0] }
  0xc7   : > { %1317 = vmatpush.bf16.msrb.mxu1 %v3848_v32  ;;  %v5428_v32 = vld [vmem:[%s6147_s0 + $0x14c] sm:$0xf0]  ;;  %v4653_v62 = vld [vmem:[%s6147_s0 + $0x370] sm:$0xf0] }
  0xc8   : > { %1331 = vmatpush.bf16.msrb.mxu2 %v3976_v33  ;;  %v4507_v33 = vld [vmem:[%s6147_s0 + $0x240] sm:$0xf] }
  0xc9   : > { %1345 = vmatpush.bf16.msrb.mxu3 %v4104_v36  ;;  %1304 = vmatmul.bf16.vlgmr.msrb.gmra.mxu0 %v6240_v63  ;;  %v5492_v36 = vld [vmem:[%s6147_s0 + $0x34c] sm:$0xf0] }
  0xca   : > { %2120 = vmatpush.bf16.msra.mxu0 %v4332_v37  ;;  %1318 = vmatmul.bf16.vlgmr.msrb.gmra.mxu1 %v6242_v1  ;;  %v4252_v37 = vor.u32 %v5396_v29, %v4251_v28  ;;  %v5406_v28 = vld [vmem:[%s6147_s0 + $0xa4] sm:$0xf]  ;;  %v4301_v29 = vld [vmem:[%s6147_s0 + $0xb0] sm:$0xf0] }
  0xcb   : > { %2134 = vmatpush.bf16.msra.mxu1 %v4460_v38  ;;  %1332 = vmatmul.bf16.vlgmr.msrb.gmra.mxu2 %v6231_v56  ;;  %v4380_v38 = vor.u32 %v5428_v32, %v4379_v30  ;;  %v5438_v30 = vld [vmem:[%s6147_s0 + $0x1a4] sm:$0xf]  ;;  %v4429_v32 = vld [vmem:[%s6147_s0 + $0x1b0] sm:$0xf0] }
  0xcc   : > { %2148 = vmatpush.bf16.msra.mxu2 %v4588_v39  ;;  %1346 = vmatmul.bf16.vlgmr.msrb.gmra.mxu3 %v6236_v60  ;;  %v4508_v39 = vor.u32 %v5460_v34, %v4507_v33  ;;  %v5470_v33 = vld [vmem:[%s6147_s0 + $0x2a4] sm:$0xf]  ;;  %v4557_v34 = vld [vmem:[%s6147_s0 + $0x2b0] sm:$0xf0] }
  0xcd   : > { %2162 = vmatpush.bf16.msra.mxu3 %v4716_v43  ;;  %v4636_v43 = vor.u32 %v5492_v36, %v4635_v35  ;;  %v5502_v35 = vld [vmem:[%s6147_s0 + $0x3a4] sm:$0xf]  ;;  %v4685_v36 = vld [vmem:[%s6147_s0 + $0x3b0] sm:$0xf0] }
  0xce   : > { %2121 = vmatpush.bf16.msra.mxu0 %v4316_v49  ;;  %v4236_v49 = vor.u32 %v5392_v41, %v4235_v40  ;;  %v5402_v40 = vld [vmem:[%s6147_s0 + $0x84] sm:$0xf]  ;;  %v4285_v41 = vld [vmem:[%s6147_s0 + $0x90] sm:$0xf0] }
  0xcf   : > { %2135 = vmatpush.bf16.msra.mxu1 %v4444_v50  ;;  %v4219_v50 = vld [vmem:[%s6147_s0] sm:$0xf] }
  0xd0   : > { %2149 = vmatpush.bf16.msra.mxu2 %v4572_v51  ;;  %v5388_v51 = vld [vmem:[%s6147_s0 + $0xc] sm:$0xf0] }
  0xd1   : > { %2163 = vmatpush.bf16.msra.mxu3 %v4700_v55  ;;  %v5420_v55 = vld [vmem:[%s6147_s0 + $0x10c] sm:$0xf0]  ;;  %v4220_v4 = vor.u32 %v5388_v51, %v4219_v50  ;;  %v4416_v50 = vor.u32 %v5434_v42, %v4413_v44  ;;  %v4544_v51 = vor.u32 %v5466_v45, %v4541_v46  ;;  %v4595_v42 = vld [vmem:[%s6147_s0 + $0x2e8] sm:$0xf] }
  0xd2   : > { %2122 = vmatpush.bf16.msra.mxu0 %v4300_v0  ;;  %v5414_v0 = vld [vmem:[%s6147_s0 + $0xe4] sm:$0xf]  ;;  %v4348_v8 = vor.u32 %v5420_v55, %v4347_v54  ;;  %v4672_v55 = vor.u32 %v5498_v47, %v4669_v48  ;;  %v4723_v46 = vld [vmem:[%s6147_s0 + $0x3e8] sm:$0xf]  ;;  %v5513_v47 = vld [vmem:[%s6147_s0 + $0x3f4] sm:$0xf0] }
  0xd3   : > { %2136 = vmatpush.bf16.msra.mxu1 %v4428_v2  ;;  %v4333_v2 = vld [vmem:[%s6147_s0 + $0xf0] sm:$0xf0]  ;;  %v5430_v54 = vld [vmem:[%s6147_s0 + $0x164] sm:$0xf] }
  0xd4   : > { %2150 = vmatpush.bf16.msra.mxu2 %v4556_v3  ;;  %v5446_v3 = vld [vmem:[%s6147_s0 + $0x1e4] sm:$0xf] }
  0xd5   : > { %2164 = vmatpush.bf16.msra.mxu3 %v4684_v7  ;;  %v4589_v7 = vld [vmem:[%s6147_s0 + $0x2f0] sm:$0xf0] }
  0xd6   : > { %2123 = vmatpush.bf16.msra.mxu0 %v4284_v13  ;;  %v4336_v13 = vor.u32 %v5414_v0, %v4333_v2  ;;  %v4400_v2 = vor.u32 %v5430_v54, %v4397_v57  ;;  %v4451_v54 = vld [vmem:[%s6147_s0 + $0x1c8] sm:$0xf]  ;;  %v5445_v57 = vld [vmem:[%s6147_s0 + $0x1d4] sm:$0xf0] }
  0xd7   : > { %2137 = vmatpush.bf16.msra.mxu1 %v4412_v14  ;;  %v4464_v14 = vor.u32 %v5446_v3, %v4461_v5  ;;  %v4253_v5 = vld [vmem:[%s6147_s0 + $0x50] sm:$0xf0] }
  0xd8   : > { %2151 = vmatpush.bf16.msra.mxu2 %v4540_v15  ;;  %v4592_v15 = vor.u32 %v5478_v6, %v4589_v7  ;;  %v5426_v6 = vld [vmem:[%s6147_s0 + $0x144] sm:$0xf]  ;;  %v4656_v7 = vor.u32 %v5494_v61, %v4653_v62  ;;  %v4707_v61 = vld [vmem:[%s6147_s0 + $0x3c8] sm:$0xf]  ;;  %v5509_v62 = vld [vmem:[%s6147_s0 + $0x3d4] sm:$0xf0] }
  0xd9   : > { %2165 = vmatpush.bf16.msra.mxu3 %v4668_v19  ;;  %v4720_v19 = vor.u32 %v5510_v10, %v4717_v11  ;;  %v4509_v10 = vld [vmem:[%s6147_s0 + $0x250] sm:$0xf0]  ;;  %v5490_v11 = vld [vmem:[%s6147_s0 + $0x344] sm:$0xf] }
  0xda   : > { %2124 = vmatpush.bf16.msra.mxu0 %v4268_v25  ;;  %v4320_v25 = vor.u32 %v5410_v16, %v4317_v17  ;;  %v5390_v16 = vld [vmem:[%s6147_s0 + $0x24] sm:$0xf]  ;;  %v4237_v17 = vld [vmem:[%s6147_s0 + $0x30] sm:$0xf0] }
  0xdb   : > { %2138 = vmatpush.bf16.msra.mxu1 %v4396_v26  ;;  %v4448_v26 = vor.u32 %v5442_v18, %v4445_v20  ;;  %v5422_v18 = vld [vmem:[%s6147_s0 + $0x124] sm:$0xf]  ;;  %v4365_v20 = vld [vmem:[%s6147_s0 + $0x130] sm:$0xf0] }
  0xdc   : > { %2152 = vmatpush.bf16.msra.mxu2 %v4524_v27  ;;  %v4576_v27 = vor.u32 %v5474_v21, %v4573_v22  ;;  %v5454_v21 = vld [vmem:[%s6147_s0 + $0x224] sm:$0xf]  ;;  %v4493_v22 = vld [vmem:[%s6147_s0 + $0x230] sm:$0xf0] }
  0xdd   : > { %2166 = vmatpush.bf16.msra.mxu3 %v4652_v31  ;;  %v4704_v31 = vor.u32 %v5506_v23, %v4701_v24  ;;  %v5486_v23 = vld [vmem:[%s6147_s0 + $0x324] sm:$0xf]  ;;  %v4621_v24 = vld [vmem:[%s6147_s0 + $0x330] sm:$0xf0] }
  0xde   : > { %2125 = vmatpush.bf16.msra.mxu0 %v4252_v37  ;;  %v4304_v37 = vor.u32 %v5406_v28, %v4301_v29  ;;  %v4368_v28 = vor.u32 %v5422_v18, %v4365_v20  ;;  %v4496_v29 = vor.u32 %v5454_v21, %v4493_v22  ;;  %v4291_v18 = vld [vmem:[%s6147_s0 + $0x88] sm:$0xf]  ;;  %v5437_v22 = vld [vmem:[%s6147_s0 + $0x194] sm:$0xf0] }
  0xdf   : > { %2139 = vmatpush.bf16.msra.mxu1 %v4380_v38  ;;  %v4432_v38 = vor.u32 %v5438_v30, %v4429_v32  ;;  %v5418_v30 = vld [vmem:[%s6147_s0 + $0x104] sm:$0xf]  ;;  %v4419_v20 = vld [vmem:[%s6147_s0 + $0x188] sm:$0xf] }
  0xe0   : > { %2153 = vmatpush.bf16.msra.mxu2 %v4508_v39  ;;  %v4560_v39 = vor.u32 %v5470_v33, %v4557_v34  ;;  %v5450_v32 = vld [vmem:[%s6147_s0 + $0x204] sm:$0xf]  ;;  %v4624_v33 = vor.u32 %v5486_v23, %v4621_v24  ;;  %v4477_v34 = vld [vmem:[%s6147_s0 + $0x210] sm:$0xf0]  ;;  %v4547_v23 = vld [vmem:[%s6147_s0 + $0x288] sm:$0xf] }
  0xe1   : > { %2167 = vmatpush.bf16.msra.mxu3 %v4636_v43  ;;  %v4688_v43 = vor.u32 %v5502_v35, %v4685_v36  ;;  %v5482_v35 = vld [vmem:[%s6147_s0 + $0x304] sm:$0xf]  ;;  %v4605_v36 = vld [vmem:[%s6147_s0 + $0x310] sm:$0xf0]  ;;  %v4480_v45 = vor.u32 %v5450_v32, %v4477_v34  ;;  %v5469_v24 = vld [vmem:[%s6147_s0 + $0x294] sm:$0xf0] }
  0xe2   : > { %2126 = vmatpush.bf16.msra.mxu0 %v4236_v49  ;;  %v4288_v49 = vor.u32 %v5402_v40, %v4285_v41  ;;  %v5449_v41 = vld [vmem:[%s6147_s0 + $0x1f4] sm:$0xf0]  ;;  %v4608_v48 = vor.u32 %v5482_v35, %v4605_v36  ;;  %v4275_v32 = vld [vmem:[%s6147_s0 + $0x68] sm:$0xf] }
  0xe3   : > { %2140 = vmatpush.bf16.msra.mxu1 %v4364_v52  ;;  %v5398_v52 = vld [vmem:[%s6147_s0 + $0x64] sm:$0xf]  ;;  %v4403_v34 = vld [vmem:[%s6147_s0 + $0x168] sm:$0xf]  ;;  %v5433_v36 = vld [vmem:[%s6147_s0 + $0x174] sm:$0xf0] }
  0xe4   : > { %2154 = vmatpush.bf16.msra.mxu2 %v4492_v53  ;;  %v4269_v53 = vld [vmem:[%s6147_s0 + $0x70] sm:$0xf0] }
  0xe5   : > { %2168 = vmatpush.bf16.msra.mxu3 %v4620_v58  ;;  %v5462_v58 = vld [vmem:[%s6147_s0 + $0x264] sm:$0xf]  ;;  %v4272_v0 = vor.u32 %v5398_v52, %v4269_v53  ;;  %v4323_v52 = vld [vmem:[%s6147_s0 + $0xc8] sm:$0xf]  ;;  %v5413_v53 = vld [vmem:[%s6147_s0 + $0xd4] sm:$0xf0] }
  0xe6   : > { %2127 = vmatpush.bf16.msra.mxu0 %v4220_v4  ;;  %v4528_v3 = vor.u32 %v5462_v58, %v4525_v59  ;;  %v5394_v4 = vld [vmem:[%s6147_s0 + $0x44] sm:$0xf]  ;;  %v4579_v58 = vld [vmem:[%s6147_s0 + $0x2c8] sm:$0xf]  ;;  %v5477_v59 = vld [vmem:[%s6147_s0 + $0x2d4] sm:$0xf0] }
  0xe7   : > { %2141 = vmatpush.bf16.msra.mxu1 %v4348_v8  ;;  %v4381_v8 = vld [vmem:[%s6147_s0 + $0x150] sm:$0xf0] }
  0xe8   : > { %2155 = vmatpush.bf16.msra.mxu2 %v4476_v9  ;;  %v5458_v9 = vld [vmem:[%s6147_s0 + $0x244] sm:$0xf] }
  0xe9   : > { %2169 = vmatpush.bf16.msra.mxu3 %v4604_v12  ;;  %2128 = vmatmul.bf16.vlgmr.msra.gmra.mxu0 %v6240_v63  ;;  %v4637_v12 = vld [vmem:[%s6147_s0 + $0x350] sm:$0xf0] }
  0xea   : > { %2176 = vmatpush.bf16.msrb.mxu0 %v4336_v13  ;;  %2142 = vmatmul.bf16.vlgmr.msra.gmra.mxu1 %v6242_v1  ;;  %v4256_v13 = vor.u32 %v5394_v4, %v4253_v5  ;;  %v4307_v4 = vld [vmem:[%s6147_s0 + $0xa8] sm:$0xf]  ;;  %v5409_v5 = vld [vmem:[%s6147_s0 + $0xb4] sm:$0xf0] }
  0xeb   : > { %2190 = vmatpush.bf16.msrb.mxu1 %v4464_v14  ;;  %2156 = vmatmul.bf16.vlgmr.msra.gmra.mxu2 %v6231_v56  ;;  %v4384_v14 = vor.u32 %v5426_v6, %v4381_v8  ;;  %v4435_v6 = vld [vmem:[%s6147_s0 + $0x1a8] sm:$0xf]  ;;  %v4708_v8 = vor.u32 %v5509_v62, %v4707_v61  ;;  %v5393_v62 = vld [vmem:[%s6147_s0 + $0x34] sm:$0xf0] }
  0xec   : > { %2204 = vmatpush.bf16.msrb.mxu2 %v4592_v15  ;;  %2170 = vmatmul.bf16.vlgmr.msra.gmra.mxu3 %v6236_v60  ;;  %v4512_v15 = vor.u32 %v5458_v9, %v4509_v10  ;;  %v5441_v9 = vld [vmem:[%s6147_s0 + $0x1b4] sm:$0xf0]  ;;  %v4563_v10 = vld [vmem:[%s6147_s0 + $0x2a8] sm:$0xf] }
  0xed   : > { %2218 = vmatpush.bf16.msrb.mxu3 %v4720_v19  ;;  %v4640_v19 = vor.u32 %v5490_v11, %v4637_v12  ;;  %v5473_v11 = vld [vmem:[%s6147_s0 + $0x2b4] sm:$0xf0]  ;;  %v6593_v12 = vpop.f32.mrf.mxu1  ;;  %v4243_v61 = vld [vmem:[%s6147_s0 + $0x28] sm:$0xf] }
  0xee   : > { %2177 = vmatpush.bf16.msrb.mxu0 %v4320_v25  ;;  %v4240_v25 = vor.u32 %v5390_v16, %v4237_v17  ;;  %v4436_v16 = vor.u32 %v5441_v9, %v4435_v6  ;;  %v4564_v17 = vor.u32 %v5473_v11, %v4563_v10  ;;  %v5457_v6 = vld [vmem:[%s6147_s0 + $0x234] sm:$0xf0]  ;;  %v4244_v11 = vor.u32 %v5393_v62, %v4243_v61 }
  0xef   : > { %2191 = vmatpush.bf16.msrb.mxu1 %v4448_v26  ;;  %v5386_v26 = vld [vmem:[%s6147_s0 + $0x4] sm:$0xf]  ;;  %v5489_v9 = vld [vmem:[%s6147_s0 + $0x334] sm:$0xf0] }
  0xf0   : > { %2205 = vmatpush.bf16.msrb.mxu2 %v4576_v27  ;;  %v4221_v27 = vld [vmem:[%s6147_s0 + $0x10] sm:$0xf0] }
  0xf1   : > { %2219 = vmatpush.bf16.msrb.mxu3 %v4704_v31  ;;  %v4349_v31 = vld [vmem:[%s6147_s0 + $0x110] sm:$0xf0]  ;;  %v4224_v40 = vor.u32 %v5386_v26, %v4221_v27  ;;  %v4675_v26 = vld [vmem:[%s6147_s0 + $0x388] sm:$0xf]  ;;  %v5501_v27 = vld [vmem:[%s6147_s0 + $0x394] sm:$0xf0] }
  0xf2   : > { %2178 = vmatpush.bf16.msrb.mxu0 %v4304_v37  ;;  %v4339_v37 = vld [vmem:[%s6147_s0 + $0xe8] sm:$0xf]  ;;  %v4352_v44 = vor.u32 %v5418_v30, %v4349_v31  ;;  %v4420_v30 = vor.u32 %v5437_v22, %v4419_v20  ;;  %v4548_v31 = vor.u32 %v5469_v24, %v4547_v23  ;;  %v4676_v35 = vor.u32 %v5501_v27, %v4675_v26  ;;  %v5453_v22 = vld [vmem:[%s6147_s0 + $0x214] sm:$0xf0]  ;;  %v5415_v26 = vld [vmem:[%s6147_s0 + $0xec] sm:$0xf] }
  0xf3   : > { %2192 = vmatpush.bf16.msrb.mxu1 %v4432_v38  ;;  %v5417_v38 = vld [vmem:[%s6147_s0 + $0xf4] sm:$0xf0]  ;;  %v4483_v20 = vld [vmem:[%s6147_s0 + $0x208] sm:$0xf]  ;;  %v4341_v27 = vld [vmem:[%s6147_s0 + $0xf8] sm:$0xf0] }
  0xf4   : > { %2206 = vmatpush.bf16.msrb.mxu2 %v4560_v39  ;;  %v4467_v39 = vld [vmem:[%s6147_s0 + $0x1e8] sm:$0xf]  ;;  %v5485_v24 = vld [vmem:[%s6147_s0 + $0x314] sm:$0xf0] }
  0xf5   : > { %2220 = vmatpush.bf16.msrb.mxu3 %v4688_v43  ;;  %v5481_v43 = vld [vmem:[%s6147_s0 + $0x2f4] sm:$0xf0]  ;;  %v4611_v23 = vld [vmem:[%s6147_s0 + $0x308] sm:$0xf] }
  0xf6   : > { %2179 = vmatpush.bf16.msrb.mxu0 %v4288_v49  ;;  %v4340_v49 = vor.u32 %v5417_v38, %v4339_v37  ;;  %v4531_v37 = vld [vmem:[%s6147_s0 + $0x268] sm:$0xf]  ;;  %v5465_v38 = vld [vmem:[%s6147_s0 + $0x274] sm:$0xf0] }
  0xf7   : > { %2193 = vmatpush.bf16.msrb.mxu1 %v4416_v50  ;;  %v4468_v50 = vor.u32 %v5449_v41, %v4467_v39  ;;  %v4659_v39 = vld [vmem:[%s6147_s0 + $0x368] sm:$0xf] }
  0xf8   : > { %2207 = vmatpush.bf16.msrb.mxu2 %v4544_v51  ;;  %v4596_v51 = vor.u32 %v5481_v43, %v4595_v42  ;;  %v6622_v43 = vpop.f32.mrf.mxu1 }
  0xf9   : > { %2221 = vmatpush.bf16.msrb.mxu3 %v4672_v55  ;;  %v4724_v55 = vor.u32 %v5513_v47, %v4723_v46  ;;  %v4259_v46 = vld [vmem:[%s6147_s0 + $0x48] sm:$0xf]  ;;  %v5397_v47 = vld [vmem:[%s6147_s0 + $0x54] sm:$0xf0] }
  0xfa   : > { %2180 = vmatpush.bf16.msrb.mxu0 %v4272_v0  ;;  %v4324_v0 = vor.u32 %v5413_v53, %v4323_v52  ;;  %v5461_v52 = vld [vmem:[%s6147_s0 + $0x254] sm:$0xf0]  ;;  %v4643_v53 = vld [vmem:[%s6147_s0 + $0x348] sm:$0xf] }
  0xfb   : > { %2194 = vmatpush.bf16.msrb.mxu1 %v4400_v2  ;;  %v4452_v2 = vor.u32 %v5445_v57, %v4451_v54  ;;  %v5493_v54 = vld [vmem:[%s6147_s0 + $0x354] sm:$0xf0] }
  0xfc   : > { %2208 = vmatpush.bf16.msrb.mxu2 %v4528_v3  ;;  %v4580_v3 = vor.u32 %v5477_v59, %v4579_v58 }
  0xfd   : > { %2222 = vmatpush.bf16.msrb.mxu3 %v4656_v7  ;;  %v6587_v7 = vpop.f32.mrf.mxu0 }
  0xfe   : > { %2181 = vmatpush.bf16.msrb.mxu0 %v4256_v13  ;;  %v4691_v13 = vld [vmem:[%s6147_s0 + $0x3a8] sm:$0xf] }
  0xff   : > { %2195 = vmatpush.bf16.msrb.mxu1 %v4384_v14  ;;  %v5505_v14 = vld [vmem:[%s6147_s0 + $0x3b4] sm:$0xf0] }
 0x100   : > { %2209 = vmatpush.bf16.msrb.mxu2 %v4512_v15  ;;  %v4308_v15 = vor.u32 %v5409_v5, %v4307_v4  ;;  %v4692_v21 = vor.u32 %v5505_v14, %v4691_v13  ;;  %v5425_v4 = vld [vmem:[%s6147_s0 + $0x134] sm:$0xf0]  ;;  %v4499_v5 = vld [vmem:[%s6147_s0 + $0x228] sm:$0xf] }
 0x101   : > { %2223 = vmatpush.bf16.msrb.mxu3 %v4640_v19  ;;  %v5405_v19 = vld [vmem:[%s6147_s0 + $0x94] sm:$0xf0]  ;;  %v4227_v13 = vld [vmem:[%s6147_s0 + $0x8] sm:$0xf] }
 0x102   : > { %2182 = vmatpush.bf16.msrb.mxu0 %v4240_v25  ;;  %v6606_v25 = vpop.f32.mrf.mxu2  ;;  %v5389_v14 = vld [vmem:[%s6147_s0 + $0x14] sm:$0xf0] }
 0x103   : > { %2196 = vmatpush.bf16.msrb.mxu1 %v4368_v28  ;;  %v6610_v28 = vpop.f32.mrf.mxu3 }
 0x104   : > { %2210 = vmatpush.bf16.msrb.mxu2 %v4496_v29  ;;  %v4292_v29 = vor.u32 %v5405_v19, %v4291_v18  ;;  %v4355_v18 = vld [vmem:[%s6147_s0 + $0x108] sm:$0xf]  ;;  %v5421_v19 = vld [vmem:[%s6147_s0 + $0x114] sm:$0xf0] }
 0x105   : > { %2224 = vmatpush.bf16.msrb.mxu3 %v4624_v33  ;;  %v5401_v33 = vld [vmem:[%s6147_s0 + $0x74] sm:$0xf0]  ;;  %v6620_v41 = vpop.f32.mrf.mxu0 }
 0x106   : > { %2183 = vmatpush.bf16.msrb.mxu0 %v4224_v40  ;;  %v5497_v40 = vld [vmem:[%s6147_s0 + $0x374] sm:$0xf0]  ;;  %v4276_v42 = vor.u32 %v5401_v33, %v4275_v32  ;;  %v5479_v32 = vld [vmem:[%s6147_s0 + $0x2ec] sm:$0xf]  ;;  %v4597_v33 = vld [vmem:[%s6147_s0 + $0x2f8] sm:$0xf0] }
 0x107   : > { %2197 = vmatpush.bf16.msrb.mxu1 %v4352_v44  ;;  %v4404_v44 = vor.u32 %v5433_v36, %v4403_v34  ;;  %v4484_v36 = vor.u32 %v5453_v22, %v4483_v20  ;;  %v4293_v20 = vld [vmem:[%s6147_s0 + $0x98] sm:$0xf0] }
 0x108   : > { %2211 = vmatpush.bf16.msrb.mxu2 %v4480_v45  ;;  %v4532_v45 = vor.u32 %v5465_v38, %v4531_v37  ;;  %v5511_v37 = vld [vmem:[%s6147_s0 + $0x3ec] sm:$0xf]  ;;  %v4725_v38 = vld [vmem:[%s6147_s0 + $0x3f8] sm:$0xf0] }
 0x109   : > { %2225 = vmatpush.bf16.msrb.mxu3 %v4608_v48  ;;  %2184 = vmatmul.bf16.vlgmr.msrb.gmra.mxu0 %v6240_v63  ;;  %v4387_v48 = vld [vmem:[%s6147_s0 + $0x148] sm:$0xf] }
 0x10a   : > { %2232 = vmatpush.bf16.msra.mxu0 %v4340_v49  ;;  %2198 = vmatmul.bf16.vlgmr.msrb.gmra.mxu1 %v6242_v1  ;;  %v4660_v49 = vor.u32 %v5497_v40, %v4659_v39  ;;  %v6632_v57 = vpop.f32.mrf.mxu2  ;;  %v4612_v40 = vor.u32 %v5485_v24, %v4611_v23  ;;  %v4421_v24 = vld [vmem:[%s6147_s0 + $0x198] sm:$0xf0] }
 0x10b   : > { %2246 = vmatpush.bf16.msra.mxu1 %v4468_v50  ;;  %2212 = vmatmul.bf16.vlgmr.msrb.gmra.mxu2 %v6231_v56  ;;  %v5429_v50 = vld [vmem:[%s6147_s0 + $0x154] sm:$0xf0] }
 0x10c   : > { %2260 = vmatpush.bf16.msra.mxu2 %v4596_v51  ;;  %2226 = vmatmul.bf16.vlgmr.msrb.gmra.mxu3 %v6236_v60  ;;  %v4515_v51 = vld [vmem:[%s6147_s0 + $0x248] sm:$0xf]  ;;  %v4388_v58 = vor.u32 %v5429_v50, %v4387_v48  ;;  %v5443_v48 = vld [vmem:[%s6147_s0 + $0x1cc] sm:$0xf]  ;;  %v4453_v50 = vld [vmem:[%s6147_s0 + $0x1d8] sm:$0xf0] }
 0x10d   : > { %2274 = vmatpush.bf16.msra.mxu3 %v4724_v55  ;;  %v4260_v55 = vor.u32 %v5397_v47, %v4259_v46  ;;  %v4516_v59 = vor.u32 %v5461_v52, %v4515_v51  ;;  %v6644_v10 = vpop.f32.mrf.mxu0  ;;  %v5411_v46 = vld [vmem:[%s6147_s0 + $0xcc] sm:$0xf]  ;;  %v4325_v47 = vld [vmem:[%s6147_s0 + $0xd8] sm:$0xf0]  ;;  %v4456_v61 = vor.u32 %v5443_v48, %v4453_v50 }
 0x10e   : > { %2233 = vmatpush.bf16.msra.mxu0 %v4324_v0  ;;  %v4371_v0 = vld [vmem:[%s6147_s0 + $0x128] sm:$0xf]  ;;  %v5475_v51 = vld [vmem:[%s6147_s0 + $0x2cc] sm:$0xf]  ;;  %v4581_v52 = vld [vmem:[%s6147_s0 + $0x2d8] sm:$0xf0] }
 0x10f   : > { %2247 = vmatpush.bf16.msra.mxu1 %v4452_v2  ;;  %v6637_v2 = vpop.f32.mrf.mxu3  ;;  %v4584_v62 = vor.u32 %v5475_v51, %v4581_v52  ;;  %v5495_v48 = vld [vmem:[%s6147_s0 + $0x36c] sm:$0xf] }
 0x110   : > { %2261 = vmatpush.bf16.msra.mxu2 %v4580_v3  ;;  %v4644_v3 = vor.u32 %v5493_v54, %v4643_v53  ;;  %v5507_v53 = vld [vmem:[%s6147_s0 + $0x3cc] sm:$0xf]  ;;  %v4709_v54 = vld [vmem:[%s6147_s0 + $0x3d8] sm:$0xf0] }
 0x111   : > { %2275 = vmatpush.bf16.msra.mxu3 %v4708_v8  ;;  %v4627_v8 = vld [vmem:[%s6147_s0 + $0x328] sm:$0xf] }
 0x112   : > { %2234 = vmatpush.bf16.msra.mxu0 %v4308_v15  ;;  %v6648_v15 = vpop.f32.mrf.mxu1  ;;  %v6662_v34 = vpop.f32.mrf.mxu2 }
 0x113   : > { %2248 = vmatpush.bf16.msra.mxu1 %v4436_v16  ;;  %v4372_v16 = vor.u32 %v5425_v4, %v4371_v0  ;;  %v5407_v0 = vld [vmem:[%s6147_s0 + $0xac] sm:$0xf] }
 0x114   : > { %2262 = vmatpush.bf16.msra.mxu2 %v4564_v17  ;;  %v4500_v17 = vor.u32 %v5457_v6, %v4499_v5  ;;  %v5439_v4 = vld [vmem:[%s6147_s0 + $0x1ac] sm:$0xf]  ;;  %v4712_v5 = vor.u32 %v5507_v53, %v4709_v54  ;;  %v4437_v6 = vld [vmem:[%s6147_s0 + $0x1b8] sm:$0xf0] }
 0x115   : > { %2276 = vmatpush.bf16.msra.mxu3 %v4692_v21  ;;  %v4628_v21 = vor.u32 %v5489_v9, %v4627_v8  ;;  %v5471_v8 = vld [vmem:[%s6147_s0 + $0x2ac] sm:$0xf]  ;;  %v4565_v9 = vld [vmem:[%s6147_s0 + $0x2b8] sm:$0xf0] }
 0x116   : > { %2235 = vmatpush.bf16.msra.mxu0 %v4292_v29  ;;  %v5447_v29 = vld [vmem:[%s6147_s0 + $0x1ec] sm:$0xf] }
 0x117   : > { %2249 = vmatpush.bf16.msra.mxu1 %v4420_v30  ;;  %v4228_v30 = vor.u32 %v5389_v14, %v4227_v13  ;;  %v6666_v39 = vpop.f32.mrf.mxu3  ;;  %v4693_v13 = vld [vmem:[%s6147_s0 + $0x3b8] sm:$0xf0]  ;;  %v5395_v54 = vld [vmem:[%s6147_s0 + $0x4c] sm:$0xf] }
 0x118   : > { %2263 = vmatpush.bf16.msra.mxu2 %v4548_v31  ;;  %v4469_v31 = vld [vmem:[%s6147_s0 + $0x1f8] sm:$0xf0] }
 0x119   : > { %2277 = vmatpush.bf16.msra.mxu3 %v4676_v35  ;;  %v4356_v35 = vor.u32 %v5421_v19, %v4355_v18  ;;  %v4568_v18 = vor.u32 %v5471_v8, %v4565_v9  ;;  %v5403_v19 = vld [vmem:[%s6147_s0 + $0x8c] sm:$0xf]  ;;  %v4645_v9 = vld [vmem:[%s6147_s0 + $0x358] sm:$0xf0] }
 0x11a   : > { %2236 = vmatpush.bf16.msra.mxu0 %v4276_v42  ;;  %v4344_v42 = vor.u32 %v5415_v26, %v4341_v27  ;;  %v5467_v26 = vld [vmem:[%s6147_s0 + $0x28c] sm:$0xf]  ;;  %v4549_v27 = vld [vmem:[%s6147_s0 + $0x298] sm:$0xf0] }
 0x11b   : > { %2250 = vmatpush.bf16.msra.mxu1 %v4404_v44  ;;  %v4472_v44 = vor.u32 %v5447_v29, %v4469_v31  ;;  %v5499_v29 = vld [vmem:[%s6147_s0 + $0x38c] sm:$0xf]  ;;  %v4296_v31 = vor.u32 %v5403_v19, %v4293_v20  ;;  %v4245_v19 = vld [vmem:[%s6147_s0 + $0x38] sm:$0xf0] }
 0x11c   : > { %2264 = vmatpush.bf16.msra.mxu2 %v4532_v45  ;;  %v4600_v45 = vor.u32 %v5479_v32, %v4597_v33  ;;  %v5491_v8 = vld [vmem:[%s6147_s0 + $0x34c] sm:$0xf] }
 0x11d   : > { %2278 = vmatpush.bf16.msra.mxu3 %v4660_v49  ;;  %v4728_v49 = vor.u32 %v5511_v37, %v4725_v38  ;;  %v5399_v37 = vld [vmem:[%s6147_s0 + $0x6c] sm:$0xf]  ;;  %v4277_v38 = vld [vmem:[%s6147_s0 + $0x78] sm:$0xf0] }
 0x11e   : > { %2237 = vmatpush.bf16.msra.mxu0 %v4260_v55  ;;  %v6676_v55 = vpop.f32.mrf.mxu0  ;;  %v4280_v50 = vor.u32 %v5399_v37, %v4277_v38  ;;  %v5423_v20 = vld [vmem:[%s6147_s0 + $0x12c] sm:$0xf]  ;;  %v4357_v37 = vld [vmem:[%s6147_s0 + $0x118] sm:$0xf0]  ;;  %v1152_v38 = vadd.f32 %v6593_v12, %v6587_v7 }
 0x11f   : > { %2251 = vmatpush.bf16.msra.mxu1 %v4388_v58  ;;  %v4328_v58 = vor.u32 %v5411_v46, %v4325_v47  ;;  %v6697_v22 = vpop.f32.mrf.mxu3  ;;  %v5463_v46 = vld [vmem:[%s6147_s0 + $0x26c] sm:$0xf]  ;;  %v4533_v47 = vld [vmem:[%s6147_s0 + $0x278] sm:$0xf0] }
 0x120   : > { %2265 = vmatpush.bf16.msra.mxu2 %v4516_v59  ;;  %v6678_v59 = vpop.f32.mrf.mxu1  ;;  %v4536_v52 = vor.u32 %v5463_v46, %v4533_v47  ;;  %v1154_v46 = vadd.f32 %v6622_v43, %v6620_v41  ;;  %v4613_v47 = vld [vmem:[%s6147_s0 + $0x318] sm:$0xf0]  ;;  %v1166_v7 = vadd.f32 %v6606_v25, %v1152_v38  ;;  %v4835_v41 = vld [vmem:[%s6149_s28 + $0xc0] sm:$0xf]  ;;  %v5540_v43 = vld [vmem:[%s6149_s28 + $0xcc] sm:$0xf0] }
 0x121   : > { %2279 = vmatpush.bf16.msra.mxu3 %v4644_v3  ;;  %v4309_v3 = vld [vmem:[%s6147_s0 + $0xb8] sm:$0xf0]  ;;  %v4836_v25 = vor.u32 %v5540_v43, %v4835_v41  ;;  %v4899_v43 = vld [vmem:[%s6149_s28 + $0x140] sm:$0xf] }
 0x122   : > { %2238 = vmatpush.bf16.msra.mxu0 %v4244_v11  ;;  %v5503_v11 = vld [vmem:[%s6147_s0 + $0x3ac] sm:$0xf]  ;;  %v4312_v14 = vor.u32 %v5407_v0, %v4309_v3 }
 0x123   : > { %2252 = vmatpush.bf16.msra.mxu1 %v4372_v16  ;;  %v6692_v16 = vpop.f32.mrf.mxu2  ;;  %v4696_v23 = vor.u32 %v5503_v11, %v4693_v13 }
 0x124   : > { %2266 = vmatpush.bf16.msra.mxu2 %v4500_v17  ;;  %v4440_v17 = vor.u32 %v5439_v4, %v4437_v6  ;;  %v4389_v4 = vld [vmem:[%s6147_s0 + $0x158] sm:$0xf0] }
 0x125   : > { %2280 = vmatpush.bf16.msra.mxu3 %v4628_v21  ;;  %v5435_v21 = vld [vmem:[%s6147_s0 + $0x18c] sm:$0xf]  ;;  %v4517_v6 = vld [vmem:[%s6147_s0 + $0x258] sm:$0xf0] }
 0x126   : > { %2239 = vmatpush.bf16.msra.mxu0 %v4228_v30  ;;  %v4677_v30 = vld [vmem:[%s6147_s0 + $0x398] sm:$0xf0]  ;;  %v1249_v32 = vpop.f32.mrf.mxu0  ;;  %v4424_v33 = vor.u32 %v5435_v21, %v4421_v24  ;;  %v4648_v21 = vor.u32 %v5491_v8, %v4645_v9  ;;  %v5455_v24 = vld [vmem:[%s6147_s0 + $0x22c] sm:$0xf]  ;;  %v4963_v8 = vld [vmem:[%s6149_s28 + $0x1c0] sm:$0xf] }
 0x127   : > { %2253 = vmatpush.bf16.msra.mxu1 %v4356_v35  ;;  %v4552_v35 = vor.u32 %v5467_v26, %v4549_v27  ;;  %v4501_v26 = vld [vmem:[%s6147_s0 + $0x238] sm:$0xf0]  ;;  %v5487_v27 = vld [vmem:[%s6147_s0 + $0x32c] sm:$0xf]  ;;  %v5572_v9 = vld [vmem:[%s6149_s28 + $0x1cc] sm:$0xf0] }
 0x128   : > { %2267 = vmatpush.bf16.msra.mxu2 %v4484_v36  ;;  %v1263_v36 = vpop.f32.mrf.mxu1 }
 0x129   : > { %2281 = vmatpush.bf16.msra.mxu3 %v4612_v40  ;;  %2240 = vmatmul.bf16.vlgmr.msra.gmra.mxu0 %v6240_v63  ;;  %v5431_v40 = vld [vmem:[%s6147_s0 + $0x16c] sm:$0xf] }
 0x12a   : > { %2288 = vmatpush.bf16.msrb.mxu0 %v4344_v42  ;;  %2254 = vmatmul.bf16.vlgmr.msra.gmra.mxu1 %v6242_v1  ;;  %v4680_v42 = vor.u32 %v5499_v29, %v4677_v30  ;;  %v4629_v29 = vld [vmem:[%s6147_s0 + $0x338] sm:$0xf0] }
 0x12b   : > { %2302 = vmatpush.bf16.msrb.mxu1 %v4472_v44  ;;  %2268 = vmatmul.bf16.vlgmr.msra.gmra.mxu2 %v6231_v56  ;;  %v1264_v44 = vadd.f32 %v1263_v36, %v1249_v32  ;;  %v5419_v36 = vld [vmem:[%s6147_s0 + $0x10c] sm:$0xf] }
 0x12c   : > { %2316 = vmatpush.bf16.msrb.mxu2 %v4600_v45  ;;  %2282 = vmatmul.bf16.vlgmr.msra.gmra.mxu3 %v6236_v60  ;;  %v4405_v45 = vld [vmem:[%s6147_s0 + $0x178] sm:$0xf0] }
 0x12d   : > { %2330 = vmatpush.bf16.msrb.mxu3 %v4728_v49  ;;  %v4661_v49 = vld [vmem:[%s6147_s0 + $0x378] sm:$0xf0]  ;;  %v4408_v51 = vor.u32 %v5431_v40, %v4405_v45  ;;  %v4632_v40 = vor.u32 %v5487_v27, %v4629_v29  ;;  %v5483_v45 = vld [vmem:[%s6147_s0 + $0x30c] sm:$0xf] }
 0x12e   : > { %2289 = vmatpush.bf16.msrb.mxu0 %v4328_v58  ;;  %v1277_v53 = vpop.f32.mrf.mxu2  ;;  %v4261_v58 = vld [vmem:[%s6147_s0 + $0x58] sm:$0xf0]  ;;  %v4616_v12 = vor.u32 %v5483_v45, %v4613_v47  ;;  %v4915_v47 = vld [vmem:[%s6149_s28 + $0x160] sm:$0xf] }
 0x12f   : > { %2303 = vmatpush.bf16.msrb.mxu1 %v4456_v61  ;;  %v5427_v61 = vld [vmem:[%s6147_s0 + $0x14c] sm:$0xf]  ;;  %v1278_v0 = vadd.f32 %v1277_v53, %v1264_v44  ;;  %v1291_v3 = vpop.f32.mrf.mxu3  ;;  %v4264_v13 = vor.u32 %v5395_v54, %v4261_v58  ;;  %v4485_v44 = vld [vmem:[%s6147_s0 + $0x218] sm:$0xf0]  ;;  %v1168_v54 = vadd.f32 %v6632_v57, %v1154_v46  ;;  %v6749_v58 = vadd.f32 %v6610_v28, %v1166_v7  ;;  %v4819_v28 = vld [vmem:[%s6149_s28 + $0xa0] sm:$0xf] }
 0x130   : > { %2317 = vmatpush.bf16.msrb.mxu2 %v4584_v62  ;;  %v4664_v62 = vor.u32 %v5495_v48, %v4661_v49  ;;  %v4851_v48 = vld [vmem:[%s6149_s28 + $0xe0] sm:$0xf]  ;;  %v5544_v49 = vld [vmem:[%s6149_s28 + $0xec] sm:$0xf0] }
 0x131   : > { %2331 = vmatpush.bf16.msrb.mxu3 %v4712_v5  ;;  %v5459_v5 = vld [vmem:[%s6147_s0 + $0x24c] sm:$0xf]  ;;  %v6720_v11 = vadd.f32 %v1291_v3, %v1278_v0  ;;  %v4852_v53 = vor.u32 %v5544_v49, %v4851_v48  ;;  %v5576_v0 = vld [vmem:[%s6149_s28 + $0x1ec] sm:$0xf0]  ;;  %v6756_v57 = vadd.f32 %v6637_v2, %v1168_v54  ;;  %v6758_v3 = vpop.f32.mrf.mxu1  ;;  %v1208_v54 = vadd.f32 %v6648_v15, %v6644_v10  ;;  %v5542_v10 = vld [vmem:[%s6149_s28 + $0xe4] sm:$0xf] }
 0x132   : > { %2290 = vmatpush.bf16.msrb.mxu0 %v4312_v14  ;;  %v4392_v14 = vor.u32 %v5427_v61, %v4389_v4  ;;  %v6751_v61 = vpop.f32.mrf.mxu0  ;;  %v5536_v4 = vld [vmem:[%s6149_s28 + $0xac] sm:$0xf0]  ;;  %v4853_v15 = vld [vmem:[%s6149_s28 + $0xf0] sm:$0xf0] }
 0x133   : > { %2304 = vmatpush.bf16.msrb.mxu1 %v4440_v17  ;;  %v4520_v17 = vor.u32 %v5459_v5, %v4517_v6  ;;  %v4729_v6 = vmul.f32 -1.442695, %v6749_v58  ;;  %v4820_v2 = vor.u32 %v5536_v4, %v4819_v28  ;;  %v5560_v48 = vld [vmem:[%s6149_s28 + $0x16c] sm:$0xf0] }
 0x134   : > { %2318 = vmatpush.bf16.msrb.mxu2 %v4568_v18  ;;  %v5391_v18 = vld [vmem:[%s6147_s0 + $0x2c] sm:$0xf]  ;;  %v4916_v7 = vor.u32 %v5560_v48, %v4915_v47  ;;  %v5516_v28 = vld [vmem:[%s6149_s28 + $0xc] sm:$0xf0]  ;;  %v4965_v47 = vld [vmem:[%s6149_s28 + $0x1d0] sm:$0xf0] }
 0x135   : > { %2332 = vmatpush.bf16.msrb.mxu3 %v4696_v23  ;;  %v4373_v23 = vld [vmem:[%s6147_s0 + $0x138] sm:$0xf0]  ;;  %v4248_v30 = vor.u32 %v5391_v18, %v4245_v19  ;;  %5733 = vpow2.f32 %v4729_v6  ;;  %v4947_v19 = vld [vmem:[%s6149_s28 + $0x1a0] sm:$0xf] }
 0x136   : > { %2291 = vmatpush.bf16.msrb.mxu0 %v4296_v31  ;;  %v5387_v31 = vld [vmem:[%s6147_s0 + $0xc] sm:$0xf]  ;;  %v4376_v32 = vor.u32 %v5423_v20, %v4373_v23  ;;  %v5568_v20 = vld [vmem:[%s6149_s28 + $0x1ac] sm:$0xf0]  ;;  %v4787_v23 = vld [vmem:[%s6149_s28 + $0x60] sm:$0xf] }
 0x137   : > { %2305 = vmatpush.bf16.msrb.mxu1 %v4424_v33  ;;  %v4504_v33 = vor.u32 %v5455_v24, %v4501_v26  ;;  %v5528_v24 = vld [vmem:[%s6149_s28 + $0x6c] sm:$0xf0]  ;;  %v4948_v26 = vor.u32 %v5568_v20, %v4947_v19  ;;  %v4837_v19 = vld [vmem:[%s6149_s28 + $0xd0] sm:$0xf0]  ;;  %v4867_v20 = vld [vmem:[%s6149_s28 + $0x100] sm:$0xf] }
 0x138   : > { %2319 = vmatpush.bf16.msrb.mxu2 %v4552_v35  ;;  %v4229_v35 = vld [vmem:[%s6147_s0 + $0x18] sm:$0xf0]  ;;  %v4788_v29 = vor.u32 %v5528_v24, %v4787_v23 }
 0x139   : > { %2333 = vmatpush.bf16.msrb.mxu3 %v4680_v42  ;;  %v5451_v42 = vld [vmem:[%s6147_s0 + $0x20c] sm:$0xf] }
 0x13a   : > { %2292 = vmatpush.bf16.msrb.mxu0 %v4280_v50  ;;  %v4232_v50 = vor.u32 %v5387_v31, %v4229_v35  ;;  %v5564_v31 = vld [vmem:[%s6149_s28 + $0x18c] sm:$0xf0] }
 0x13b   : > { %2306 = vmatpush.bf16.msrb.mxu1 %v4408_v51  ;;  %v4360_v51 = vor.u32 %v5419_v36, %v4357_v37  ;;  %v5524_v35 = vld [vmem:[%s6149_s28 + $0x4c] sm:$0xf0]  ;;  %v5734_v37 = vpop.eup %5733 }
 0x13c   : > { %2320 = vmatpush.bf16.msrb.mxu2 %v4536_v52  ;;  %v4488_v52 = vor.u32 %v5451_v42, %v4485_v44  ;;  %v6788_v49 = vadd.f32 1.0, %v5734_v37 }
 0x13d   : > { %2334 = vmatpush.bf16.msrb.mxu3 %v4664_v62  ;;  %v4979_v62 = vld [vmem:[%s6149_s28 + $0x1e0] sm:$0xf] }
 0x13e   : > { %2293 = vmatpush.bf16.msrb.mxu0 %v4264_v13  ;;  %v4980_v5 = vor.u32 %v5576_v0, %v4979_v62  ;;  %v6770_v13 = vpop.f32.mrf.mxu2  ;;  %v4739_v0 = vld [vmem:[%s6149_s28] sm:$0xf]  ;;  %vm2381_vm0 = vweird.f32 %v6788_v49 }
 0x13f   : > { %2307 = vmatpush.bf16.msrb.mxu1 %v4392_v14  ;;  %v5532_v14 = vld [vmem:[%s6149_s28 + $0x8c] sm:$0xf0] }
 0x140   : > { %2321 = vmatpush.bf16.msrb.mxu2 %v4520_v17  ;;  %v6774_v17 = vpop.f32.mrf.mxu3 }
 0x141   : > { %2335 = vmatpush.bf16.msrb.mxu3 %v4648_v21 }
 0x142   : > { %2294 = vmatpush.bf16.msrb.mxu0 %v4248_v30  ;;  %v4931_v30 = vld [vmem:[%s6149_s28 + $0x180] sm:$0xf] }
 0x143   : > { %2308 = vmatpush.bf16.msrb.mxu1 %v4376_v32  ;;  %v4932_v36 = vor.u32 %v5564_v31, %v4931_v30  ;;  %v4981_v31 = vld [vmem:[%s6149_s28 + $0x1f0] sm:$0xf0] }
 0x144   : > { %2322 = vmatpush.bf16.msrb.mxu2 %v4504_v33  ;;  %v4771_v33 = vld [vmem:[%s6149_s28 + $0x40] sm:$0xf] }
 0x145   : > { %2336 = vmatpush.bf16.msrb.mxu3 %v4632_v40  ;;  %v4772_v46 = vor.u32 %v5524_v35, %v4771_v33 }
 0x146   : > { %2295 = vmatpush.bf16.msrb.mxu0 %v4232_v50 }
 0x147   : > { %2309 = vmatpush.bf16.msrb.mxu1 %v4360_v51  ;;  %v1319_v21 = vpop.f32.mrf.mxu1  ;;  %v4755_v51 = vld [vmem:[%s6149_s28 + $0x20] sm:$0xf] }
 0x148   : > { %2323 = vmatpush.bf16.msrb.mxu2 %v4488_v52  ;;  %v5520_v52 = vld [vmem:[%s6149_s28 + $0x2c] sm:$0xf0] }
 0x149   : > { %2337 = vmatpush.bf16.msrb.mxu3 %v4616_v12  ;;  %2296 = vmatmul.bf16.vlgmr.msrb.gmra.mxu0 %v6240_v63  ;;  %v4733_v63 = vmul.f32 -1.442695, %v6756_v57  ;;  %v4756_v41 = vor.u32 %v5520_v52, %v4755_v51  ;;  %v5075_v51 = vld [vmem:[%s6149_s28 + $0x2a0] sm:$0xf]  ;;  %v5600_v52 = vld [vmem:[%s6149_s28 + $0x2ac] sm:$0xf0] }
 0x14a   : > { %3292 = vmatpush.bf16.msra.mxu0 %v4852_v53  ;;  %2310 = vmatmul.bf16.vlgmr.msrb.gmra.mxu1 %v6242_v1  ;;  %v4803_v1 = vld [vmem:[%s6149_s28 + $0x80] sm:$0xf] }
 0x14b   : > { %2324 = vmatmul.bf16.vlgmr.msrb.gmra.mxu2 %v6231_v56  ;;  %3306 = vmatpush.bf16.msra.mxu1 %v4980_v5  ;;  %v4964_v56 = vor.u32 %v5572_v9, %v4963_v8  ;;  %v4804_v18 = vor.u32 %v5532_v14, %v4803_v1  ;;  %5735 = vpow2.f32 %v4733_v63  ;;  %v1222_v8 = vadd.f32 %v6662_v34, %v1208_v54  ;;  %v4883_v1 = vld [vmem:[%s6149_s28 + $0x120] sm:$0xf]  ;;  %v5552_v14 = vld [vmem:[%s6149_s28 + $0x12c] sm:$0xf0]  ;;  %v4949_v54 = vld [vmem:[%s6149_s28 + $0x1b0] sm:$0xf0] }
 0x14c   : > { %2338 = vmatmul.bf16.vlgmr.msrb.gmra.mxu3 %v6236_v60  ;;  %v1305_v60 = vpop.f32.mrf.mxu0  ;;  %5737 = vrcp.f32 %v6788_v49  ;;  %v4740_v63 = vor.u32 %v5516_v28, %v4739_v0 }
 0x14d   : > { %v1320_v27 = vadd.f32 %v1319_v21, %v1305_v60  ;;  %v5538_v60 = vld [vmem:[%s6149_s28 + $0xc4] sm:$0xf]  ;;  %v6821_v24 = vadd.f32 %v6666_v39, %v1222_v8  ;;  %v2385_v8 = vand.u32 2147483647, %v6788_v49 }
 0x14e   : > { %3293 = vmatpush.bf16.msra.mxu0 %v4836_v25  ;;  %v1333_v32 = vpop.f32.mrf.mxu2  ;;  %v5556_v25 = vld [vmem:[%s6149_s28 + $0x14c] sm:$0xf0]  ;;  %v4840_v30 = vor.u32 %v5538_v60, %v4837_v19  ;;  %v5522_v19 = vld [vmem:[%s6149_s28 + $0x44] sm:$0xf] }
 0x14f   : > { %3307 = vmatpush.bf16.msra.mxu1 %v4964_v56  ;;  %v1334_v38 = vadd.f32 %v1333_v32, %v1320_v27  ;;  %v1347_v40 = vpop.f32.mrf.mxu3  ;;  %v1321_v50 = vpop.f32.mrf.mxu1  ;;  %v4900_v4 = vor.u32 %v5556_v25, %v4899_v43  ;;  %v4856_v56 = vor.u32 %v5542_v10, %v4853_v15  ;;  %v5608_v27 = vld [vmem:[%s6149_s28 + $0x2ec] sm:$0xf0]  ;;  %v5534_v32 = vld [vmem:[%s6149_s28 + $0xa4] sm:$0xf]  ;;  %vm6876_vm5 = vcmp.eq.f32.partialorder %v2385_v8, 8.507059e+37 }
 0x150   : > { %v5596_v60 = vld [vmem:[%s6149_s28 + $0x28c] sm:$0xf0] }
 0x151   : > { %v5736_v42 = vpop.eup %5735  ;;  %v6784_v44 = vadd.f32 %v1347_v40, %v1334_v38  ;;  %v5604_v40 = vld [vmem:[%s6149_s28 + $0x2cc] sm:$0xf0] }
 0x152   : > { %3294 = vmatpush.bf16.msra.mxu0 %v4820_v2  ;;  %v6792_v12 = vadd.f32 1.0, %v5736_v42  ;;  %v1210_v2 = vadd.f32 %v6678_v59, %v6676_v55  ;;  %v5548_v55 = vld [vmem:[%s6149_s28 + $0x10c] sm:$0xf0]  ;;  %v6815_v59 = vpop.eup %5737  ;;  %v5570_v42 = vld [vmem:[%s6149_s28 + $0x1c4] sm:$0xf] }
 0x153   : > { %3308 = vmatpush.bf16.msra.mxu1 %v4948_v26  ;;  %v4868_v21 = vor.u32 %v5548_v55, %v4867_v20  ;;  %v5107_v26 = vld [vmem:[%s6149_s28 + $0x2e0] sm:$0xf]  ;;  %v2377_v39 = vmul.f32 %v6815_v59, %v6788_v49  ;;  %vm2382_vm1 = vweird.f32 %v6815_v59  ;;  %v4773_v20 = vld [vmem:[%s6149_s28 + $0x50] sm:$0xf0] }
 0x154   : > { %v1307_v45 = vpop.f32.mrf.mxu0  ;;  %5739 = vrcp.f32 %v6792_v12  ;;  %v1224_v34 = vadd.f32 %v6692_v16, %v1210_v2  ;;  %v4821_v16 = vld [vmem:[%s6149_s28 + $0xb0] sm:$0xf0]  ;;  %v5108_v33 = vor.u32 %v5608_v27, %v5107_v26  ;;  %vm2441_vm2 = vweird.f32 %v6792_v12  ;;  %vm6870_vm4 = vmor %vm2381_vm0, %vm2382_vm1  ;;  %v5545_v26 = vld [vmem:[%s6149_s28 + $0xf4] sm:$0xf0] }
 0x155   : > { %v1322_v53 = vadd.f32 %v1321_v50, %v1307_v45  ;;  %v4730_v45 = vmul.f32 -1.442695, %v6821_v24  ;;  %v4824_v48 = vor.u32 %v5534_v32, %v4821_v16  ;;  %v4968_v50 = vor.u32 %v5570_v42, %v4965_v47  ;;  %v5518_v42 = vld [vmem:[%s6149_s28 + $0x24] sm:$0xf]  ;;  %v4757_v47 = vld [vmem:[%s6149_s28 + $0x30] sm:$0xf0] }
 0x156   : > { %3295 = vmatpush.bf16.msra.mxu0 %v4804_v18  ;;  %v1335_v62 = vpop.f32.mrf.mxu2  ;;  %v4884_v18 = vor.u32 %v5552_v14, %v4883_v1  ;;  %v6835_v38 = vadd.f32 %v6697_v22, %v1224_v34  ;;  %3320 = vmatpush.bf16.msra.mxu2 %v5108_v33  ;;  %v5530_v22 = vld [vmem:[%s6149_s28 + $0x84] sm:$0xf]  ;;  %v2445_v1 = vand.u32 2147483647, %v6792_v12  ;;  %v4933_v34 = vld [vmem:[%s6149_s28 + $0x190] sm:$0xf0] }
 0x157   : > { %3309 = vmatpush.bf16.msra.mxu1 %v4932_v36  ;;  %v1336_v5 = vadd.f32 %v1335_v62, %v1322_v53  ;;  %v1349_v6 = vpop.f32.mrf.mxu3  ;;  %v5091_v36 = vld [vmem:[%s6149_s28 + $0x2c0] sm:$0xf]  ;;  %v4805_v53 = vld [vmem:[%s6149_s28 + $0x90] sm:$0xf0]  ;;  %v5076_v62 = vor.u32 %v5600_v52, %v5075_v51  ;;  %5741 = vpow2.f32 %v4730_v45 }
 0x158   : > { %v4734_v25 = vmul.f32 -1.442695, %v6835_v38  ;;  %v4808_v28 = vor.u32 %v5530_v22, %v4805_v53  ;;  %vm6888_vm7 = vcmp.eq.f32.partialorder %v2445_v1, 8.507059e+37  ;;  %v5043_v45 = vld [vmem:[%s6149_s28 + $0x260] sm:$0xf]  ;;  %v1266_v1 = vadd.f32 %v6758_v3, %v6751_v61 }
 0x159   : > { %v6807_v9 = vadd.f32 %v1349_v6, %v1336_v5  ;;  %v5526_v5 = vld [vmem:[%s6149_s28 + $0x64] sm:$0xf]  ;;  %v4789_v6 = vld [vmem:[%s6149_s28 + $0x70] sm:$0xf0] }
 0x15a   : > { %3296 = vmatpush.bf16.msra.mxu0 %v4788_v29  ;;  %v6818_v23 = vpop.eup %5739  ;;  %v5574_v29 = vld [vmem:[%s6149_s28 + $0x1e4] sm:$0xf]  ;;  %5743 = vpow2.f32 %v4734_v25  ;;  %v4792_v14 = vor.u32 %v5526_v5, %v4789_v6  ;;  %v4917_v51 = vld [vmem:[%s6149_s28 + $0x170] sm:$0xf0] }
 0x15b   : > { %3310 = vmatpush.bf16.msra.mxu1 %v4916_v7  ;;  %v4984_v35 = vor.u32 %v5574_v29, %v4981_v31  ;;  %v2437_v37 = vmul.f32 %v6818_v23, %v6792_v12  ;;  %v5566_v7 = vld [vmem:[%s6149_s28 + $0x1a4] sm:$0xf]  ;;  %vm2442_vm3 = vweird.f32 %v6818_v23  ;;  %v2447_v29 = vand.u32 2147483648, %v6792_v12  ;;  %v5592_v12 = vld [vmem:[%s6149_s28 + $0x26c] sm:$0xf0] }
 0x15c   : > { %v4952_v0 = vor.u32 %v5566_v7, %v4949_v54  ;;  %vm6884_vm6 = vmor %vm2441_vm2, %vm2442_vm3  ;;  %v5514_v5 = vld [vmem:[%s6149_s28 + $0x4] sm:$0xf] }
 0x15d   : > { %v2438_v43 = vsub.f32 1.0, %v2437_v37  ;;  %v5742_v32 = vpop.eup %5741  ;;  %v2448_v22 = vor.u32 1.1754944e-38, %v2447_v29  ;;  %v4885_v29 = vld [vmem:[%s6149_s28 + $0x130] sm:$0xf0] }
 0x15e   : > { %3297 = vmatpush.bf16.msra.mxu0 %v4772_v46  ;;  %v5092_v46 = vor.u32 %v5604_v40, %v5091_v36  ;;  %v4776_v40 = vor.u32 %v5522_v19, %v4773_v20  ;;  %v5011_v19 = vld [vmem:[%s6149_s28 + $0x220] sm:$0xf]  ;;  %v5584_v20 = vld [vmem:[%s6149_s28 + $0x22c] sm:$0xf0] }
 0x15f   : > { %3311 = vmatpush.bf16.msra.mxu1 %v4900_v4  ;;  %v2439_v15 = vmul.f32 %v6818_v23, %v2438_v43 }
 0x160   : > { %3321 = vmatpush.bf16.msra.mxu2 %v5092_v46  ;;  %v5744_v37 = vpop.eup %5743 }
 0x161   : > { %v2440_v27 = vadd.f32 %v6818_v23, %v2439_v15  ;;  %v6906_v43 = vadd.f32 1.0, %v5744_v37  ;;  %v4869_v37 = vld [vmem:[%s6149_s28 + $0x110] sm:$0xf0] }
 0x162   : > { %3298 = vmatpush.bf16.msra.mxu0 %v4756_v41  ;;  %v2378_v41 = vsub.f32 1.0, %v2377_v39 }
 0x163   : > { %3312 = vmatpush.bf16.msra.mxu1 %v4884_v18  ;;  %v5562_v18 = vld [vmem:[%s6149_s28 + $0x184] sm:$0xf]  ;;  %v2444_v7 = vsel %vm6884_vm6, %v6818_v23, %v2440_v27  ;;  %v4741_v23 = vld [vmem:[%s6149_s28 + $0x10] sm:$0xf0]  ;;  %v5012_v27 = vor.u32 %v5584_v20, %v5011_v19  ;;  %vm2456_vm10 = vweird.f32 %v6906_v43 }
 0x164   : > { %v2379_v10 = vmul.f32 %v6815_v59, %v2378_v41  ;;  %3322 = vmatpush.bf16.msra.mxu2 %v5076_v62  ;;  %v4936_v31 = vor.u32 %v5562_v18, %v4933_v34  ;;  %v6904_v41 = vadd.f32 1.0, %v5742_v32  ;;  %v4744_v18 = vor.u32 %v5514_v5, %v4741_v23  ;;  %v5203_v23 = vld [vmem:[%s6149_s28 + $0x3a0] sm:$0xf] }
 0x165   : > { %v4731_v5 = vmul.f32 -1.442695, %v6720_v11 }
 0x166   : > { %3299 = vmatpush.bf16.msra.mxu0 %v4740_v63  ;;  %v2129_v4 = vpop.f32.mrf.mxu0  ;;  %v2387_v63 = vand.u32 2147483648, %v6788_v49  ;;  %5745 = vrcp.f32 %v6904_v41  ;;  %vm2396_vm8 = vweird.f32 %v6904_v41 }
 0x167   : > { %3313 = vmatpush.bf16.msra.mxu1 %v4868_v21  ;;  %v2143_v2 = vpop.f32.mrf.mxu1  ;;  %v2380_v21 = vadd.f32 %v6815_v59, %v2379_v10  ;;  %v4901_v10 = vld [vmem:[%s6149_s28 + $0x150] sm:$0xf0]  ;;  %5747 = vrcp.f32 %v6906_v43 }
 0x168   : > { %v2388_v49 = vor.u32 1.1754944e-38, %v2387_v63  ;;  %v2144_v36 = vadd.f32 %v2143_v2, %v2129_v4  ;;  %v5554_v4 = vld [vmem:[%s6149_s28 + $0x144] sm:$0xf]  ;;  %v2449_v2 = vsel %vm6888_vm7, %v2448_v22, %v2444_v7  ;;  %v5219_v7 = vld [vmem:[%s6149_s28 + $0x3c0] sm:$0xf]  ;;  %5749 = vpow2.f32 %v4731_v5 }
 0x169   : > { %v2384_v52 = vsel %vm6870_vm4, %v6815_v59, %v2380_v21  ;;  %v5027_v59 = vld [vmem:[%s6149_s28 + $0x240] sm:$0xf]  ;;  %v4904_v63 = vor.u32 %v5554_v4, %v4901_v10  ;;  %v2500_v61 = vmul.f32 %v2449_v2, %v6756_v57  ;;  %v4859_v21 = vld [vmem:[%s6149_s28 + $0xe8] sm:$0xf]  ;;  %v5546_v57 = vld [vmem:[%s6149_s28 + $0x104] sm:$0xf] }
 0x16a   : > { %3348 = vmatpush.bf16.msrb.mxu0 %v4856_v56  ;;  %v5059_v56 = vld [vmem:[%s6149_s28 + $0x280] sm:$0xf]  ;;  %v2389_v15 = vsel %vm6876_vm5, %v2388_v49, %v2384_v52  ;;  %v5580_v49 = vld [vmem:[%s6149_s28 + $0x20c] sm:$0xf0]  ;;  %v4860_v33 = vor.u32 %v5545_v26, %v4859_v21  ;;  %v5077_v2 = vld [vmem:[%s6149_s28 + $0x2b0] sm:$0xf0] }
 0x16b   : > { %3362 = vmatpush.bf16.msrb.mxu1 %v4984_v35  ;;  %v5060_v55 = vor.u32 %v5596_v60, %v5059_v56  ;;  %v2496_v34 = vmul.f32 %v2389_v15, %v6749_v58  ;;  %v4995_v58 = vld [vmem:[%s6149_s28 + $0x200] sm:$0xf]  ;;  %v4843_v35 = vld [vmem:[%s6149_s28 + $0xc8] sm:$0xf]  ;;  %v5598_v15 = vld [vmem:[%s6149_s28 + $0x2a4] sm:$0xf] }
 0x16c   : > { %v5187_v26 = vld [vmem:[%s6149_s28 + $0x380] sm:$0xf] }
 0x16d   : > { %3323 = vmatpush.bf16.msra.mxu2 %v5060_v55  ;;  %v5550_v55 = vld [vmem:[%s6149_s28 + $0x124] sm:$0xf] }
 0x16e   : > { %3349 = vmatpush.bf16.msrb.mxu0 %v4840_v30  ;;  %v2157_v30 = vpop.f32.mrf.mxu2  ;;  %v2131_v46 = vpop.f32.mrf.mxu0 }
 0x16f   : > { %3363 = vmatpush.bf16.msrb.mxu1 %v4968_v50  ;;  %v2171_v39 = vpop.f32.mrf.mxu3  ;;  %v5558_v50 = vld [vmem:[%s6149_s28 + $0x164] sm:$0xf]  ;;  %v2145_v53 = vpop.f32.mrf.mxu1  ;;  %v2158_v25 = vadd.f32 %v2157_v30, %v2144_v36  ;;  %v4888_v30 = vor.u32 %v5550_v55, %v4885_v29  ;;  %v5541_v36 = vld [vmem:[%s6149_s28 + $0xd4] sm:$0xf0] }
 0x170   : > { %v4920_v54 = vor.u32 %v5558_v50, %v4917_v51  ;;  %v2146_v62 = vadd.f32 %v2145_v53, %v2131_v46  ;;  %v5606_v46 = vld [vmem:[%s6149_s28 + $0x2e4] sm:$0xf]  ;;  %v5109_v50 = vld [vmem:[%s6149_s28 + $0x2f0] sm:$0xf0]  ;;  %v4844_v53 = vor.u32 %v5541_v36, %v4843_v35  ;;  %v2462_v36 = vand.u32 2147483648, %v6906_v43 }
 0x171   : > { %v5112_v52 = vor.u32 %v5606_v46, %v5109_v50  ;;  %v5594_v29 = vld [vmem:[%s6149_s28 + $0x284] sm:$0xf]  ;;  %v4987_v35 = vld [vmem:[%s6149_s28 + $0x1e8] sm:$0xf] }
 0x172   : > { %3350 = vmatpush.bf16.msrb.mxu0 %v4824_v48  ;;  %v5044_v48 = vor.u32 %v5592_v12, %v5043_v45  ;;  %v5235_v45 = vld [vmem:[%s6149_s28 + $0x3e0] sm:$0xf]  ;;  %v5640_v12 = vld [vmem:[%s6149_s28 + $0x3ec] sm:$0xf0] }
 0x173   : > { %3364 = vmatpush.bf16.msrb.mxu1 %v4952_v0  ;;  %v4760_v0 = vor.u32 %v5518_v42, %v4757_v47  ;;  %v4872_v42 = vor.u32 %v5546_v57, %v4869_v37 }
 0x174   : > { %3324 = vmatpush.bf16.msra.mxu2 %v5044_v48  ;;  %v5236_v48 = vor.u32 %v5640_v12, %v5235_v45  ;;  %v5525_v45 = vld [vmem:[%s6149_s28 + $0x54] sm:$0xf0] }
 0x176   : > { %3351 = vmatpush.bf16.msrb.mxu0 %v4808_v28  ;;  %v5588_v28 = vld [vmem:[%s6149_s28 + $0x24c] sm:$0xf0]  ;;  %v2159_v8 = vpop.f32.mrf.mxu2  ;;  %3334 = vmatpush.bf16.msra.mxu3 %v5236_v48 }
 0x177   : > { %3365 = vmatpush.bf16.msrb.mxu1 %v4936_v31  ;;  %v5028_v6 = vor.u32 %v5588_v28, %v5027_v59  ;;  %v2160_v56 = vadd.f32 %v2159_v8, %v2146_v62  ;;  %v2173_v60 = vpop.f32.mrf.mxu3  ;;  %v1280_v31 = vadd.f32 %v6770_v13, %v1266_v1  ;;  %v5093_v62 = vld [vmem:[%s6149_s28 + $0x2d0] sm:$0xf0]  ;;  %v5537_v59 = vld [vmem:[%s6149_s28 + $0xb4] sm:$0xf0] }
 0x179   : > { %3325 = vmatpush.bf16.msra.mxu2 %v5028_v6  ;;  %v2174_v3 = vadd.f32 %v2173_v60, %v2160_v56  ;;  %v6948_v51 = vadd.f32 %v6774_v17, %v1280_v31  ;;  %v5632_v6 = vld [vmem:[%s6149_s28 + $0x3ac] sm:$0xf0]  ;;  %v5533_v56 = vld [vmem:[%s6149_s28 + $0x94] sm:$0xf0]  ;;  %v2402_v31 = vand.u32 2147483648, %v6904_v41 }
 0x17a   : > { %3352 = vmatpush.bf16.msrb.mxu0 %v4792_v14  ;;  %v2172_v14 = vadd.f32 %v2171_v39, %v2158_v25  ;;  %v4996_v39 = vor.u32 %v5580_v49, %v4995_v58  ;;  %v5602_v25 = vld [vmem:[%s6149_s28 + $0x2c4] sm:$0xf]  ;;  %v5204_v60 = vor.u32 %v5632_v6, %v5203_v23  ;;  %v2460_v58 = vand.u32 2147483647, %v6906_v43 }
 0x17b   : > { %3366 = vmatpush.bf16.msrb.mxu1 %v4920_v54  ;;  %v2508_v16 = vmul.f32 %v2500_v61, %v2174_v3  ;;  %v5636_v54 = vld [vmem:[%s6149_s28 + $0x3cc] sm:$0xf0]  ;;  %v5096_v4 = vor.u32 %v5602_v25, %v5093_v62  ;;  %v4735_v10 = vmul.f32 -1.442695, %v6948_v51  ;;  %v4795_v61 = vld [vmem:[%s6149_s28 + $0x68] sm:$0xf] }
 0x17c   : > { %v2504_v32 = vmul.f32 %v2496_v34, %v2172_v14  ;;  %v5220_v28 = vor.u32 %v5636_v54, %v5219_v7  ;;  %v4811_v14 = vld [vmem:[%s6149_s28 + $0x88] sm:$0xf]  ;;  %v5529_v3 = vld [vmem:[%s6149_s28 + $0x74] sm:$0xf0]  ;;  %v5590_v7 = vld [vmem:[%s6149_s28 + $0x264] sm:$0xf] }
 0x17d   : > { %3326 = vmatpush.bf16.msra.mxu2 %v5012_v27  ;;  %5751 = vpow2.f32 %v4735_v10  ;;  %v4812_v34 = vor.u32 %v5533_v56, %v4811_v14  ;;  %v5628_v27 = vld [vmem:[%s6149_s28 + $0x38c] sm:$0xf0]  ;;  %v4796_v37 = vor.u32 %v5529_v3, %v4795_v61  ;;  %v5045_v25 = vld [vmem:[%s6149_s28 + $0x270] sm:$0xf0]  ;;  %v2403_v62 = vor.u32 1.1754944e-38, %v2402_v31 }
 0x17e   : > { %3353 = vmatpush.bf16.msrb.mxu0 %v4776_v40  ;;  %v6937_v40 = vpop.eup %5745  ;;  %v6939_v13 = vpack.c.bf16 %v2508_v16, %v2504_v32  ;;  %3335 = vmatpush.bf16.msra.mxu3 %v5220_v28  ;;  %v5188_v32 = vor.u32 %v5628_v27, %v5187_v26  ;;  %v5061_v16 = vld [vmem:[%s6149_s28 + $0x290] sm:$0xf0]  ;;  %vm7013_vm15 = vcmp.eq.f32.partialorder %v2460_v58, 8.507059e+37  ;;  %v4763_v10 = vld [vmem:[%s6149_s28 + $0x28] sm:$0xf] }
 0x17f   : > { %3367 = vmatpush.bf16.msrb.mxu1 %v4904_v63  ;;  %v6944_v47 = vpop.eup %5747  ;;  %v2392_v22 = vmul.f32 %v6937_v40, %v6904_v41  ;;  %vm2397_vm9 = vweird.f32 %v6937_v40  ;;  %v5064_v49 = vor.u32 %v5594_v29, %v5061_v16  ;;  %v5586_v14 = vld [vmem:[%s6149_s28 + $0x244] sm:$0xf]  ;;  %v5517_v61 = vld [vmem:[%s6149_s28 + $0x14] sm:$0xf0]  ;;  %v5139_v27 = vld [vmem:[%s6149_s28 + $0x320] sm:$0xf] }
 0x180   : > { %3300 = vmatmul.bf16.vlgmr.msra.gmra.mxu0 %v6939_v13  ;;  %v2452_v17 = vmul.f32 %v6944_v47, %v6906_v43  ;;  %vm2457_vm11 = vweird.f32 %v6944_v47  ;;  %v5750_v57 = vpop.eup %5749  ;;  %vm6989_vm12 = vmor %vm2396_vm8, %vm2397_vm9  ;;  %v5048_v43 = vor.u32 %v5590_v7, %v5045_v25  ;;  %v5616_v29 = vld [vmem:[%s6149_s28 + $0x32c] sm:$0xf0]  ;;  %v5543_v31 = vld [vmem:[%s6149_s28 + $0xec] sm:$0xf] }
 0x181   : > { %3327 = vmatpush.bf16.msra.mxu2 %v4996_v39  ;;  %v2393_v8 = vsub.f32 1.0, %v2392_v22  ;;  %vm7008_vm14 = vmor %vm2456_vm10, %vm2457_vm11  ;;  %v5140_v16 = vor.u32 %v5616_v29, %v5139_v27  ;;  %v5013_v58 = vld [vmem:[%s6149_s28 + $0x230] sm:$0xf0]  ;;  %v4845_v7 = vld [vmem:[%s6149_s28 + $0xd8] sm:$0xf0] }
 0x182   : > { %3354 = vmatpush.bf16.msrb.mxu0 %v4760_v0  ;;  %v4827_v0 = vld [vmem:[%s6149_s28 + $0xa8] sm:$0xf]  ;;  %v2453_v1 = vsub.f32 1.0, %v2452_v17  ;;  %3336 = vmatpush.bf16.msra.mxu3 %v5204_v60  ;;  %v5029_v60 = vld [vmem:[%s6149_s28 + $0x250] sm:$0xf0] }
 0x183   : > { %3368 = vmatpush.bf16.msrb.mxu1 %v4888_v30  ;;  %v4828_v63 = vor.u32 %v5537_v59, %v4827_v0  ;;  %v2394_v20 = vmul.f32 %v6937_v40, %v2393_v8  ;;  %v2400_v30 = vand.u32 2147483647, %v6904_v41  ;;  %v5752_v12 = vpop.eup %5751  ;;  %v5171_v41 = vld [vmem:[%s6149_s28 + $0x360] sm:$0xf]  ;;  %v7017_v0 = vadd.f32 1.0, %v5750_v57 }
 0x184   : > { %v2454_v21 = vmul.f32 %v6944_v47, %v2453_v1  ;;  %v7023_v5 = vadd.f32 1.0, %v5752_v12  ;;  %v5620_v1 = vld [vmem:[%s6149_s28 + $0x34c] sm:$0xf0]  ;;  %v4971_v25 = vld [vmem:[%s6149_s28 + $0x1c8] sm:$0xf] }
 0x185   : > { %3376 = vmatpush.bf16.msrb.mxu2 %v5112_v52  ;;  %v5624_v52 = vld [vmem:[%s6149_s28 + $0x36c] sm:$0xf0]  ;;  %vm7000_vm13 = vcmp.eq.f32.partialorder %v2400_v30, 8.507059e+37  ;;  %5753 = vrcp.f32 %v7017_v0  ;;  %v5582_v30 = vld [vmem:[%s6149_s28 + $0x224] sm:$0xf]  ;;  %vm2411_vm0 = vweird.f32 %v7017_v0 }
 0x186   : > { %3355 = vmatpush.bf16.msrb.mxu0 %v4744_v18  ;;  %v5080_v18 = vor.u32 %v5598_v15, %v5077_v2  ;;  %v2185_v19 = vpop.f32.mrf.mxu0  ;;  %v2455_v46 = vadd.f32 %v6944_v47, %v2454_v21  ;;  %3337 = vmatpush.bf16.msra.mxu3 %v5188_v32  ;;  %v5172_v54 = vor.u32 %v5624_v52, %v5171_v41  ;;  %v5521_v15 = vld [vmem:[%s6149_s28 + $0x34] sm:$0xf0]  ;;  %5755 = vrcp.f32 %v7023_v5  ;;  %v4861_v32 = vld [vmem:[%s6149_s28 + $0xf8] sm:$0xf0]  ;;  %v5539_v52 = vld [vmem:[%s6149_s28 + $0xcc] sm:$0xf] }
 0x187   : > { %3369 = vmatpush.bf16.msrb.mxu1 %v4872_v42  ;;  %v2199_v55 = vpop.f32.mrf.mxu1  ;;  %v4779_v42 = vld [vmem:[%s6149_s28 + $0x48] sm:$0xf]  ;;  %vm2471_vm2 = vweird.f32 %v7023_v5 }
 0x188   : > { %v2200_v48 = vadd.f32 %v2199_v55, %v2185_v19  ;;  %v4780_v6 = vor.u32 %v5525_v45, %v4779_v42  ;;  %v2459_v2 = vsel %vm7008_vm14, %v6944_v47, %v2455_v46  ;;  %v4764_v55 = vor.u32 %v5521_v15, %v4763_v10  ;;  %v5634_v10 = vld [vmem:[%s6149_s28 + $0x3c4] sm:$0xf] }
 0x189   : > { %3377 = vmatpush.bf16.msrb.mxu2 %v5096_v4  ;;  %v2463_v4 = vor.u32 1.1754944e-38, %v2462_v36  ;;  %v5577_v36 = vld [vmem:[%s6149_s28 + $0x1f4] sm:$0xf0]  ;;  %v4864_v46 = vor.u32 %v5543_v31, %v4861_v32  ;;  %v5527_v31 = vld [vmem:[%s6149_s28 + $0x6c] sm:$0xf] }
 0x18a   : > { %3404 = vmatpush.bf16.msra.mxu0 %v4860_v33  ;;  %v2395_v33 = vadd.f32 %v6937_v40, %v2394_v20  ;;  %3338 = vmatpush.bf16.msra.mxu3 %v5172_v54  ;;  %v4988_v41 = vor.u32 %v5577_v36, %v4987_v35  ;;  %v2415_v35 = vand.u32 2147483647, %v7017_v0 }
 0x18b   : > { %v2464_v19 = vsel %vm7013_vm15, %v2463_v4, %v2459_v2  ;;  %v7052_v42 = vpop.eup %5753  ;;  %v5535_v2 = vld [vmem:[%s6149_s28 + $0xac] sm:$0xf] }
 0x18c   : > { %v2399_v28 = vsel %vm6989_vm12, %v6937_v40, %v2395_v33  ;;  %v5155_v40 = vld [vmem:[%s6149_s28 + $0x340] sm:$0xf]  ;;  %v2501_v57 = vmul.f32 %v2464_v19, %v6835_v38  ;;  %v5612_v38 = vld [vmem:[%s6149_s28 + $0x30c] sm:$0xf0]  ;;  %v5531_v19 = vld [vmem:[%s6149_s28 + $0x8c] sm:$0xf]  ;;  %vm2412_vm1 = vweird.f32 %v7052_v42 }
 0x18d   : > { %3378 = vmatpush.bf16.msrb.mxu2 %v5080_v18  ;;  %v5156_v56 = vor.u32 %v5620_v1, %v5155_v40  ;;  %v5032_v18 = vor.u32 %v5586_v14, %v5029_v60  ;;  %v2404_v47 = vsel %vm7000_vm13, %v2403_v62, %v2399_v28  ;;  %v5573_v62 = vld [vmem:[%s6149_s28 + $0x1d4] sm:$0xf0]  ;;  %v5237_v28 = vld [vmem:[%s6149_s28 + $0x3f0] sm:$0xf0]  ;;  %v4955_v40 = vld [vmem:[%s6149_s28 + $0x1a8] sm:$0xf] }
 0x18e   : > { %3405 = vmatpush.bf16.msra.mxu0 %v4844_v53  ;;  %v2213_v39 = vpop.f32.mrf.mxu2  ;;  %v2187_v59 = vpop.f32.mrf.mxu0  ;;  %v4997_v53 = vld [vmem:[%s6149_s28 + $0x210] sm:$0xf0]  ;;  %v4972_v15 = vor.u32 %v5573_v62, %v4971_v25  ;;  %v5569_v1 = vld [vmem:[%s6149_s28 + $0x1b4] sm:$0xf0]  ;;  %vm7113_vm4 = vmor %vm2411_vm0, %vm2412_vm1  ;;  %vm7120_vm5 = vcmp.eq.f32.partialorder %v2415_v35, 8.507059e+37 }
 0x18f   : > { %v2227_v50 = vpop.f32.mrf.mxu3  ;;  %v2201_v23 = vpop.f32.mrf.mxu1  ;;  %v2214_v8 = vadd.f32 %v2213_v39, %v2200_v48  ;;  %3339 = vmatpush.bf16.msra.mxu3 %v5156_v56  ;;  %v5016_v39 = vor.u32 %v5582_v30, %v5013_v58  ;;  %v5578_v48 = vld [vmem:[%s6149_s28 + $0x204] sm:$0xf]  ;;  %v5173_v25 = vld [vmem:[%s6149_s28 + $0x370] sm:$0xf0] }
 0x190   : > { %3356 = vmatmul.bf16.vlgmr.msrb.gmra.mxu0 %v6939_v13  ;;  %v5000_v17 = vor.u32 %v5578_v48, %v4997_v53  ;;  %v5523_v48 = vld [vmem:[%s6149_s28 + $0x4c] sm:$0xf]  ;;  %v5622_v53 = vld [vmem:[%s6149_s28 + $0x364] sm:$0xf] }
 0x191   : > { %3379 = vmatpush.bf16.msrb.mxu2 %v5064_v49  ;;  %v2228_v3 = vadd.f32 %v2227_v50, %v2214_v8  ;;  %v2497_v49 = vmul.f32 %v2404_v47, %v6821_v24  ;;  %v5123_v24 = vld [vmem:[%s6149_s28 + $0x300] sm:$0xf]  ;;  %v7057_v50 = vpop.eup %5755  ;;  %v4829_v8 = vld [vmem:[%s6149_s28 + $0xb8] sm:$0xf0] }
 0x192   : > { %3406 = vmatpush.bf16.msra.mxu0 %v4828_v63  ;;  %v2202_v63 = vadd.f32 %v2201_v23, %v2187_v59  ;;  %v5124_v22 = vor.u32 %v5612_v38, %v5123_v24  ;;  %v5638_v59 = vld [vmem:[%s6149_s28 + $0x3e4] sm:$0xf]  ;;  %v2467_v4 = vmul.f32 %v7057_v50, %v7023_v5  ;;  %v4848_v23 = vor.u32 %v5539_v52, %v4845_v7 }
 0x193   : > { %v2505_v45 = vmul.f32 %v2497_v49, %v2228_v3  ;;  %3340 = vmatpush.bf16.msra.mxu3 %v5140_v16  ;;  %v4832_v47 = vor.u32 %v5535_v2, %v4829_v8  ;;  %v4736_v3 = vmul.f32 -1.442695, %v6807_v9  ;;  %v4797_v49 = vld [vmem:[%s6149_s28 + $0x78] sm:$0xf0]  ;;  %vm2472_vm3 = vweird.f32 %v7057_v50 }
 0x194   : > { %v2468_v60 = vsub.f32 1.0, %v2467_v4  ;;  %v2477_v24 = vand.u32 2147483648, %v7023_v5  ;;  %v4800_v38 = vor.u32 %v5527_v31, %v4797_v49  ;;  %v5557_v4 = vld [vmem:[%s6149_s28 + $0x154] sm:$0xf0]  ;;  %vm7128_vm6 = vmor %vm2471_vm2, %vm2472_vm3  ;;  %v5141_v49 = vld [vmem:[%s6149_s28 + $0x330] sm:$0xf0] }
 0x195   : > { %3380 = vmatpush.bf16.msrb.mxu2 %v5048_v43  ;;  %v2407_v43 = vmul.f32 %v7052_v42, %v7017_v0  ;;  %v4957_v8 = vld [vmem:[%s6149_s28 + $0x1b8] sm:$0xf0] }
 0x196   : > { %3407 = vmatpush.bf16.msra.mxu0 %v4812_v34  ;;  %v2215_v20 = vpop.f32.mrf.mxu2  ;;  %v4747_v34 = vld [vmem:[%s6149_s28 + $0x8] sm:$0xf]  ;;  %v2469_v36 = vmul.f32 %v7057_v50, %v2468_v60 }
 0x197   : > { %v2216_v21 = vadd.f32 %v2215_v20, %v2202_v63  ;;  %v2229_v26 = vpop.f32.mrf.mxu3  ;;  %3341 = vmatpush.bf16.msra.mxu3 %v5124_v22  ;;  %v5221_v63 = vld [vmem:[%s6149_s28 + $0x3d0] sm:$0xf0]  ;;  %v2408_v56 = vsub.f32 1.0, %v2407_v43  ;;  %v4956_v20 = vor.u32 %v5569_v1, %v4955_v40  ;;  %v4781_v22 = vld [vmem:[%s6149_s28 + $0x58] sm:$0xf0] }
 0x198   : > { %v5224_v14 = vor.u32 %v5634_v10, %v5221_v63  ;;  %v5176_v10 = vor.u32 %v5622_v53, %v5173_v25  ;;  %v2478_v63 = vor.u32 1.1754944e-38, %v2477_v24  ;;  %v4784_v40 = vor.u32 %v5523_v48, %v4781_v22  ;;  %v5519_v1 = vld [vmem:[%s6149_s28 + $0x2c] sm:$0xf]  ;;  %v5610_v22 = vld [vmem:[%s6149_s28 + $0x304] sm:$0xf] }
 0x199   : > { %3381 = vmatpush.bf16.msrb.mxu2 %v5032_v18  ;;  %v2230_v33 = vadd.f32 %v2229_v26, %v2216_v21  ;;  %v4732_v18 = vmul.f32 -1.442695, %v6784_v44  ;;  %v4939_v21 = vld [vmem:[%s6149_s28 + $0x188] sm:$0xf]  ;;  %v5565_v26 = vld [vmem:[%s6149_s28 + $0x194] sm:$0xf0]  ;;  %v2409_v32 = vmul.f32 %v7052_v42, %v2408_v56 }
 0x19a   : > { %3408 = vmatpush.bf16.msra.mxu0 %v4796_v37  ;;  %v4748_v37 = vor.u32 %v5517_v61, %v4747_v34  ;;  %v5630_v34 = vld [vmem:[%s6149_s28 + $0x3a4] sm:$0xf]  ;;  %v5205_v61 = vld [vmem:[%s6149_s28 + $0x3b0] sm:$0xf0]  ;;  %v4940_v58 = vor.u32 %v5565_v26, %v4939_v21 }
 0x19b   : > { %v2509_v12 = vmul.f32 %v2501_v57, %v2230_v33  ;;  %v5208_v27 = vor.u32 %v5630_v34, %v5205_v61  ;;  %5757 = vpow2.f32 %v4732_v18  ;;  %v5626_v57 = vld [vmem:[%s6149_s28 + $0x384] sm:$0xf]  ;;  %v5189_v33 = vld [vmem:[%s6149_s28 + $0x390] sm:$0xf0]  ;;  %v4765_v18 = vld [vmem:[%s6149_s28 + $0x38] sm:$0xf0] }
 0x19c   : > { %5759 = vpow2.f32 %v4736_v3  ;;  %v4891_v3 = vld [vmem:[%s6149_s28 + $0x128] sm:$0xf]  ;;  %v5125_v53 = vld [vmem:[%s6149_s28 + $0x310] sm:$0xf0] }
 0x19d   : > { %3382 = vmatpush.bf16.msrb.mxu2 %v5016_v39  ;;  %v7062_v54 = vpack.c.bf16 %v2509_v12, %v2505_v45  ;;  %v4923_v39 = vld [vmem:[%s6149_s28 + $0x168] sm:$0xf]  ;;  %v2417_v45 = vand.u32 2147483648, %v7017_v0  ;;  %v5192_v12 = vor.u32 %v5626_v57, %v5189_v33 }
 0x19e   : > { %3409 = vmatpush.bf16.msra.mxu0 %v4780_v6  ;;  %v5240_v6 = vor.u32 %v5638_v59, %v5237_v28  ;;  %v4907_v28 = vld [vmem:[%s6149_s28 + $0x148] sm:$0xf] }
 0x19f   : > { %3314 = vmatmul.bf16.vlgmr.msra.gmra.mxu1 %v7062_v54  ;;  %v2418_v2 = vor.u32 1.1754944e-38, %v2417_v45  ;;  %v4908_v60 = vor.u32 %v5557_v4, %v4907_v28  ;;  %v4989_v45 = vld [vmem:[%s6149_s28 + $0x1f8] sm:$0xf0]  ;;  %v5099_v4 = vld [vmem:[%s6149_s28 + $0x2c8] sm:$0xf] }
 0x1a0   : > { %3418 = vmatpush.bf16.msra.mxu1 %v4988_v41  ;;  %3390 = vmatpush.bf16.msrb.mxu3 %v5240_v6  ;;  %v2410_v41 = vadd.f32 %v7052_v42, %v2409_v32  ;;  %v5128_v6 = vor.u32 %v5610_v22, %v5125_v53 }
 0x1a1   : > { %3383 = vmatpush.bf16.msrb.mxu2 %v5000_v17  ;;  %v2470_v17 = vadd.f32 %v7057_v50, %v2469_v36  ;;  %v4875_v36 = vld [vmem:[%s6149_s28 + $0x108] sm:$0xf] }
 0x1a2   : > { %3410 = vmatpush.bf16.msra.mxu0 %v4764_v55  ;;  %v4813_v55 = vld [vmem:[%s6149_s28 + $0x98] sm:$0xf0] }
 0x1a3   : > { %v4816_v30 = vor.u32 %v5531_v19, %v4813_v55  ;;  %v5157_v19 = vld [vmem:[%s6149_s28 + $0x350] sm:$0xf0] }
 0x1a4   : > { %3419 = vmatpush.bf16.msra.mxu1 %v4972_v15  ;;  %3391 = vmatpush.bf16.msrb.mxu3 %v5224_v14  ;;  %v2414_v14 = vsel %vm7113_vm4, %v7052_v42, %v2410_v41  ;;  %v5553_v42 = vld [vmem:[%s6149_s28 + $0x134] sm:$0xf0]  ;;  %v5115_v41 = vld [vmem:[%s6149_s28 + $0x2e8] sm:$0xf] }
 0x1a5   : > { %v4892_v32 = vor.u32 %v5553_v42, %v4891_v3 }
 0x1a6   : > { %3411 = vmatpush.bf16.msra.mxu0 %v4748_v37  ;;  %v2241_v29 = vpop.f32.mrf.mxu0  ;;  %v5561_v37 = vld [vmem:[%s6149_s28 + $0x174] sm:$0xf0] }
 0x1a7   : > { %v2255_v16 = vpop.f32.mrf.mxu1  ;;  %v4924_v7 = vor.u32 %v5561_v37, %v4923_v39  ;;  %v5549_v39 = vld [vmem:[%s6149_s28 + $0x114] sm:$0xf0]  ;;  %v5575_v37 = vld [vmem:[%s6149_s28 + $0x1ec] sm:$0xf] }
 0x1a8   : > { %3420 = vmatpush.bf16.msra.mxu1 %v4956_v20  ;;  %3392 = vmatpush.bf16.msrb.mxu3 %v5208_v27  ;;  %v2256_v59 = vadd.f32 %v2255_v16, %v2241_v29  ;;  %v2474_v20 = vsel %vm7128_vm6, %v7057_v50, %v2470_v17  ;;  %v4768_v27 = vor.u32 %v5519_v1, %v4765_v18  ;;  %v5515_v29 = vld [vmem:[%s6149_s28 + $0xc] sm:$0xf]  ;;  %v4749_v16 = vld [vmem:[%s6149_s28 + $0x18] sm:$0xf0]  ;;  %v5601_v1 = vld [vmem:[%s6149_s28 + $0x2b4] sm:$0xf0] }
 0x1a9   : > { %3412 = vmatmul.bf16.vlgmr.msra.gmra.mxu0 %v6939_v13  ;;  %v2419_v50 = vsel %vm7120_vm5, %v2418_v2, %v2414_v14  ;;  %v4752_v48 = vor.u32 %v5515_v29, %v4749_v16  ;;  %v4992_v17 = vor.u32 %v5575_v37, %v4989_v45  ;;  %v5567_v2 = vld [vmem:[%s6149_s28 + $0x1ac] sm:$0xf]  ;;  %v5069_v37 = vld [vmem:[%s6149_s28 + $0x298] sm:$0xf0] }
 0x1aa   : > { %3460 = vmatpush.bf16.msrb.mxu0 %v4864_v46  ;;  %v2475_v46 = vand.u32 2147483647, %v7023_v5  ;;  %v4960_v14 = vor.u32 %v5567_v2, %v4957_v8 }
 0x1ac   : > { %3421 = vmatpush.bf16.msra.mxu1 %v4940_v58  ;;  %3393 = vmatpush.bf16.msrb.mxu3 %v5192_v12  ;;  %vm7132_vm7 = vcmp.eq.f32.partialorder %v2475_v46, 8.507059e+37  ;;  %v5614_v58 = vld [vmem:[%s6149_s28 + $0x324] sm:$0xf]  ;;  %v2498_v46 = vmul.f32 %v2419_v50, %v6720_v11  ;;  %v4973_v11 = vld [vmem:[%s6149_s28 + $0x1d8] sm:$0xf0] }
 0x1ad   : > { %v5144_v12 = vor.u32 %v5614_v58, %v5141_v49 }
 0x1ae   : > { %3461 = vmatpush.bf16.msrb.mxu0 %v4848_v23  ;;  %v2269_v52 = vpop.f32.mrf.mxu2  ;;  %v5758_v23 = vpop.eup %5757 }
 0x1af   : > { %v2283_v43 = vpop.f32.mrf.mxu3  ;;  %v5760_v15 = vpop.eup %5759  ;;  %3370 = vmatmul.bf16.vlgmr.msrb.gmra.mxu1 %v7062_v54  ;;  %v7147_v55 = vadd.f32 1.0, %v5758_v23  ;;  %v2270_v34 = vadd.f32 %v2269_v52, %v2256_v59  ;;  %v5609_v52 = vld [vmem:[%s6149_s28 + $0x2f4] sm:$0xf0] }
 0x1b0   : > { %v2243_v5 = vpop.f32.mrf.mxu0  ;;  %3422 = vmatpush.bf16.msra.mxu1 %v4924_v7  ;;  %v2257_v56 = vpop.f32.mrf.mxu1  ;;  %v7151_v21 = vadd.f32 1.0, %v5760_v15  ;;  %3394 = vmatpush.bf16.msrb.mxu3 %v5176_v10  ;;  %v4876_v7 = vor.u32 %v5549_v39, %v4875_v36  ;;  %v5116_v59 = vor.u32 %v5609_v52, %v5115_v41  ;;  %v5605_v23 = vld [vmem:[%s6149_s28 + $0x2d4] sm:$0xf0]  ;;  %v4909_v36 = vld [vmem:[%s6149_s28 + $0x158] sm:$0xf0] }
 0x1b1   : > { %v2258_v61 = vadd.f32 %v2257_v56, %v2243_v5  ;;  %5761 = vrcp.f32 %v7147_v55  ;;  %v2284_v57 = vadd.f32 %v2283_v43, %v2270_v34  ;;  %v5571_v43 = vld [vmem:[%s6149_s28 + $0x1cc] sm:$0xf]  ;;  %v5100_v15 = vor.u32 %v5605_v23, %v5099_v4  ;;  %v5019_v4 = vld [vmem:[%s6149_s28 + $0x228] sm:$0xf]  ;;  %v5585_v23 = vld [vmem:[%s6149_s28 + $0x234] sm:$0xf0] }
 0x1b2   : > { %3462 = vmatpush.bf16.msrb.mxu0 %v4832_v47  ;;  %v5618_v47 = vld [vmem:[%s6149_s28 + $0x344] sm:$0xf]  ;;  %5763 = vrcp.f32 %v7151_v21  ;;  %v4976_v10 = vor.u32 %v5571_v43, %v4973_v11  ;;  %v5563_v56 = vld [vmem:[%s6149_s28 + $0x18c] sm:$0xf]  ;;  %vm2426_vm8 = vweird.f32 %v7147_v55  ;;  %vm2486_vm10 = vweird.f32 %v7151_v21 }
 0x1b3   : > { %v5160_v26 = vor.u32 %v5618_v47, %v5157_v19  ;;  %v2506_v25 = vmul.f32 %v2498_v46, %v2284_v57  ;;  %v5067_v19 = vld [vmem:[%s6149_s28 + $0x288] sm:$0xf]  ;;  %v2432_v58 = vand.u32 2147483648, %v7147_v55  ;;  %v2492_v49 = vand.u32 2147483648, %v7151_v21 }
 0x1b4   : > { %3423 = vmatpush.bf16.msra.mxu1 %v4908_v60  ;;  %v4941_v60 = vld [vmem:[%s6149_s28 + $0x198] sm:$0xf0]  ;;  %v5020_v8 = vor.u32 %v5585_v23, %v5019_v4 }
 0x1b5   : > { %3395 = vmatpush.bf16.msrb.mxu3 %v5160_v26  ;;  %v4944_v3 = vor.u32 %v5563_v56, %v4941_v60  ;;  %v5559_v26 = vld [vmem:[%s6149_s28 + $0x16c] sm:$0xf]  ;;  %v2493_v22 = vor.u32 1.1754944e-38, %v2492_v49  ;;  %v5117_v60 = vld [vmem:[%s6149_s28 + $0x2f8] sm:$0xf0] }
 0x1b6   : > { %3463 = vmatpush.bf16.msrb.mxu0 %v4816_v30  ;;  %v2479_v30 = vsel %vm7132_vm7, %v2478_v63, %v2474_v20  ;;  %v2271_v31 = vpop.f32.mrf.mxu2  ;;  %v5597_v20 = vld [vmem:[%s6149_s28 + $0x294] sm:$0xf0]  ;;  %v5607_v56 = vld [vmem:[%s6149_s28 + $0x2ec] sm:$0xf]  ;;  %v5085_v49 = vld [vmem:[%s6149_s28 + $0x2b8] sm:$0xf0] }
 0x1b7   : > { %v2272_v33 = vadd.f32 %v2271_v31, %v2258_v61  ;;  %v2285_v35 = vpop.f32.mrf.mxu3  ;;  %v2502_v24 = vmul.f32 %v2479_v30, %v6948_v51  ;;  %v7175_v51 = vpop.eup %5761  ;;  %v5068_v42 = vor.u32 %v5597_v20, %v5067_v19  ;;  %v5051_v30 = vld [vmem:[%s6149_s28 + $0x268] sm:$0xf]  ;;  %v5593_v31 = vld [vmem:[%s6149_s28 + $0x274] sm:$0xf0] }
 0x1b8   : > { %3424 = vmatpush.bf16.msra.mxu1 %v4892_v32  ;;  %v7181_v0 = vpop.eup %5763  ;;  %v2422_v63 = vmul.f32 %v7175_v51, %v7147_v55  ;;  %vm2427_vm9 = vweird.f32 %v7175_v51  ;;  %v2430_v32 = vand.u32 2147483647, %v7147_v55  ;;  %v5625_v55 = vld [vmem:[%s6149_s28 + $0x374] sm:$0xf0] }
 0x1b9   : > { %3396 = vmatpush.bf16.msrb.mxu3 %v5144_v12  ;;  %v2482_v5 = vmul.f32 %v7181_v0, %v7151_v21  ;;  %vm2487_vm11 = vweird.f32 %v7181_v0  ;;  %vm7216_vm12 = vmor %vm2426_vm8, %vm2427_vm9  ;;  %v2490_v12 = vand.u32 2147483647, %v7151_v21 }
 0x1ba   : > { %3464 = vmatpush.bf16.msrb.mxu0 %v4800_v38  ;;  %v2286_v38 = vadd.f32 %v2285_v35, %v2272_v33  ;;  %v2423_v18 = vsub.f32 1.0, %v2422_v63  ;;  %v5052_v33 = vor.u32 %v5593_v31, %v5051_v30  ;;  %v5555_v35 = vld [vmem:[%s6149_s28 + $0x14c] sm:$0xf]  ;;  %vm7228_vm13 = vmor %vm2486_vm10, %vm2487_vm11  ;;  %vm7232_vm14 = vcmp.eq.f32.partialorder %v2430_v32, 8.507059e+37  ;;  %v4877_v63 = vld [vmem:[%s6149_s28 + $0x118] sm:$0xf0] }
 0x1bb   : > { %v2483_v47 = vsub.f32 1.0, %v2482_v5  ;;  %v4912_v52 = vor.u32 %v5555_v35, %v4909_v36  ;;  %vm2491_vm15 = vcmp.eq.f32.partialorder %v2490_v12, 8.507059e+37  ;;  %v5227_v30 = vld [vmem:[%s6149_s28 + $0x3c8] sm:$0xf]  ;;  %v5637_v31 = vld [vmem:[%s6149_s28 + $0x3d4] sm:$0xf0] }
 0x1bc   : > { %v2510_v62 = vmul.f32 %v2502_v24, %v2286_v38  ;;  %3425 = vmatpush.bf16.msra.mxu1 %v4876_v7  ;;  %v2424_v29 = vmul.f32 %v7175_v51, %v2423_v18  ;;  %v5035_v38 = vld [vmem:[%s6149_s28 + $0x248] sm:$0xf]  ;;  %v2433_v7 = vor.u32 1.1754944e-38, %v2432_v58  ;;  %v5599_v58 = vld [vmem:[%s6149_s28 + $0x2ac] sm:$0xf] }
 0x1bd   : > { %3397 = vmatpush.bf16.msrb.mxu3 %v5128_v6  ;;  %v2484_v50 = vmul.f32 %v7181_v0, %v2483_v47  ;;  %v5088_v35 = vor.u32 %v5599_v58, %v5085_v49 }
 0x1be   : > { %3465 = vmatpush.bf16.msrb.mxu0 %v4784_v40  ;;  %v7177_v28 = vpack.c.bf16 %v2510_v62, %v2506_v25  ;;  %v5083_v40 = vld [vmem:[%s6149_s28 + $0x2a8] sm:$0xf]  ;;  %v2425_v39 = vadd.f32 %v7175_v51, %v2424_v29  ;;  %v5551_v62 = vld [vmem:[%s6149_s28 + $0x12c] sm:$0xf] }
 0x1bf   : > { %3426 = vmatmul.bf16.vlgmr.msra.gmra.mxu1 %v7062_v54  ;;  %v2485_v45 = vadd.f32 %v7181_v0, %v2484_v50  ;;  %v5603_v50 = vld [vmem:[%s6149_s28 + $0x2cc] sm:$0xf] }
 0x1c0   : > { %3328 = vmatmul.bf16.vlgmr.msra.gmra.mxu2 %v7177_v28  ;;  %3474 = vmatpush.bf16.msrb.mxu1 %v4992_v17  ;;  %v4893_v17 = vld [vmem:[%s6149_s28 + $0x138] sm:$0xf0] }
 0x1c1   : > { %3432 = vmatpush.bf16.msra.mxu2 %v5116_v59  ;;  %v2429_v59 = vsel %vm7216_vm12, %v7175_v51, %v2425_v39  ;;  %v2489_v43 = vsel %vm7228_vm13, %v7181_v0, %v2485_v45  ;;  %v5547_v0 = vld [vmem:[%s6149_s28 + $0x10c] sm:$0xf]  ;;  %v5629_v45 = vld [vmem:[%s6149_s28 + $0x394] sm:$0xf0] }
 0x1c2   : > { %3466 = vmatpush.bf16.msrb.mxu0 %v4768_v27  ;;  %v4925_v27 = vld [vmem:[%s6149_s28 + $0x178] sm:$0xf0]  ;;  %v2494_v2 = vsel %vm2491_vm15, %v2493_v22, %v2489_v43  ;;  %v4880_v20 = vor.u32 %v5547_v0, %v4877_v63  ;;  %v5595_v39 = vld [vmem:[%s6149_s28 + $0x28c] sm:$0xf]  ;;  %v5147_v43 = vld [vmem:[%s6149_s28 + $0x328] sm:$0xf] }
 0x1c3   : > { %v4928_v16 = vor.u32 %v5559_v26, %v4925_v27  ;;  %v2503_v47 = vmul.f32 %v2494_v2, %v6807_v9  ;;  %v5120_v27 = vor.u32 %v5607_v56, %v5117_v60  ;;  %v5072_v12 = vor.u32 %v5595_v39, %v5069_v37  ;;  %v5037_v22 = vld [vmem:[%s6149_s28 + $0x258] sm:$0xf0]  ;;  %v5613_v2 = vld [vmem:[%s6149_s28 + $0x314] sm:$0xf0] }
 0x1c4   : > { %3475 = vmatpush.bf16.msrb.mxu1 %v4976_v10  ;;  %v4896_v10 = vor.u32 %v5551_v62, %v4893_v17  ;;  %v5583_v17 = vld [vmem:[%s6149_s28 + $0x22c] sm:$0xf]  ;;  %v5213_v56 = vld [vmem:[%s6149_s28 + $0x3b8] sm:$0xf0] }
 0x1c5   : > { %3433 = vmatpush.bf16.msra.mxu2 %v5100_v15  ;;  %v2434_v15 = vsel %vm7232_vm14, %v2433_v7, %v2429_v59  ;;  %v5587_v7 = vld [vmem:[%s6149_s28 + $0x24c] sm:$0xf]  ;;  %v5021_v59 = vld [vmem:[%s6149_s28 + $0x238] sm:$0xf0] }
 0x1c6   : > { %3467 = vmatpush.bf16.msrb.mxu0 %v4752_v48  ;;  %v2297_v34 = vpop.f32.mrf.mxu0  ;;  %v5589_v48 = vld [vmem:[%s6149_s28 + $0x254] sm:$0xf0]  ;;  %v2499_v18 = vmul.f32 %v2434_v15, %v6784_v44  ;;  %v5101_v44 = vld [vmem:[%s6149_s28 + $0x2d8] sm:$0xf0]  ;;  %v5024_v4 = vor.u32 %v5583_v17, %v5021_v59  ;;  %v5131_v15 = vld [vmem:[%s6149_s28 + $0x308] sm:$0xf] }
 0x1c7   : > { %v2311_v61 = vpop.f32.mrf.mxu1  ;;  %v5036_v21 = vor.u32 %v5589_v48, %v5035_v38  ;;  %v5104_v32 = vor.u32 %v5603_v50, %v5101_v44  ;;  %v5053_v38 = vld [vmem:[%s6149_s28 + $0x278] sm:$0xf0]  ;;  %v5179_v48 = vld [vmem:[%s6149_s28 + $0x368] sm:$0xf]  ;;  %v5132_v63 = vor.u32 %v5613_v2, %v5131_v15  ;;  %v5611_v50 = vld [vmem:[%s6149_s28 + $0x30c] sm:$0xf] }
 0x1c8   : > { %3476 = vmatpush.bf16.msrb.mxu1 %v4960_v14  ;;  %v2312_v46 = vadd.f32 %v2311_v61, %v2297_v34  ;;  %v5581_v14 = vld [vmem:[%s6149_s28 + $0x214] sm:$0xf0]  ;;  %v5243_v34 = vld [vmem:[%s6149_s28 + $0x3e8] sm:$0xf]  ;;  %v5133_v44 = vld [vmem:[%s6149_s28 + $0x318] sm:$0xf0] }
 0x1c9   : > { %3468 = vmatmul.bf16.vlgmr.msrb.gmra.mxu0 %v6939_v13  ;;  %v5084_v13 = vor.u32 %v5601_v1, %v5083_v40  ;;  %v5003_v1 = vld [vmem:[%s6149_s28 + $0x208] sm:$0xf]  ;;  %v5641_v61 = vld [vmem:[%s6149_s28 + $0x3f4] sm:$0xf0] }
 0x1ca   : > { %v5244_v29 = vor.u32 %v5641_v61, %v5243_v34  ;;  %v5181_v34 = vld [vmem:[%s6149_s28 + $0x378] sm:$0xf0] }
 0x1cb   : > { %3434 = vmatpush.bf16.msra.mxu2 %v5084_v13 }
 0x1cc   : > { %3477 = vmatpush.bf16.msrb.mxu1 %v4944_v3  ;;  %v5004_v3 = vor.u32 %v5581_v14, %v5003_v1  ;;  %v5229_v1 = vld [vmem:[%s6149_s28 + $0x3d8] sm:$0xf0] }
 0x1ce   : > { %v2325_v57 = vpop.f32.mrf.mxu2  ;;  %v2299_v53 = vpop.f32.mrf.mxu0 }
 0x1cf   : > { %3435 = vmatpush.bf16.msra.mxu2 %v5068_v42  ;;  %v2339_v24 = vpop.f32.mrf.mxu3  ;;  %v2313_v25 = vpop.f32.mrf.mxu1  ;;  %v2326_v11 = vadd.f32 %v2325_v57, %v2312_v46  ;;  %v5211_v57 = vld [vmem:[%s6149_s28 + $0x3a8] sm:$0xf] }
 0x1d0   : > { %3384 = vmatmul.bf16.vlgmr.msrb.gmra.mxu2 %v7177_v28  ;;  %3478 = vmatpush.bf16.msrb.mxu1 %v4928_v16  ;;  %v2314_v6 = vadd.f32 %v2313_v25, %v2299_v53  ;;  %v5228_v16 = vor.u32 %v5637_v31, %v5227_v30  ;;  %v5163_v53 = vld [vmem:[%s6149_s28 + $0x348] sm:$0xf]  ;;  %v5621_v25 = vld [vmem:[%s6149_s28 + $0x354] sm:$0xf0]  ;;  %v5136_v30 = vor.u32 %v5611_v50, %v5133_v44 }
 0x1d1   : > { %v2340_v5 = vadd.f32 %v2339_v24, %v2326_v11  ;;  %v5591_v24 = vld [vmem:[%s6149_s28 + $0x26c] sm:$0xf]  ;;  %v5164_v62 = vor.u32 %v5621_v25, %v5163_v53  ;;  %v5617_v11 = vld [vmem:[%s6149_s28 + $0x334] sm:$0xf0] }
 0x1d2   : > { %v5056_v41 = vor.u32 %v5591_v24, %v5053_v38  ;;  %v5148_v23 = vor.u32 %v5617_v11, %v5147_v43 }
 0x1d3   : > { %3436 = vmatpush.bf16.msra.mxu2 %v5052_v33  ;;  %v2507_v42 = vmul.f32 %v2499_v18, %v2340_v5  ;;  %v5633_v33 = vld [vmem:[%s6149_s28 + $0x3b4] sm:$0xf0]  ;;  %v5627_v18 = vld [vmem:[%s6149_s28 + $0x38c] sm:$0xf] }
 0x1d4   : > { %3479 = vmatpush.bf16.msrb.mxu1 %v4912_v52  ;;  %v5212_v36 = vor.u32 %v5633_v33, %v5211_v57  ;;  %v5180_v52 = vor.u32 %v5625_v55, %v5179_v48  ;;  %v2520_v48 = vld [vmem:[#allocation2 + $0x8] sm:$0xff] }
 0x1d6   : > { %v2327_v51 = vpop.f32.mrf.mxu2 }
 0x1d7   : > { %3437 = vmatpush.bf16.msra.mxu2 %v5036_v21  ;;  %v2328_v40 = vadd.f32 %v2327_v51, %v2314_v6  ;;  %v2341_v13 = vpop.f32.mrf.mxu3  ;;  %v5040_v21 = vor.u32 %v5587_v7, %v5037_v22  ;;  %v5579_v6 = vld [vmem:[%s6149_s28 + $0x20c] sm:$0xf] }
 0x1d8   : > { %3480 = vmatpush.bf16.msrb.mxu1 %v4896_v10  ;;  %v5005_v10 = vld [vmem:[%s6149_s28 + $0x218] sm:$0xf0]  ;;  %v5639_v51 = vld [vmem:[%s6149_s28 + $0x3ec] sm:$0xf] }
 0x1d9   : > { %v2342_v19 = vadd.f32 %v2341_v13, %v2328_v40  ;;  %v5008_v0 = vor.u32 %v5579_v6, %v5005_v10  ;;  %v5635_v40 = vld [vmem:[%s6149_s28 + $0x3cc] sm:$0xf] }
 0x1da   : > { %v5232_v14 = vor.u32 %v5635_v40, %v5229_v1  ;;  %v5631_v13 = vld [vmem:[%s6149_s28 + $0x3ac] sm:$0xf] }
 0x1db   : > { %3438 = vmatpush.bf16.msra.mxu2 %v5020_v8  ;;  %v2511_v26 = vmul.f32 %v2503_v47, %v2342_v19  ;;  %v5245_v8 = vld [vmem:[%s6149_s28 + $0x3f8] sm:$0xf0]  ;;  %v5216_v60 = vor.u32 %v5631_v13, %v5213_v56 }
 0x1dc   : > { %3481 = vmatpush.bf16.msrb.mxu1 %v4880_v20  ;;  %v5248_v5 = vor.u32 %v5639_v51, %v5245_v8  ;;  %v5197_v47 = vld [vmem:[%s6149_s28 + $0x398] sm:$0xf0]  ;;  %v5623_v20 = vld [vmem:[%s6149_s28 + $0x36c] sm:$0xf] }
 0x1dd   : > { %v7261_v9 = vpack.c.bf16 %v2511_v26, %v2507_v42  ;;  %v5200_v19 = vor.u32 %v5627_v18, %v5197_v47  ;;  %v5184_v61 = vor.u32 %v5623_v20, %v5181_v34  ;;  %v5615_v26 = vld [vmem:[%s6149_s28 + $0x32c] sm:$0xf] }
 0x1de   : > { %v2522_v47 = vld [vmem:[#allocation2 + $0x28] sm:$0xff] }
 0x1df   : > { %3439 = vmatpush.bf16.msra.mxu2 %v5004_v3  ;;  %3342 = vmatmul.bf16.vlgmr.msra.gmra.mxu3 %v7261_v9  ;;  %v5619_v3 = vld [vmem:[%s6149_s28 + $0x34c] sm:$0xf] }
 0x1e0   : > { %3446 = vmatpush.bf16.msra.mxu3 %v5244_v29  ;;  %3482 = vmatmul.bf16.vlgmr.msrb.gmra.mxu1 %v7062_v54  ;;  %v5195_v54 = vld [vmem:[%s6149_s28 + $0x388] sm:$0xf] }
 0x1e1   : > { %v5196_v46 = vor.u32 %v5629_v45, %v5195_v54 }
 0x1e2   : > { %3440 = vmatmul.bf16.vlgmr.msra.gmra.mxu2 %v7177_v28 }
 0x1e3   : > { %3488 = vmatpush.bf16.msrb.mxu2 %v5120_v27  ;;  %v5149_v27 = vld [vmem:[%s6149_s28 + $0x338] sm:$0xf0] }
 0x1e4   : > { %3447 = vmatpush.bf16.msra.mxu3 %v5228_v16  ;;  %v5152_v29 = vor.u32 %v5615_v26, %v5149_v27  ;;  %v2519_v27 = vld [vmem:[#allocation2 + $0x10] sm:$0xff] }
 0x1e7   : > { %3489 = vmatpush.bf16.msrb.mxu2 %v5104_v32 }
 0x1e8   : > { %3448 = vmatpush.bf16.msra.mxu3 %v5212_v36  ;;  %v2516_v36 = vld [vmem:[#allocation2 + $0x30] sm:$0xff] }
 0x1eb   : > { %3490 = vmatpush.bf16.msrb.mxu2 %v5088_v35 }
 0x1ec   : > { %3449 = vmatpush.bf16.msra.mxu3 %v5196_v46 }
 0x1ef   : > { %3491 = vmatpush.bf16.msrb.mxu2 %v5072_v12  ;;  %3398 = vmatmul.bf16.vlgmr.msrb.gmra.mxu3 %v7261_v9 }
 0x1f0   : > { %3450 = vmatpush.bf16.msra.mxu3 %v5180_v52 }
 0x1f3   : > { %3492 = vmatpush.bf16.msrb.mxu2 %v5056_v41 }
 0x1f4   : > { %3451 = vmatpush.bf16.msra.mxu3 %v5164_v62 }
 0x1f7   : > { %3493 = vmatpush.bf16.msrb.mxu2 %v5040_v21  ;;  %v2517_v21 = vld [vmem:[#allocation2] sm:$0xff] }
 0x1f8   : > { %3452 = vmatpush.bf16.msra.mxu3 %v5148_v23  ;;  %v2521_v23 = vld [vmem:[#allocation2 + $0x20] sm:$0xff] }
 0x1fb   : > { %3494 = vmatpush.bf16.msrb.mxu2 %v5024_v4 }
 0x1fc   : > { %3453 = vmatpush.bf16.msra.mxu3 %v5132_v63  ;;  %v2518_v63 = vld [vmem:[#allocation2 + $0x18] sm:$0xff] }
 0x1fd   : > { %v3301_v32 = vpop.f32.mrf.mxu0 }
 0x1ff   : > { %3495 = vmatpush.bf16.msrb.mxu2 %v5008_v0  ;;  %3454 = vmatmul.bf16.vlgmr.msra.gmra.mxu3 %v7261_v9 }
 0x200   : > { %3502 = vmatpush.bf16.msrb.mxu3 %v5248_v5 }
 0x202   : > { %3496 = vmatmul.bf16.vlgmr.msrb.gmra.mxu2 %v7177_v28  ;;  %v5165_v28 = vld [vmem:[%s6149_s28 + $0x358] sm:$0xf0] }
 0x203   : > { %v5168_v42 = vor.u32 %v5619_v3, %v5165_v28 }
 0x204   : > { %3503 = vmatpush.bf16.msrb.mxu3 %v5232_v14 }
 0x205   : > { %v3303_v49 = vpop.f32.mrf.mxu0 }
 0x208   : > { %3504 = vmatpush.bf16.msrb.mxu3 %v5216_v60 }
 0x20c   : > { %3505 = vmatpush.bf16.msrb.mxu3 %v5200_v19 }
 0x20d   : > { %v3357_v12 = vpop.f32.mrf.mxu0 }
 0x210   : > { %3506 = vmatpush.bf16.msrb.mxu3 %v5184_v61 }
 0x214   : > { %3507 = vmatpush.bf16.msrb.mxu3 %v5168_v42 }
 0x215   : > { %v3359_v22 = vpop.f32.mrf.mxu0 }
 0x218   : > { %3508 = vmatpush.bf16.msrb.mxu3 %v5152_v29 }
 0x21c   : > { %3509 = vmatpush.bf16.msrb.mxu3 %v5136_v30  ;;  %v3315_v31 = vpop.f32.mrf.mxu1 }
 0x21d   : > { %v3316_v33 = vadd.f32 %v3315_v31, %v3301_v32 }
 0x21f   : > { %3510 = vmatmul.bf16.vlgmr.msrb.gmra.mxu3 %v7261_v9 }
 0x224   : > { %v3317_v58 = vpop.f32.mrf.mxu1 }
 0x225   : > { %v3318_v46 = vadd.f32 %v3317_v58, %v3303_v49  ;;  %v2523_v49 = vld [vmem:[#allocation2 + $0x38] sm:$0xff] }
 0x226   : > { %v3413_v15 = vpop.f32.mrf.mxu0 }
 0x22c   : > { %v3371_v45 = vpop.f32.mrf.mxu1 }
 0x22d   : > { %v3372_v52 = vadd.f32 %v3371_v45, %v3357_v12 }
 0x22e   : > { %v3415_v13 = vpop.f32.mrf.mxu0 }
 0x234   : > { %v3373_v7 = vpop.f32.mrf.mxu1 }
 0x235   : > { %v3374_v43 = vadd.f32 %v3373_v7, %v3359_v22 }
 0x23c   : > { %v3427_v4 = vpop.f32.mrf.mxu1 }
 0x23d   : > { %v3428_v8 = vadd.f32 %v3427_v4, %v3413_v15 }
 0x243   : > { %v3329_v16 = vpop.f32.mrf.mxu2 }
 0x244   : > { %v3330_v35 = vadd.f32 %v3329_v16, %v3316_v33  ;;  %v3429_v1 = vpop.f32.mrf.mxu1 }
 0x245   : > { %v3430_v60 = vadd.f32 %v3429_v1, %v3415_v13 }
 0x246   : > { %v3469_v3 = vpop.f32.mrf.mxu0 }
 0x24b   : > { %v3331_v57 = vpop.f32.mrf.mxu2 }
 0x24c   : > { %v3332_v38 = vadd.f32 %v3331_v57, %v3318_v46 }
 0x24e   : > { %v3471_v31 = vpop.f32.mrf.mxu0 }
 0x253   : > { %v3385_v24 = vpop.f32.mrf.mxu2 }
 0x254   : > { %v3386_v53 = vadd.f32 %v3385_v24, %v3372_v52 }
 0x25b   : > { %v3387_v25 = vpop.f32.mrf.mxu2 }
 0x25c   : > { %v3388_v11 = vadd.f32 %v3387_v25, %v3374_v43 }
 0x25d   : > { %v3483_v61 = vpop.f32.mrf.mxu1 }
 0x25e   : > { %v3484_v42 = vadd.f32 %v3483_v61, %v3469_v3 }
 0x262   : > { %v3343_v39 = vpop.f32.mrf.mxu3 }
 0x263   : > { %v3344_v37 = vadd.f32 %v3343_v39, %v3330_v35 }
 0x265   : > { %v3516_v54 = vadd.f32 %v3344_v37, %v2516_v36  ;;  %v3441_v2 = vpop.f32.mrf.mxu2  ;;  %v3485_v44 = vpop.f32.mrf.mxu1 }
 0x266   : > { %v3442_v0 = vadd.f32 %v3441_v2, %v3428_v8  ;;  %v3486_v16 = vadd.f32 %v3485_v44, %v3471_v31 }
 0x267   : > { %3524 = vst [vmem:[#allocation2 + $0x30] sm:$0xff] %v3516_v54 }
 0x26a   : > { %v3345_v9 = vpop.f32.mrf.mxu3 }
 0x26b   : > { %v3346_v55 = vadd.f32 %v3345_v9, %v3332_v38 }
 0x26d   : > { %v3520_v41 = vadd.f32 %v3346_v55, %v2520_v48  ;;  %v3443_v56 = vpop.f32.mrf.mxu2 }
 0x26e   : > { %v3444_v18 = vadd.f32 %v3443_v56, %v3430_v60 }
 0x26f   : > { %3528 = vst [vmem:[#allocation2 + $0x8] sm:$0xff] %v3520_v41 }
 0x272   : > { %v3399_v62 = vpop.f32.mrf.mxu3 }
 0x273   : > { %v3400_v17 = vadd.f32 %v3399_v62, %v3386_v53 }
 0x275   : > { %v3517_v59 = vadd.f32 %v3400_v17, %v2517_v21 }
 0x277   : > { %3525 = vst [vmem:[#allocation2] sm:$0xff] %v3517_v59 }
 0x27a   : > { %v3401_v6 = vpop.f32.mrf.mxu3 }
 0x27b   : > { %v3402_v10 = vadd.f32 %v3401_v6, %v3388_v11 }
 0x27d   : > { %v3521_v51 = vadd.f32 %v3402_v10, %v2521_v23 }
 0x27f   : > { %3529 = vst [vmem:[#allocation2 + $0x20] sm:$0xff] %v3521_v51 }
 0x282   : > { %v3455_v5 = vpop.f32.mrf.mxu3 }
 0x283   : > { %v3456_v40 = vadd.f32 %v3455_v5, %v3442_v0 }
 0x285   : > { %v3518_v14 = vadd.f32 %v3456_v40, %v2518_v63  ;;  %v3497_v28 = vpop.f32.mrf.mxu2 }
 0x286   : > { %v3498_v26 = vadd.f32 %v3497_v28, %v3484_v42 }
 0x287   : > { %3526 = vst [vmem:[#allocation2 + $0x18] sm:$0xff] %v3518_v14 }
 0x28a   : > { %v3457_v19 = vpop.f32.mrf.mxu3 }
 0x28b   : > { %v3458_v20 = vadd.f32 %v3457_v19, %v3444_v18 }
 0x28d   : > { %v3522_v34 = vadd.f32 %v3458_v20, %v2522_v47  ;;  %v3499_v32 = vpop.f32.mrf.mxu2 }
 0x28e   : > { %v3500_v58 = vadd.f32 %v3499_v32, %v3486_v16 }
 0x28f   : > { %3530 = vst [vmem:[#allocation2 + $0x28] sm:$0xff] %v3522_v34 }
 0x2a2   : > { %v3511_v29 = vpop.f32.mrf.mxu3 }
 0x2a3   : > { %v3512_v50 = vadd.f32 %v3511_v29, %v3498_v26 }
 0x2a5   : > { %v3519_v30 = vadd.f32 %v3512_v50, %v2519_v27 }
 0x2a7   : > { %3527 = vst [vmem:[#allocation2 + $0x10] sm:$0xff] %v3519_v30 }
 0x2aa   : > { %v3513_v57 = vpop.f32.mrf.mxu3 }
 0x2ab   : > { %v3514_v33 = vadd.f32 %v3513_v57, %v3500_v58  ;;  %3535 = sbr.rel (%p5249_p2) target bundleno = 697 (0x2b9), region = 60 }
 0x2ad   : > { %v3523_v35 = vadd.f32 %v3514_v33, %v2523_v49 }
 0x2af   : > { %3531 = vst [vmem:[#allocation2 + $0x38] sm:$0xff] %v3523_v35 }
 0x2b0   : > { %v3536_v36 = vld [vmem:[#allocation2 + $0x30] sm:$0xff]  ;;  %v3537_v39 = vld [vmem:[#allocation2] sm:$0xff]  ;;  %v3538_v37 = vld [vmem:[#allocation2 + $0x18] sm:$0xff] }
 0x2b1   : > { %3544 = vst [vmem:[#allocation11] sm:$0xff] %v3536_v36  ;;  %v3539_v54 = vld [vmem:[#allocation2 + $0x10] sm:$0xff]  ;;  %v3540_v45 = vld [vmem:[#allocation2 + $0x8] sm:$0xff]  ;;  %v3541_v12 = vld [vmem:[#allocation2 + $0x20] sm:$0xff] }
 0x2b2   : > { %3545 = vst [vmem:[#allocation11 + $0x8] sm:$0xff] %v3537_v39  ;;  %v3542_v46 = vld [vmem:[#allocation2 + $0x28] sm:$0xff] }
 0x2b3   : > { %3546 = vst [vmem:[#allocation11 + $0x10] sm:$0xff] %v3538_v37 }
 0x2b4   : > { %3547 = vst [vmem:[#allocation11 + $0x18] sm:$0xff] %v3539_v54 }
 0x2b5   : > { %3548 = vst [vmem:[#allocation11 + $0x20] sm:$0xff] %v3540_v45 }
 0x2b6   : > { %v3543_v24 = vld [vmem:[#allocation2 + $0x38] sm:$0xff]  ;;  %3549 = vst [vmem:[#allocation11 + $0x28] sm:$0xff] %v3541_v12 }
 0x2b7   : > { %3550 = vst [vmem:[#allocation11 + $0x30] sm:$0xff] %v3542_v46 }
 0x2b8   : > { %3551 = vst [vmem:[#allocation11 + $0x38] sm:$0xff] %v3543_v24 }
 0x2b9 PF: > { %p5673_p3 = scmp.eq.s32.totalorder %s6090_s5, 3  ;;  %s3563_s12 = sshll.u32 %s7339_s4, 4  ;;  %s3564_s12 = int_to_ptr.hbm [resolvable:$true] %s3563_s12 }
 0x2ba   : > { %s5984_s13 = smov [#allocation11]   ;;  %s5985_s30 = smov 512  }
 0x2bb   : > { %s3561_s14 = sshll.u32 %s5984_s13, 4  ;;  %s5986_s25 = smov 32   ;;  %s3562_s14 = int_to_ptr.vmem [resolvable:$true] %s3561_s14 }
 0x2bc   : > { %5653 = dma.vmem_to_hbm [thread:$0]  (%p5673_p3), %s3562_s14, 1024, %s3564_s12, [#allocation5], %s5985_s30, %s5985_s30, %s5986_s25  }
 0x2bd   : > { %5950 = dma.done.wait (%p5673_p3), [#allocation5], 1024  }
 0x2be   : > { %5952 = vsyncadd (%p5673_p3), [#allocation5], 4294966272 }
 0x2bf PF: > { %s22_s20 = sadd.s32 1, %s5975_s20   ;;  %s7385_s5 = sld [smem:[#allocation17_spill]] }
 0x2c0   : > { %p19_p4 = scmp.ge.s32.totalorder %s22_s20, 6   ;;  %s7386_s27 = sld [smem:[#allocation16_spill]] }
 0x2c1   : > { %s7387_s15 = smov %s5959_s16  ;;  %s7388_s16 = smov %s5963_s17 }
 0x2c2   : > { %s7390_s18 = smov %s5971_s19  ;;  %21 = sbr.rel (!%p19_p4) target bundleno = 12 (0xc), region = 112 }
 0x2c5   : > { %s7389_s17 = smov %s7385_s5 }
 0x2c6   : > { %s7391_s19 = smov %s7386_s27 }
 0x2c7   :  { %3580 = vsyncpa [#allocation4], 1 }
 0x2c8   :  { %3582 = vsyncpa [#allocation4 + $0x1], 1 }
 0x2c9   :  { %3583 = vsyncpa [#allocation7], 1 }
 0x2ca   :  { %3585 = vsyncpa [#allocation7 + $0x1], 1 }
 0x2cb   :  { %3586 = vsyncpa [#allocation10], 1 }
 0x2cc   :  { %3588 = vsyncpa [#allocation10 + $0x1], 1 }
 0x2cd   :  { %3589 = vsyncpa [#allocation5], 1 }
 0x2ce   :  { %3591 = vsyncpa [#allocation5 + $0x1], 1 }

</bundles_post_ra>
